<compile_context>
chip_gen: v6e
topology: v6e:2x2x1
jax: 0.10.0
libtpu: 0.0.40
codegen_flags: <defaults>
</compile_context>

<pallas_src>
import functools

import jax
import jax.numpy as jnp
from jax import lax
from jax.experimental import pallas as pl
from jax.experimental.pallas import tpu as pltpu

EPS = 1e-3  # BatchNorm eps


def _full_spec(shape):
    # Whole-array block (grid of size 1), resident in VMEM.
    return pl.BlockSpec(shape, lambda i: (0,) * len(shape))


def fused_kernel(x_ref, b1_ref, b2_ref, w1_ref, g1_ref, w2_ref, g2_ref, be2_ref,
                 wc_ref, o_ref, *, C, M, M2):
    f32, bf16 = jnp.float32, jnp.bfloat16
    inv_m = 1.0 / M
    ones_row = jnp.ones((1, M), f32)

    def row_moments(cat):
        # Per-row means of cat (K, M) as ONE lane-dense (1, K) row:
        # out[0, k] = (1/M) * sum_m cat[k, m]   (A @ B^T form, contracts the M axes).
        return lax.dot_general(ones_row, cat, (((1,), (1,)), ((), ())),
                               preferred_element_type=f32) * inv_m

    # conv1: 1x1 conv == (Cout,Cin)@(Cin,M) matmul, bf16 operands / f32 accumulation.
    # conv1's own bias is a per-channel constant cancelled by BN1's mean subtraction.
    v1 = jnp.dot(w1_ref[...], x_ref[...], preferred_element_type=f32)          # (C, M)
    # torch.add(v1, bias_conv1): bias indexed by the W coordinate; pre-permuted (1, M).
    v2 = v1 + b1_ref[...]

    # BN1 (training mode, biased variance).  Only the per-channel *scale* survives:
    # BN1's shift and conv2's bias are per-channel constants cancelled by BN2's mean
    # subtraction.  Variance via a column-0 pivot; both moments from one ones-row
    # MXU matmul over a concatenated RHS -> lane-dense (1, 2C) result.
    d1 = v2 - v2[:, :1]
    mom1 = row_moments(jnp.concatenate([d1, d1 * d1], axis=0))                 # (1, 2C)
    e1, e1sq = mom1[:, :C], mom1[:, C:]
    var1 = e1sq - e1 * e1
    scale1 = g1_ref[...] * lax.rsqrt(var1 + EPS)                               # (1, C)

    # conv2 with BN1's scale folded into the weight's contraction columns (tiny mul).
    w2s = (w2_ref[...] * scale1).astype(bf16)                                  # (C, C)
    v5 = jnp.dot(w2s, v2.astype(bf16), preferred_element_type=f32) + b2_ref[...]

    # BN2 -> per-channel affine (scale2, shift2); mean + pivoted moments from one
    # ones-row matmul over [v5; d2; d2^2] -> lane-dense (1, 3C) result.
    d2 = v5 - v5[:, :1]
    mom2 = row_moments(jnp.concatenate([v5, d2, d2 * d2], axis=0))             # (1, 3C)
    mean2, e2, e2sq = mom2[:, :C], mom2[:, C:2 * C], mom2[:, 2 * C:]
    var2 = e2sq - e2 * e2
    scale2 = g2_ref[...] * lax.rsqrt(var2 + EPS)                               # (1, C)
    shift2 = be2_ref[...] - scale2 * mean2                                     # (1, C)

    # Collapsed conv3*conv4*conv7 with BN2's scale folded into its contraction columns;
    # BN2's shift folded into a (128, 1) output bias (kept in f32).
    wcs = (wc_ref[...] * scale2).astype(bf16)                                  # (128, C)
    bias_eff = lax.dot_general(wc_ref[...], shift2, (((1,), (1,)), ((), ())),
                               preferred_element_type=f32)                     # (128, 1)

    # conv3's stride-2 subsample == first M2 columns (pixels were permuted in the
    # wrapper so kept pixels come first): free lane slice, one matmul, one dense store.
    v6s = v5[:, :M2].astype(bf16)                                              # (C, M2)
    o_ref[...] = jnp.dot(wcs, v6s, preferred_element_type=f32) + bias_eff      # (128, M2)


def model_forward(x_nchw, p):
    """Pallas forward of the module. x_nchw: (N, 64, H, W) float32, W == 64, H,W even."""
    N, C, H, W = x_nchw.shape
    assert C == 64, "module fixes channels at 64"
    assert W == 64, "torch.add(v, bias(64,)) broadcasts the bias over W -> W must be 64"
    assert H % 2 == 0 and W % 2 == 0
    Ho, Wo = H // 2, W // 2
    M, M2 = N * H * W, N * Ho * Wo

    # Channel-major layout + pixel permutation putting the stride-2-kept (even-h,
    # even-w) pixels in the FIRST M2 columns:
    #   m = (((hpar*2 + wpar)*N + n)*Ho + ho)*Wo + wo,  h = 2*ho + hpar, w = 2*wo + wpar.
    x_cm = jnp.transpose(
        x_nchw.astype(jnp.bfloat16).reshape(N, C, Ho, 2, Wo, 2),
        (1, 3, 5, 0, 2, 4)).reshape(C, M)

    def bias_row(bias_w):  # (W,) -> (1, M) row matching the same pixel permutation
        b = jnp.broadcast_to(bias_w[None, None, :], (N, H, W)).reshape(N, Ho, 2, Wo, 2)
        return jnp.transpose(b, (2, 4, 0, 1, 3)).reshape(1, M).astype(jnp.float32)

    # conv3/conv4/conv7 compose exactly (no nonlinearity in between): one (128, 64)
    # weight, kept in f32 (BN2 scale/shift folded in-kernel).
    wc = (p["w7"] @ p["w4"] @ p["w3"]).astype(jnp.float32)

    row = lambda a: a.reshape(1, -1).astype(jnp.float32)

    kernel = functools.partial(fused_kernel, C=C, M=M, M2=M2)
    out = pl.pallas_call(
        kernel,
        grid=(1,),
        out_shape=jax.ShapeDtypeStruct((128, M2), jnp.float32),
        in_specs=[
            _full_spec((C, M)),      # x, channel-major, bf16
            _full_spec((1, M)),      # bias_conv1 row (pixel-permuted)
            _full_spec((1, M)),      # bias_conv2 row (pixel-permuted)
            _full_spec((C, C)),      # conv1 weight (out, in), bf16
            _full_spec((1, C)),      # bn1 gamma
            _full_spec((C, C)),      # conv2 weight (out, in), f32 (scale folded in-kernel)
            _full_spec((1, C)),      # bn2 gamma
            _full_spec((1, C)),      # bn2 beta
            _full_spec((128, C)),    # collapsed conv3*conv4*conv7 weight, f32
        ],
        out_specs=_full_spec((128, M2)),
        compiler_params=pltpu.CompilerParams(
            dimension_semantics=("arbitrary",),
            vmem_limit_bytes=32 << 20),   # safe on v7x (64 MiB physical VMEM)
    )(x_cm, bias_row(p["bias_conv1"]), bias_row(p["bias_conv2"]),
      p["w1"].astype(jnp.bfloat16), row(p["g1"]), p["w2"].astype(jnp.float32),
      row(p["g2"]), row(p["be2"]), wc)

    # (128, M2) -> NCHW; the first M2 columns are ordered (n, ho, wo).
    return jnp.transpose(out.reshape(128, N, Ho, Wo), (1, 0, 2, 3))


# ----------------------------------------------------------------------------
# Pure-JAX reference (NCHW, mirrors the PyTorch graph faithfully, f32).
# ----------------------------------------------------------------------------
def reference_forward(x, p):
    def conv1x1(x, w, b=None, stride=1):
        y = jnp.einsum("oc,nchw->nohw", w, x)
        if b is not None:
            y = y + b[None, :, None, None]
        if stride > 1:
            y = y[:, :, ::stride, ::stride]
        return y

    def bn_train(x, g, be):
        mu = jnp.mean(x, axis=(0, 2, 3), keepdims=True)
        var = jnp.mean((x - mu) ** 2, axis=(0, 2, 3), keepdims=True)
        return (x - mu) * jax.lax.rsqrt(var + EPS) * g[None, :, None, None] + be[None, :, None, None]

    v1 = conv1x1(x, p["w1"], p["b1"])
    v2 = v1 + p["bias_conv1"]            # broadcast over W (last axis)
    v3 = bn_train(v2, p["g1"], p["be1"])
    v4 = conv1x1(v3, p["w2"], p["b2"])
    v5 = v4 + p["bias_conv2"]
    v6 = bn_train(v5, p["g2"], p["be2"])
    v7 = conv1x1(v6, p["w3"], stride=2)
    v8 = conv1x1(v7, p["w4"])
    v11 = conv1x1(v8, p["w7"])
    return v11


def init_params(key):
    ks = jax.random.split(key, 16)
    nrm = lambda k, s, scale=1.0: (scale * jax.random.normal(k, s)).astype(jnp.float32)
    return {
        # conv weights stored as (out, in) — 1x1 kernels
        "w1": nrm(ks[0], (64, 64), 1.0 / 8.0),
        "b1": nrm(ks[1], (64,), 0.1),
        "bias_conv1": nrm(ks[2], (64,)),
        "g1": 1.0 + nrm(ks[3], (64,), 0.1),
        "be1": nrm(ks[4], (64,), 0.1),
        "w2": nrm(ks[5], (64, 64), 1.0 / 8.0),
        "b2": nrm(ks[6], (64,), 0.1),
        "bias_conv2": nrm(ks[7], (64,)),
        "g2": 1.0 + nrm(ks[8], (64,), 0.1),
        "be2": nrm(ks[9], (64,), 0.1),
        "w3": nrm(ks[10], (64, 64), 1.0 / 8.0),
        "w4": nrm(ks[11], (128, 64), 1.0 / 8.0),
        "w7": nrm(ks[12], (128, 128), 1.0 / 11.3),
    }


if __name__ == "__main__":
    key = jax.random.PRNGKey(0)
    k_x, k_p = jax.random.split(key)

    # Small shape consistent with the module: channels fixed at 64,
    # W = 64 required by the torch.add broadcast, N = 2, H = 16.
    x1 = jax.random.normal(k_x, (2, 64, 16, 64), dtype=jnp.float32)
    params = init_params(k_p)

    out = jax.block_until_ready(jax.jit(model_forward)(x1, params))
    ref = jax.block_until_ready(reference_forward(x1, params))

    assert out.shape == (2, 128, 8, 32), out.shape
    assert bool(jnp.all(jnp.isfinite(out)))
    # bf16 MXU operands with f32 accumulation -> small absolute error on O(1) outputs.
    max_err = float(jnp.max(jnp.abs(out - ref)))
    assert bool(jnp.allclose(out, ref, rtol=2e-2, atol=5e-2)), max_err

    print("KERNEL_OK")
</pallas_src>

<mosaic_0001>
module attributes {stable_mosaic.version = 11 : i64} {
  func.func @fused_kernel(%arg0: i32, %arg1: memref<64x2048xbf16, #tpu.memory_space<vmem>>, %arg2: memref<1x2048xf32, #tpu.memory_space<vmem>>, %arg3: memref<1x2048xf32, #tpu.memory_space<vmem>>, %arg4: memref<64x64xbf16, #tpu.memory_space<vmem>>, %arg5: memref<1x64xf32, #tpu.memory_space<vmem>>, %arg6: memref<64x64xf32, #tpu.memory_space<vmem>>, %arg7: memref<1x64xf32, #tpu.memory_space<vmem>>, %arg8: memref<1x64xf32, #tpu.memory_space<vmem>>, %arg9: memref<128x64xf32, #tpu.memory_space<vmem>>, %arg10: memref<128x512xf32, #tpu.memory_space<vmem>>) attributes {dimension_semantics = [#tpu.dimension_semantics<arbitrary>], iteration_bounds = array<i64: 1>, scalar_prefetch = 0 : i64, scratch_operands = 0 : i64, tpu.core_type = #tpu.core_type<tc>, window_params = [{pipeline_mode = #tpu.pipeline_mode<synchronous>, transform_indices = @transform_0, window_bounds = array<i64: 64, 2048>}, {pipeline_mode = #tpu.pipeline_mode<synchronous>, transform_indices = @transform_1, window_bounds = array<i64: 1, 2048>}, {pipeline_mode = #tpu.pipeline_mode<synchronous>, transform_indices = @transform_2, window_bounds = array<i64: 1, 2048>}, {pipeline_mode = #tpu.pipeline_mode<synchronous>, transform_indices = @transform_3, window_bounds = array<i64: 64, 64>}, {pipeline_mode = #tpu.pipeline_mode<synchronous>, transform_indices = @transform_4, window_bounds = array<i64: 1, 64>}, {pipeline_mode = #tpu.pipeline_mode<synchronous>, transform_indices = @transform_5, window_bounds = array<i64: 64, 64>}, {pipeline_mode = #tpu.pipeline_mode<synchronous>, transform_indices = @transform_6, window_bounds = array<i64: 1, 64>}, {pipeline_mode = #tpu.pipeline_mode<synchronous>, transform_indices = @transform_7, window_bounds = array<i64: 1, 64>}, {pipeline_mode = #tpu.pipeline_mode<synchronous>, transform_indices = @transform_8, window_bounds = array<i64: 128, 64>}, {pipeline_mode = #tpu.pipeline_mode<synchronous>, transform_indices = @transform_9, window_bounds = array<i64: 128, 512>}]} {
    %cst = arith.constant 1.000000e+00 : f32
    %0 = vector.broadcast %cst : f32 to vector<1x2048xf32>
    %c0 = arith.constant 0 : index
    %c0_0 = arith.constant 0 : index
    %1 = vector.load %arg4[%c0, %c0_0] : memref<64x64xbf16, #tpu.memory_space<vmem>>, vector<64x64xbf16>
    %c0_1 = arith.constant 0 : index
    %c0_2 = arith.constant 0 : index
    %2 = vector.load %arg1[%c0_1, %c0_2] : memref<64x2048xbf16, #tpu.memory_space<vmem>>, vector<64x2048xbf16>
    %cst_3 = arith.constant dense<0.000000e+00> : vector<64x2048xf32>
    %3 = tpu.matmul %1, %2, %cst_3 {dimension_numbers = #tpu.dot_dimension_numbers<[1], [0], [0], [1], [0, 0, 1, 1], [], []>} : vector<64x64xbf16>, vector<64x2048xbf16>, vector<64x2048xf32> -> vector<64x2048xf32>
    %c0_4 = arith.constant 0 : index
    %c0_5 = arith.constant 0 : index
    %4 = vector.load %arg2[%c0_4, %c0_5] : memref<1x2048xf32, #tpu.memory_space<vmem>>, vector<1x2048xf32>
    %5 = vector.broadcast %4 : vector<1x2048xf32> to vector<64x2048xf32>
    %6 = arith.addf %3, %5 : vector<64x2048xf32>
    %7 = vector.extract_strided_slice %6 {offsets = [0, 0], sizes = [64, 1], strides = [1, 1]} : vector<64x2048xf32> to vector<64x1xf32>
    %8 = vector.broadcast %7 : vector<64x1xf32> to vector<64x2048xf32>
    %9 = arith.subf %6, %8 : vector<64x2048xf32>
    %10 = arith.mulf %9, %9 : vector<64x2048xf32>
    %11 = tpu.concatenate %9, %10 in 0 : vector<64x2048xf32>, vector<64x2048xf32> -> vector<128x2048xf32>
    %cst_6 = arith.constant dense<0.000000e+00> : vector<1x128xf32>
    %12 = tpu.matmul %0, %11, %cst_6 {dimension_numbers = #tpu.dot_dimension_numbers<[1], [1], [0], [0], [0, 0, 1, 0], [], []>} : vector<1x2048xf32>, vector<128x2048xf32>, vector<1x128xf32> -> vector<1x128xf32>
    %cst_7 = arith.constant 4.8828125E-4 : f32
    %13 = vector.broadcast %cst_7 : f32 to vector<1x128xf32>
    %14 = arith.mulf %12, %13 : vector<1x128xf32>
    %15 = vector.extract_strided_slice %14 {offsets = [0, 0], sizes = [1, 64], strides = [1, 1]} : vector<1x128xf32> to vector<1x64xf32>
    %16 = vector.extract_strided_slice %14 {offsets = [0, 64], sizes = [1, 64], strides = [1, 1]} : vector<1x128xf32> to vector<1x64xf32>
    %17 = arith.mulf %15, %15 : vector<1x64xf32>
    %18 = arith.subf %16, %17 : vector<1x64xf32>
    %c0_8 = arith.constant 0 : index
    %c0_9 = arith.constant 0 : index
    %19 = vector.load %arg5[%c0_8, %c0_9] : memref<1x64xf32, #tpu.memory_space<vmem>>, vector<1x64xf32>
    %cst_10 = arith.constant 1.000000e-03 : f32
    %20 = vector.broadcast %cst_10 : f32 to vector<1x64xf32>
    %21 = arith.addf %18, %20 : vector<1x64xf32>
    %22 = math.rsqrt %21 : vector<1x64xf32>
    %23 = arith.mulf %19, %22 : vector<1x64xf32>
    %c0_11 = arith.constant 0 : index
    %c0_12 = arith.constant 0 : index
    %24 = vector.load %arg6[%c0_11, %c0_12] : memref<64x64xf32, #tpu.memory_space<vmem>>, vector<64x64xf32>
    %25 = vector.broadcast %23 : vector<1x64xf32> to vector<64x64xf32>
    %26 = arith.mulf %24, %25 : vector<64x64xf32>
    %27 = arith.truncf %26 : vector<64x64xf32> to vector<64x64xbf16>
    %28 = arith.truncf %6 : vector<64x2048xf32> to vector<64x2048xbf16>
    %cst_13 = arith.constant dense<0.000000e+00> : vector<64x2048xf32>
    %29 = tpu.matmul %27, %28, %cst_13 {dimension_numbers = #tpu.dot_dimension_numbers<[1], [0], [0], [1], [0, 0, 1, 1], [], []>} : vector<64x64xbf16>, vector<64x2048xbf16>, vector<64x2048xf32> -> vector<64x2048xf32>
    %c0_14 = arith.constant 0 : index
    %c0_15 = arith.constant 0 : index
    %30 = vector.load %arg3[%c0_14, %c0_15] : memref<1x2048xf32, #tpu.memory_space<vmem>>, vector<1x2048xf32>
    %31 = vector.broadcast %30 : vector<1x2048xf32> to vector<64x2048xf32>
    %32 = arith.addf %29, %31 : vector<64x2048xf32>
    %33 = vector.extract_strided_slice %32 {offsets = [0, 0], sizes = [64, 1], strides = [1, 1]} : vector<64x2048xf32> to vector<64x1xf32>
    %34 = vector.broadcast %33 : vector<64x1xf32> to vector<64x2048xf32>
    %35 = arith.subf %32, %34 : vector<64x2048xf32>
    %36 = arith.mulf %35, %35 : vector<64x2048xf32>
    %37 = tpu.concatenate %32, %35, %36 in 0 : vector<64x2048xf32>, vector<64x2048xf32>, vector<64x2048xf32> -> vector<192x2048xf32>
    %cst_16 = arith.constant dense<0.000000e+00> : vector<1x192xf32>
    %38 = tpu.matmul %0, %37, %cst_16 {dimension_numbers = #tpu.dot_dimension_numbers<[1], [1], [0], [0], [0, 0, 1, 0], [], []>} : vector<1x2048xf32>, vector<192x2048xf32>, vector<1x192xf32> -> vector<1x192xf32>
    %cst_17 = arith.constant 4.8828125E-4 : f32
    %39 = vector.broadcast %cst_17 : f32 to vector<1x192xf32>
    %40 = arith.mulf %38, %39 : vector<1x192xf32>
    %41 = vector.extract_strided_slice %40 {offsets = [0, 0], sizes = [1, 64], strides = [1, 1]} : vector<1x192xf32> to vector<1x64xf32>
    %42 = vector.extract_strided_slice %40 {offsets = [0, 64], sizes = [1, 64], strides = [1, 1]} : vector<1x192xf32> to vector<1x64xf32>
    %43 = vector.extract_strided_slice %40 {offsets = [0, 128], sizes = [1, 64], strides = [1, 1]} : vector<1x192xf32> to vector<1x64xf32>
    %44 = arith.mulf %42, %42 : vector<1x64xf32>
    %45 = arith.subf %43, %44 : vector<1x64xf32>
    %c0_18 = arith.constant 0 : index
    %c0_19 = arith.constant 0 : index
    %46 = vector.load %arg7[%c0_18, %c0_19] : memref<1x64xf32, #tpu.memory_space<vmem>>, vector<1x64xf32>
    %cst_20 = arith.constant 1.000000e-03 : f32
    %47 = vector.broadcast %cst_20 : f32 to vector<1x64xf32>
    %48 = arith.addf %45, %47 : vector<1x64xf32>
    %49 = math.rsqrt %48 : vector<1x64xf32>
    %50 = arith.mulf %46, %49 : vector<1x64xf32>
    %c0_21 = arith.constant 0 : index
    %c0_22 = arith.constant 0 : index
    %51 = vector.load %arg8[%c0_21, %c0_22] : memref<1x64xf32, #tpu.memory_space<vmem>>, vector<1x64xf32>
    %52 = arith.mulf %50, %41 : vector<1x64xf32>
    %53 = arith.subf %51, %52 : vector<1x64xf32>
    %c0_23 = arith.constant 0 : index
    %c0_24 = arith.constant 0 : index
    %54 = vector.load %arg9[%c0_23, %c0_24] : memref<128x64xf32, #tpu.memory_space<vmem>>, vector<128x64xf32>
    %55 = vector.broadcast %50 : vector<1x64xf32> to vector<128x64xf32>
    %56 = arith.mulf %54, %55 : vector<128x64xf32>
    %57 = arith.truncf %56 : vector<128x64xf32> to vector<128x64xbf16>
    %c0_25 = arith.constant 0 : index
    %c0_26 = arith.constant 0 : index
    %58 = vector.load %arg9[%c0_25, %c0_26] : memref<128x64xf32, #tpu.memory_space<vmem>>, vector<128x64xf32>
    %cst_27 = arith.constant dense<0.000000e+00> : vector<128x1xf32>
    %59 = tpu.matmul %58, %53, %cst_27 {dimension_numbers = #tpu.dot_dimension_numbers<[1], [1], [0], [0], [0, 0, 1, 0], [], []>} : vector<128x64xf32>, vector<1x64xf32>, vector<128x1xf32> -> vector<128x1xf32>
    %60 = vector.extract_strided_slice %32 {offsets = [0, 0], sizes = [64, 512], strides = [1, 1]} : vector<64x2048xf32> to vector<64x512xf32>
    %61 = arith.truncf %60 : vector<64x512xf32> to vector<64x512xbf16>
    %cst_28 = arith.constant dense<0.000000e+00> : vector<128x512xf32>
    %62 = tpu.matmul %57, %61, %cst_28 {dimension_numbers = #tpu.dot_dimension_numbers<[1], [0], [0], [1], [0, 0, 1, 1], [], []>} : vector<128x64xbf16>, vector<64x512xbf16>, vector<128x512xf32> -> vector<128x512xf32>
    %63 = vector.broadcast %59 : vector<128x1xf32> to vector<128x512xf32>
    %64 = arith.addf %62, %63 : vector<128x512xf32>
    %c0_29 = arith.constant 0 : index
    %c0_30 = arith.constant 0 : index
    %65 = vector.load %arg10[%c0_29, %c0_30] : memref<128x512xf32, #tpu.memory_space<vmem>>, vector<128x512xf32>
    tpu.vector_store %arg10[%c0_29, %c0_30], %64 {strides = array<i32>} : memref<128x512xf32, #tpu.memory_space<vmem>>, vector<128x512xf32>,
    return
  }
  func.func @transform_0(%arg0: i32) -> (i32, i32) {
    %c0_i32 = arith.constant 0 : i32
    %c0_i32_0 = arith.constant 0 : i32
    %c0_i32_1 = arith.constant 0 : i32
    return %c0_i32, %c0_i32_0 : i32, i32
  }
  func.func @transform_1(%arg0: i32) -> (i32, i32) {
    %c0_i32 = arith.constant 0 : i32
    %c0_i32_0 = arith.constant 0 : i32
    %c0_i32_1 = arith.constant 0 : i32
    return %c0_i32, %c0_i32_0 : i32, i32
  }
  func.func @transform_2(%arg0: i32) -> (i32, i32) {
    %c0_i32 = arith.constant 0 : i32
    %c0_i32_0 = arith.constant 0 : i32
    %c0_i32_1 = arith.constant 0 : i32
    return %c0_i32, %c0_i32_0 : i32, i32
  }
  func.func @transform_3(%arg0: i32) -> (i32, i32) {
    %c0_i32 = arith.constant 0 : i32
    %c0_i32_0 = arith.constant 0 : i32
    %c0_i32_1 = arith.constant 0 : i32
    return %c0_i32, %c0_i32_0 : i32, i32
  }
  func.func @transform_4(%arg0: i32) -> (i32, i32) {
    %c0_i32 = arith.constant 0 : i32
    %c0_i32_0 = arith.constant 0 : i32
    %c0_i32_1 = arith.constant 0 : i32
    return %c0_i32, %c0_i32_0 : i32, i32
  }
  func.func @transform_5(%arg0: i32) -> (i32, i32) {
    %c0_i32 = arith.constant 0 : i32
    %c0_i32_0 = arith.constant 0 : i32
    %c0_i32_1 = arith.constant 0 : i32
    return %c0_i32, %c0_i32_0 : i32, i32
  }
  func.func @transform_6(%arg0: i32) -> (i32, i32) {
    %c0_i32 = arith.constant 0 : i32
    %c0_i32_0 = arith.constant 0 : i32
    %c0_i32_1 = arith.constant 0 : i32
    return %c0_i32, %c0_i32_0 : i32, i32
  }
  func.func @transform_7(%arg0: i32) -> (i32, i32) {
    %c0_i32 = arith.constant 0 : i32
    %c0_i32_0 = arith.constant 0 : i32
    %c0_i32_1 = arith.constant 0 : i32
    return %c0_i32, %c0_i32_0 : i32, i32
  }
  func.func @transform_8(%arg0: i32) -> (i32, i32) {
    %c0_i32 = arith.constant 0 : i32
    %c0_i32_0 = arith.constant 0 : i32
    %c0_i32_1 = arith.constant 0 : i32
    return %c0_i32, %c0_i32_0 : i32, i32
  }
  func.func @transform_9(%arg0: i32) -> (i32, i32) {
    %c0_i32 = arith.constant 0 : i32
    %c0_i32_0 = arith.constant 0 : i32
    %c0_i32_1 = arith.constant 0 : i32
    return %c0_i32, %c0_i32_0 : i32, i32
  }
}

</mosaic_0001>

<bundles_post_ra>
// kernel: model_forward.1
= control target key start
LH: loop header
LB: loop body
LE: loop exit
PB: predicated region body
PF: predicated region fallthrough
CT: control target
= control target key end

     0   :  { %v8582_v3 = vmov 0   ;;  %vm529_vm0 = vcmask 523264   ;;  %s8572_s0 = inlined_call_operand.vmem [shape: bf16[64,2048], index: 0, kind: input, shape index: {}]   ;;  %s8573_s3 = inlined_call_operand.vmem [shape: bf16[64,64], index: 3, kind: input, shape index: {}]   ;;  %s8574_s1 = inlined_call_operand.vmem [shape: f32[1,2048], index: 1, kind: input, shape index: {}]   ;;  %s8575_s4 = inlined_call_operand.vmem [shape: f32[1,64], index: 4, kind: input, shape index: {}]   ;;  %s8576_s5 = inlined_call_operand.vmem [shape: f32[64,64], index: 5, kind: input, shape index: {}]   ;;  %s8577_s2 = inlined_call_operand.vmem [shape: f32[1,2048], index: 2, kind: input, shape index: {}]   ;;  %s8578_s6 = inlined_call_operand.vmem [shape: f32[1,64], index: 6, kind: input, shape index: {}]   ;;  %s8579_s7 = inlined_call_operand.vmem [shape: f32[1,64], index: 7, kind: input, shape index: {}]   ;;  %s8580_s8 = inlined_call_operand.vmem [shape: f32[128,64], index: 8, kind: input, shape index: {}]   ;;  %s8581_s9 = inlined_call_operand.vmem [shape: f32[128,512], index: 9, kind: output, shape index: {}]  }
   0x1   :  { %v89_v0 = vld [vmem:[%s8572_s0 + $0x180] sm:$0xff]  ;;  %574 = vmatprep.mubr.bf16.mxu0 %v8582_v3  ;;  %647 = vmatprep.mubr.bf16.mxu1 %v8582_v3  ;;  %v90_v12 = vld [vmem:[%s8572_s0 + $0x188] sm:$0xff]  ;;  %v91_v27 = vld [vmem:[%s8572_s0 + $0x190] sm:$0xff] }
   0x2   :  { %v97_v1 = vld [vmem:[%s8572_s0 + $0x1c0] sm:$0xff]  ;;  %4263 = vset.pattern.permute.xlu1 %v8582_v3  ;;  %4262 = vset.pattern.permute.xlu0 %v8582_v3  ;;  %v98_v14 = vld [vmem:[%s8572_s0 + $0x1c8] sm:$0xff]  ;;  %v99_v28 = vld [vmem:[%s8572_s0 + $0x1d0] sm:$0xff] }
   0x3   :  { %v73_v2 = vld [vmem:[%s8572_s0 + $0x100] sm:$0xff]  ;;  %v4163_v4 = vcombine.high %v89_v0, %v97_v1  ;;  %v4162_v5 = vcombine.low %v89_v0, %v97_v1  ;;  %v74_v15 = vld [vmem:[%s8572_s0 + $0x108] sm:$0xff]  ;;  %v4165_v18 = vcombine.high %v90_v12, %v98_v14  ;;  %v4164_v19 = vcombine.low %v90_v12, %v98_v14  ;;  %v75_v35 = vld [vmem:[%s8572_s0 + $0x110] sm:$0xff] }
   0x4   :  { %v81_v6 = vld [vmem:[%s8572_s0 + $0x140] sm:$0xff]  ;;  %v82_v16 = vld [vmem:[%s8572_s0 + $0x148] sm:$0xff]  ;;  %v4167_v33 = vcombine.high %v91_v27, %v99_v28  ;;  %v83_v36 = vld [vmem:[%s8572_s0 + $0x150] sm:$0xff]  ;;  %v4166_v40 = vcombine.low %v91_v27, %v99_v28 }
   0x5   :  { %v4147_v7 = vcombine.high %v73_v2, %v81_v6  ;;  %v57_v8 = vld [vmem:[%s8572_s0 + $0x80] sm:$0xff]  ;;  %550 = vmatprep.subr.bf16.mxu0 %v4163_v4  ;;  %v4146_v10 = vcombine.low %v73_v2, %v81_v6  ;;  %v4149_v20 = vcombine.high %v74_v15, %v82_v16  ;;  %v58_v21 = vld [vmem:[%s8572_s0 + $0x88] sm:$0xff]  ;;  %623 = vmatprep.subr.bf16.mxu1 %v4165_v18  ;;  %v92_v38 = vld [vmem:[%s8572_s0 + $0x198] sm:$0xff] }
   0x6   :  { %v65_v9 = vld [vmem:[%s8572_s0 + $0xc0] sm:$0xff]  ;;  %551 = vmatpush1.bf16.msra.mxu0 %v4162_v5  ;;  %v66_v22 = vld [vmem:[%s8572_s0 + $0xc8] sm:$0xff]  ;;  %624 = vmatpush1.bf16.msra.mxu1 %v4164_v19  ;;  %v4148_v25 = vcombine.low %v74_v15, %v82_v16  ;;  %v100_v39 = vld [vmem:[%s8572_s0 + $0x1d8] sm:$0xff]  ;;  %v4151_v42 = vcombine.high %v75_v35, %v83_v36  ;;  %v4150_v48 = vcombine.low %v75_v35, %v83_v36 }
   0x7   :  { %v41_v11 = vld [vmem:[%s8572_s0] sm:$0xff]  ;;  %552 = vmatprep.subr.bf16.mxu0 %v4147_v7  ;;  %v4131_v13 = vcombine.high %v57_v8, %v65_v9  ;;  %v4130_v23 = vcombine.low %v57_v8, %v65_v9  ;;  %625 = vmatprep.subr.bf16.mxu1 %v4149_v20  ;;  %v4133_v26 = vcombine.high %v58_v21, %v66_v22  ;;  %v42_v29 = vld [vmem:[%s8572_s0 + $0x8] sm:$0xff]  ;;  %v76_v44 = vld [vmem:[%s8572_s0 + $0x118] sm:$0xff] }
   0x8   :  { %v49_v17 = vld [vmem:[%s8572_s0 + $0x40] sm:$0xff]  ;;  %v50_v30 = vld [vmem:[%s8572_s0 + $0x48] sm:$0xff]  ;;  %v4132_v32 = vcombine.low %v58_v21, %v66_v22  ;;  %v4169_v43 = vcombine.high %v92_v38, %v100_v39  ;;  %v84_v45 = vld [vmem:[%s8572_s0 + $0x158] sm:$0xff]  ;;  %v4168_v49 = vcombine.low %v92_v38, %v100_v39 }
   0x9   :  { %v4115_v24 = vcombine.high %v41_v11, %v49_v17  ;;  %v4114_v31 = vcombine.low %v41_v11, %v49_v17  ;;  %v4117_v34 = vcombine.high %v42_v29, %v50_v30  ;;  %v4393_v37 = vld [vmem:[%s8573_s3] sm:$0xff]   ;;  %v4116_v41 = vcombine.low %v42_v29, %v50_v30  ;;  %v59_v46 = vld [vmem:[%s8572_s0 + $0x90] sm:$0xff]  ;;  %v4425_v54 = vld [vmem:[%s8573_s3 + $0x8] sm:$0xff]  }
   0xa   :  { %553 = vmatpush1.bf16.msra.mxu0 %v4146_v10  ;;  %626 = vmatpush1.bf16.msra.mxu1 %v4148_v25  ;;  %v67_v47 = vld [vmem:[%s8572_s0 + $0xd0] sm:$0xff]  ;;  %v4153_v50 = vcombine.high %v76_v44, %v84_v45  ;;  %v60_v55 = vld [vmem:[%s8572_s0 + $0x98] sm:$0xff]  ;;  %v4152_v58 = vcombine.low %v76_v44, %v84_v45  ;;  %v93_v63 = vld [vmem:[%s8572_s0 + $0x1a0] sm:$0xff] }
   0xb   :  { %554 = vmatprep.subr.bf16.mxu0 %v4131_v13  ;;  %627 = vmatprep.subr.bf16.mxu1 %v4133_v26  ;;  %v4135_v51 = vcombine.high %v59_v46, %v67_v47  ;;  %v43_v52 = vld [vmem:[%s8572_s0 + $0x10] sm:$0xff]  ;;  %v68_v56 = vld [vmem:[%s8572_s0 + $0xd8] sm:$0xff]  ;;  %v4134_v57 = vcombine.low %v59_v46, %v67_v47  ;;  %v101_v0 = vld [vmem:[%s8572_s0 + $0x1e0] sm:$0xff] }
   0xc   :  { %v51_v53 = vld [vmem:[%s8572_s0 + $0x50] sm:$0xff]  ;;  %v4137_v60 = vcombine.high %v60_v55, %v68_v56  ;;  %v44_v61 = vld [vmem:[%s8572_s0 + $0x18] sm:$0xff]  ;;  %v4136_v2 = vcombine.low %v60_v55, %v68_v56  ;;  %v4171_v5 = vcombine.high %v93_v63, %v101_v0  ;;  %v94_v7 = vld [vmem:[%s8572_s0 + $0x1a8] sm:$0xff]  ;;  %v4170_v14 = vcombine.low %v93_v63, %v101_v0 }
   0xd   :  { %v4119_v59 = vcombine.high %v43_v52, %v51_v53  ;;  %v52_v62 = vld [vmem:[%s8572_s0 + $0x58] sm:$0xff]  ;;  %v4118_v1 = vcombine.low %v43_v52, %v51_v53  ;;  %v4454_v6 = vld [vmem:[%s8573_s3 + $0x10] sm:$0xff]   ;;  %v102_v8 = vld [vmem:[%s8572_s0 + $0x1e8] sm:$0xff] }
   0xe   :  { %555 = vmatpush1.bf16.msra.mxu0 %v4130_v23  ;;  %628 = vmatpush1.bf16.msra.mxu1 %v4132_v32  ;;  %v4121_v4 = vcombine.high %v44_v61, %v52_v62  ;;  %v4120_v9 = vcombine.low %v44_v61, %v52_v62  ;;  %v4173_v10 = vcombine.high %v94_v7, %v102_v8  ;;  %v4471_v11 = vld [vmem:[%s8573_s3 + $0x18] sm:$0xff]   ;;  %v77_v12 = vld [vmem:[%s8572_s0 + $0x120] sm:$0xff]  ;;  %v78_v16 = vld [vmem:[%s8572_s0 + $0x128] sm:$0xff] }
   0xf   :  { %556 = vmatprep.subr.bf16.mxu0 %v4115_v24  ;;  %629 = vmatprep.subr.bf16.mxu1 %v4117_v34  ;;  %v85_v13 = vld [vmem:[%s8572_s0 + $0x160] sm:$0xff]  ;;  %v86_v17 = vld [vmem:[%s8572_s0 + $0x168] sm:$0xff]  ;;  %v4172_v21 = vcombine.low %v94_v7, %v102_v8  ;;  %v95_v34 = vld [vmem:[%s8572_s0 + $0x1b0] sm:$0xff] }
  0x10   :  { %v4155_v15 = vcombine.high %v77_v12, %v85_v13  ;;  %v61_v18 = vld [vmem:[%s8572_s0 + $0xa0] sm:$0xff]  ;;  %v4154_v20 = vcombine.low %v77_v12, %v85_v13  ;;  %v4157_v22 = vcombine.high %v78_v16, %v86_v17  ;;  %v62_v26 = vld [vmem:[%s8572_s0 + $0xa8] sm:$0xff]  ;;  %v4156_v29 = vcombine.low %v78_v16, %v86_v17  ;;  %v103_v35 = vld [vmem:[%s8572_s0 + $0x1f0] sm:$0xff] }
  0x11   :  { %v69_v19 = vld [vmem:[%s8572_s0 + $0xe0] sm:$0xff]  ;;  %v70_v27 = vld [vmem:[%s8572_s0 + $0xe8] sm:$0xff]  ;;  %v79_v45 = vld [vmem:[%s8572_s0 + $0x130] sm:$0xff]  ;;  %v4174_v47 = vcombine.low %v95_v34, %v103_v35  ;;  %v109_v13 = vlaneseq }
  0x12   :  { %557 = vmatpush1.bf16.msra.mxu0 %v4114_v31  ;;  %630 = vmatpush1.bf16.msra.mxu1 %v4116_v41  ;;  %v4139_v23 = vcombine.high %v61_v18, %v69_v19  ;;  %v45_v24 = vld [vmem:[%s8572_s0 + $0x20] sm:$0xff]  ;;  %v4138_v28 = vcombine.low %v61_v18, %v69_v19  ;;  %v4141_v31 = vcombine.high %v62_v26, %v70_v27  ;;  %v46_v32 = vld [vmem:[%s8572_s0 + $0x28] sm:$0xff]  ;;  %v96_v41 = vld [vmem:[%s8572_s0 + $0x1b8] sm:$0xff] }
  0x13   :  { %696 = vmatprep.subr.bf16.mxu0 %v4167_v33  ;;  %769 = vmatprep.subr.bf16.mxu1 %v4169_v43  ;;  %v53_v25 = vld [vmem:[%s8572_s0 + $0x60] sm:$0xff]  ;;  %v54_v33 = vld [vmem:[%s8572_s0 + $0x68] sm:$0xff]  ;;  %v4140_v38 = vcombine.low %v62_v26, %v70_v27  ;;  %v87_v46 = vld [vmem:[%s8572_s0 + $0x170] sm:$0xff]  ;;  %v4642_v16 = vshrl.u32 %v109_v13, 7 }
  0x14   :  { %v4123_v30 = vcombine.high %v45_v24, %v53_v25  ;;  %v4122_v36 = vcombine.low %v45_v24, %v53_v25  ;;  %v4125_v39 = vcombine.high %v46_v32, %v54_v33  ;;  %v4124_v43 = vcombine.low %v46_v32, %v54_v33  ;;  %v71_v52 = vld [vmem:[%s8572_s0 + $0xf0] sm:$0xff]  ;;  %v72_v61 = vld [vmem:[%s8572_s0 + $0xf8] sm:$0xff] }
  0x15   :  { %4178 = vmatmul.mubr.msk.bf16.vlgmr.msra.gmra.mxu0 %vm529_vm0, %v4393_v37  ;;  %4182 = vmatmul.mubr.msk.bf16.vlgmr.msra.gmra.mxu1 %vm529_vm0, %v4393_v37  ;;  %v4158_v53 = vcombine.low %v79_v45, %v87_v46  ;;  %8872 = vst [vmem:[#allocation2_spill] sm:$0xff] %v4642_v16  ;;  %v4647_v18 = vsub.s32 0, %v4642_v16 }
  0x16   :  { %584 = vmatprep.mubr.bf16.mxu0 %v8582_v3  ;;  %697 = vmatpush1.bf16.msra.mxu0 %v4166_v40  ;;  %v4175_v40 = vcombine.high %v95_v34, %v103_v35 }
  0x17   :  { %698 = vmatprep.subr.bf16.mxu0 %v4151_v42  ;;  %657 = vmatprep.mubr.bf16.mxu1 %v8582_v3  ;;  %v104_v42 = vld [vmem:[%s8572_s0 + $0x1f8] sm:$0xff]  ;;  %8873 = vst [vmem:[#allocation3_spill] sm:$0xff] %v4647_v18 }
  0x18   :  { %770 = vmatpush1.bf16.msra.mxu1 %v4168_v49  ;;  %v4177_v44 = vcombine.high %v96_v41, %v104_v42  ;;  %v80_v49 = vld [vmem:[%s8572_s0 + $0x138] sm:$0xff]  ;;  %v4176_v55 = vcombine.low %v96_v41, %v104_v42 }
  0x19   :  { %771 = vmatprep.subr.bf16.mxu1 %v4153_v50  ;;  %v88_v50 = vld [vmem:[%s8572_s0 + $0x178] sm:$0xff] }
  0x1a   :  { %699 = vmatpush1.bf16.msra.mxu0 %v4150_v48  ;;  %v4159_v48 = vcombine.high %v79_v45, %v87_v46  ;;  %v4161_v56 = vcombine.high %v80_v49, %v88_v50  ;;  %v4160_v63 = vcombine.low %v80_v49, %v88_v50 }
  0x1b   :  { %700 = vmatprep.subr.bf16.mxu0 %v4135_v51  ;;  %v63_v51 = vld [vmem:[%s8572_s0 + $0xb0] sm:$0xff] }
  0x1c   :  { %772 = vmatpush1.bf16.msra.mxu1 %v4152_v58  ;;  %v47_v58 = vld [vmem:[%s8572_s0 + $0x30] sm:$0xff]  ;;  %v4142_v62 = vcombine.low %v63_v51, %v71_v52 }
  0x1d   :  { %4179 = vmatmul.mubr.msk.bf16.gmra.mxu0 %vm529_vm0, %v4425_v54  ;;  %773 = vmatprep.subr.bf16.mxu1 %v4137_v60  ;;  %v64_v60 = vld [vmem:[%s8572_s0 + $0xb8] sm:$0xff] }
  0x1e   :  { %594 = vmatprep.mubr.bf16.mxu0 %v8582_v3  ;;  %701 = vmatpush1.bf16.msra.mxu0 %v4134_v57  ;;  %v4143_v57 = vcombine.high %v63_v51, %v71_v52  ;;  %v4144_v7 = vcombine.low %v64_v60, %v72_v61 }
  0x1f   :  { %702 = vmatprep.subr.bf16.mxu0 %v4119_v59  ;;  %4183 = vmatmul.mubr.msk.bf16.gmra.mxu1 %vm529_vm0, %v4425_v54  ;;  %v55_v59 = vld [vmem:[%s8572_s0 + $0x70] sm:$0xff] }
  0x20   :  { %667 = vmatprep.mubr.bf16.mxu1 %v8582_v3  ;;  %774 = vmatpush1.bf16.msra.mxu1 %v4136_v2  ;;  %v4127_v0 = vcombine.high %v47_v58, %v55_v59  ;;  %v48_v2 = vld [vmem:[%s8572_s0 + $0x38] sm:$0xff] }
  0x21   :  { %775 = vmatprep.subr.bf16.mxu1 %v4121_v4  ;;  %v56_v4 = vld [vmem:[%s8572_s0 + $0x78] sm:$0xff] }
  0x22   :  { %703 = vmatpush1.bf16.msra.mxu0 %v4118_v1  ;;  %v4145_v1 = vcombine.high %v64_v60, %v72_v61  ;;  %v4129_v8 = vcombine.high %v48_v2, %v56_v4 }
  0x23   :  { %842 = vmatprep.subr.bf16.mxu0 %v4171_v5  ;;  %v4126_v5 = vcombine.low %v47_v58, %v55_v59 }
  0x24   :  { %776 = vmatpush1.bf16.msra.mxu1 %v4120_v9  ;;  %v4128_v9 = vcombine.low %v48_v2, %v56_v4 }
  0x25   :  { %4180 = vmatmul.mubr.msk.bf16.gmra.mxu0 %vm529_vm0, %v4454_v6  ;;  %915 = vmatprep.subr.bf16.mxu1 %v4173_v10 }
  0x26   :  { %604 = vmatprep.mubr.bf16.mxu0 %v8582_v3 }
  0x27   :  { %4184 = vmatmul.mubr.msk.bf16.gmra.mxu1 %vm529_vm0, %v4454_v6 }
  0x28   :  { %677 = vmatprep.mubr.bf16.mxu1 %v8582_v3 }
  0x2d   :  { %4181 = vmatmul.mubr.msk.bf16.gmra.mxu0 %vm529_vm0, %v4471_v11 }
  0x2e   :  { %720 = vmatprep.mubr.bf16.mxu0 %v8582_v3 }
  0x2f   :  { %4185 = vmatmul.mubr.msk.bf16.gmra.mxu1 %vm529_vm0, %v4471_v11 }
  0x30   :  { %793 = vmatprep.mubr.bf16.mxu1 %v8582_v3 }
  0x35   :  { %4186 = vmatmul.mubr.msk.bf16.vlgmr.msra.gmra.mxu0 %vm529_vm0, %v4393_v37 }
  0x36   :  { %730 = vmatprep.mubr.bf16.mxu0 %v8582_v3  ;;  %843 = vmatpush1.bf16.msra.mxu0 %v4170_v14 }
  0x37   :  { %844 = vmatprep.subr.bf16.mxu0 %v4155_v15  ;;  %4190 = vmatmul.mubr.msk.bf16.vlgmr.msra.gmra.mxu1 %vm529_vm0, %v4393_v37 }
  0x38   :  { %803 = vmatprep.mubr.bf16.mxu1 %v8582_v3  ;;  %916 = vmatpush1.bf16.msra.mxu1 %v4172_v21 }
  0x39   :  { %917 = vmatprep.subr.bf16.mxu1 %v4157_v22 }
  0x3a   :  { %845 = vmatpush1.bf16.msra.mxu0 %v4154_v20 }
  0x3b   :  { %846 = vmatprep.subr.bf16.mxu0 %v4139_v23 }
  0x3c   :  { %918 = vmatpush1.bf16.msra.mxu1 %v4156_v29 }
  0x3d   :  { %4187 = vmatmul.mubr.msk.bf16.gmra.mxu0 %vm529_vm0, %v4425_v54  ;;  %919 = vmatprep.subr.bf16.mxu1 %v4141_v31 }
  0x3e   :  { %740 = vmatprep.mubr.bf16.mxu0 %v8582_v3  ;;  %847 = vmatpush1.bf16.msra.mxu0 %v4138_v28 }
  0x3f   :  { %848 = vmatprep.subr.bf16.mxu0 %v4123_v30  ;;  %4191 = vmatmul.mubr.msk.bf16.gmra.mxu1 %vm529_vm0, %v4425_v54 }
  0x40   :  { %813 = vmatprep.mubr.bf16.mxu1 %v8582_v3  ;;  %920 = vmatpush1.bf16.msra.mxu1 %v4140_v38 }
  0x41   :  { %921 = vmatprep.subr.bf16.mxu1 %v4125_v39  ;;  %v8584_v39 = vmov 1.0  }
  0x42   :  { %849 = vmatpush1.bf16.msra.mxu0 %v4122_v36 }
  0x43   :  { %988 = vmatprep.subr.bf16.mxu0 %v4175_v40 }
  0x44   :  { %922 = vmatpush1.bf16.msra.mxu1 %v4124_v43 }
  0x45   :  { %4188 = vmatmul.mubr.msk.bf16.gmra.mxu0 %vm529_vm0, %v4454_v6  ;;  %1061 = vmatprep.subr.bf16.mxu1 %v4177_v44 }
  0x46   :  { %750 = vmatprep.mubr.bf16.mxu0 %v8582_v3 }
  0x47   :  { %4192 = vmatmul.mubr.msk.bf16.gmra.mxu1 %vm529_vm0, %v4454_v6 }
  0x48   :  { %823 = vmatprep.mubr.bf16.mxu1 %v8582_v3 }
  0x4d   :  { %4189 = vmatmul.mubr.msk.bf16.gmra.mxu0 %vm529_vm0, %v4471_v11 }
  0x4e   :  { %866 = vmatprep.mubr.bf16.mxu0 %v8582_v3 }
  0x4f   :  { %4193 = vmatmul.mubr.msk.bf16.gmra.mxu1 %vm529_vm0, %v4471_v11 }
  0x50   :  { %939 = vmatprep.mubr.bf16.mxu1 %v8582_v3 }
  0x55   :  { %4194 = vmatmul.mubr.msk.bf16.vlgmr.msra.gmra.mxu0 %vm529_vm0, %v4393_v37 }
  0x56   :  { %876 = vmatprep.mubr.bf16.mxu0 %v8582_v3  ;;  %989 = vmatpush1.bf16.msra.mxu0 %v4174_v47 }
  0x57   :  { %990 = vmatprep.subr.bf16.mxu0 %v4159_v48  ;;  %4198 = vmatmul.mubr.msk.bf16.vlgmr.msra.gmra.mxu1 %vm529_vm0, %v4393_v37 }
  0x58   :  { %949 = vmatprep.mubr.bf16.mxu1 %v8582_v3  ;;  %1062 = vmatpush1.bf16.msra.mxu1 %v4176_v55  ;;  %v4703_v55 = vsub.s32 1, %v4642_v16 }
  0x59   :  { %1063 = vmatprep.subr.bf16.mxu1 %v4161_v56  ;;  %v4706_v56 = vsub.s32 2, %v4642_v16 }
  0x5a   :  { %991 = vmatpush1.bf16.msra.mxu0 %v4158_v53  ;;  %8882 = vst [vmem:[#allocation12_spill] sm:$0xff] %v4703_v55 }
  0x5b   :  { %992 = vmatprep.subr.bf16.mxu0 %v4143_v57  ;;  %8883 = vst [vmem:[#allocation13_spill] sm:$0xff] %v4706_v56  ;;  %v4709_v57 = vsub.s32 3, %v4642_v16 }
  0x5c   :  { %1064 = vmatpush1.bf16.msra.mxu1 %v4160_v63 }
  0x5d   :  { %4195 = vmatmul.mubr.msk.bf16.gmra.mxu0 %vm529_vm0, %v4425_v54  ;;  %1065 = vmatprep.subr.bf16.mxu1 %v4145_v1  ;;  %8884 = vst [vmem:[#allocation14_spill] sm:$0xff] %v4709_v57 }
  0x5e   :  { %886 = vmatprep.mubr.bf16.mxu0 %v8582_v3  ;;  %993 = vmatpush1.bf16.msra.mxu0 %v4142_v62 }
  0x5f   :  { %994 = vmatprep.subr.bf16.mxu0 %v4127_v0  ;;  %4199 = vmatmul.mubr.msk.bf16.gmra.mxu1 %vm529_vm0, %v4425_v54 }
  0x60   :  { %959 = vmatprep.mubr.bf16.mxu1 %v8582_v3  ;;  %1066 = vmatpush1.bf16.msra.mxu1 %v4144_v7 }
  0x61   :  { %1067 = vmatprep.subr.bf16.mxu1 %v4129_v8 }
  0x62   :  { %995 = vmatpush1.bf16.msra.mxu0 %v4126_v5 }
  0x64   :  { %1068 = vmatpush1.bf16.msra.mxu1 %v4128_v9 }
  0x65   :  { %4196 = vmatmul.mubr.msk.bf16.gmra.mxu0 %vm529_vm0, %v4454_v6 }
  0x66   :  { %896 = vmatprep.mubr.bf16.mxu0 %v8582_v3 }
  0x67   :  { %4200 = vmatmul.mubr.msk.bf16.gmra.mxu1 %vm529_vm0, %v4454_v6 }
  0x68   :  { %969 = vmatprep.mubr.bf16.mxu1 %v8582_v3 }
  0x6d   :  { %4197 = vmatmul.mubr.msk.bf16.gmra.mxu0 %vm529_vm0, %v4471_v11 }
  0x6e   :  { %1012 = vmatprep.mubr.bf16.mxu0 %v8582_v3 }
  0x6f   :  { %4201 = vmatmul.mubr.msk.bf16.gmra.mxu1 %vm529_vm0, %v4471_v11 }
  0x70   :  { %1085 = vmatprep.mubr.bf16.mxu1 %v8582_v3 }
  0x75   :  { %4202 = vmatmul.mubr.msk.bf16.vlgmr.msra.gmra.mxu0 %vm529_vm0, %v4393_v37 }
  0x76   :  { %1022 = vmatprep.mubr.bf16.mxu0 %v8582_v3 }
  0x77   :  { %4206 = vmatmul.mubr.msk.bf16.vlgmr.msra.gmra.mxu1 %vm529_vm0, %v4393_v37 }
  0x78   :  { %1095 = vmatprep.mubr.bf16.mxu1 %v8582_v3 }
  0x7d   :  { %4203 = vmatmul.mubr.msk.bf16.gmra.mxu0 %vm529_vm0, %v4425_v54 }
  0x7e   :  { %1032 = vmatprep.mubr.bf16.mxu0 %v8582_v3 }
  0x7f   :  { %4207 = vmatmul.mubr.msk.bf16.gmra.mxu1 %vm529_vm0, %v4425_v54 }
  0x80   :  { %1105 = vmatprep.mubr.bf16.mxu1 %v8582_v3 }
  0x85   :  { %4204 = vmatmul.mubr.msk.bf16.gmra.mxu0 %vm529_vm0, %v4454_v6 }
  0x86   :  { %1042 = vmatprep.mubr.bf16.mxu0 %v8582_v3 }
  0x87   :  { %4208 = vmatmul.mubr.msk.bf16.gmra.mxu1 %vm529_vm0, %v4454_v6 }
  0x88   :  { %1115 = vmatprep.mubr.bf16.mxu1 %v8582_v3 }
  0x8d   :  { %4205 = vmatmul.mubr.msk.bf16.gmra.mxu0 %vm529_vm0, %v4471_v11 }
  0x8e   :  { %1486 = vmatprep.mubr.f32.mxu0 %v8584_v39 }
  0x8f   :  { %4209 = vmatmul.mubr.msk.bf16.gmra.mxu1 %vm529_vm0, %v4471_v11  ;;  %v4652_v11 = vld [vmem:[%s8574_s1] sm:$0xff] }
  0x90   :  { %v112_v21 = vrot.slane %v4652_v11, %v4647_v18  ;;  %1556 = vmatprep.mubr.f32.mxu1 %v8584_v39  ;;  %v4717_v60 = vrot.slane %v4652_v11, %v4703_v55  ;;  %v4721_v61 = vrot.slane %v4652_v11, %v4706_v56  ;;  %v4725_v62 = vrot.slane %v4652_v11, %v4709_v57 }
  0xd5   :  { %v576_v37 = vpop.f32.mrf.mxu0  ;;  %v4682_v35 = vpop.f32.mrf.mxu1 }
  0xd6   :  { %v4670_v31 = vadd.f32 %v576_v37, %v112_v21 }
  0xd7   :  { %v4636_v54 = vpop.f32.mrf.mxu0  ;;  %v4684_v36 = vpop.f32.mrf.mxu1 }
  0xd8   :  { %8878 = vst [vmem:[#allocation8_spill] sm:$0xff] %v4670_v31 }
  0xd9   :  { %v580_v10 = vpop.f32.mrf.mxu0  ;;  %v4686_v38 = vpop.f32.mrf.mxu1 }
  0xda   :  { %v4679_v34 = vadd.f32 %v580_v10, %v112_v21 }
  0xdb   :  { %v4638_v12 = vpop.f32.mrf.mxu0  ;;  %v4690_v40 = vpop.f32.mrf.mxu1 }
  0xdc   :  { %8881 = vst [vmem:[#allocation11_spill] sm:$0xff] %v4679_v34 }
  0xdd   :  { %v586_v14 = vpop.f32.mrf.mxu0 }
  0xde   :  { %v4664_v29 = vadd.f32 %v586_v14, %v112_v21 }
  0xdf   :  { %v4640_v15 = vpop.f32.mrf.mxu0  ;;  %v4692_v41 = vpop.f32.mrf.mxu1 }
  0xe0   :  { %8876 = vst [vmem:[#allocation6_spill] sm:$0xff] %v4664_v29  ;;  %v4911_v57 = vadd.f32 %v4640_v15, %v4717_v60 }
  0xe1   :  { %v590_v6 = vpop.f32.mrf.mxu0  ;;  %v4694_v42 = vpop.f32.mrf.mxu1 }
  0xe2   :  { %v4676_v33 = vadd.f32 %v590_v6, %v112_v21  ;;  %8905 = vst [vmem:[#allocation35_spill] sm:$0xff] %v4911_v57 }
  0xe3   :  { %v4644_v17 = vpop.f32.mrf.mxu0  ;;  %v4696_v43 = vpop.f32.mrf.mxu1 }
  0xe4   :  { %8880 = vst [vmem:[#allocation10_spill] sm:$0xff] %v4676_v33 }
  0xe5   :  { %v596_v19 = vpop.f32.mrf.mxu0  ;;  %v4698_v44 = vpop.f32.mrf.mxu1 }
  0xe6   :  { %v4661_v26 = vadd.f32 %v596_v19, %v112_v21 }
  0xe7   :  { %v4654_v20 = vpop.f32.mrf.mxu0  ;;  %v4700_v45 = vpop.f32.mrf.mxu1 }
  0xe8   :  { %8875 = vst [vmem:[#allocation5_spill] sm:$0xff] %v4661_v26 }
  0xe9   :  { %v600_v22 = vpop.f32.mrf.mxu0  ;;  %v671_v46 = vpop.f32.mrf.mxu1 }
  0xea   :  { %v4658_v23 = vadd.f32 %v600_v22, %v112_v21 }
  0xeb   :  { %v602_v24 = vpop.f32.mrf.mxu0  ;;  %v673_v47 = vpop.f32.mrf.mxu1 }
  0xec   :  { %8874 = vst [vmem:[#allocation4_spill] sm:$0xff] %v4658_v23  ;;  %1153 = vperm.xlu1 %4263, %v4658_v23   ;;  %v4763_v14 = vadd.f32 %v602_v24, %v4717_v60 }
  0xed   :  { %v606_v25 = vpop.f32.mrf.mxu0  ;;  %v675_v48 = vpop.f32.mrf.mxu1 }
  0xee   :  { %v4672_v32 = vadd.f32 %v606_v25, %v112_v21  ;;  %8892 = vst [vmem:[#allocation22_spill] sm:$0xff] %v4763_v14  ;;  %v4769_v19 = vadd.f32 %v675_v48, %v4725_v62 }
  0xef   :  { %v608_v27 = vpop.f32.mrf.mxu0  ;;  %v679_v49 = vpop.f32.mrf.mxu1 }
  0xf0   :  { %1148 = vperm.xlu1 %4263, %v4661_v26   ;;  %8879 = vst [vmem:[#allocation9_spill] sm:$0xff] %v4672_v32  ;;  %v4766_v6 = vadd.f32 %v608_v27, %v4717_v60  ;;  %8894 = vst [vmem:[#allocation24_spill] sm:$0xff] %v4769_v19  ;;  %v4785_v48 = vadd.f32 %v679_v49, %v4721_v61 }
  0xf1   :  { %v610_v28 = vpop.f32.mrf.mxu0  ;;  %v681_v50 = vpop.f32.mrf.mxu1 }
  0xf2   :  { %v4666_v30 = vadd.f32 %v610_v28, %v112_v21  ;;  %8893 = vst [vmem:[#allocation23_spill] sm:$0xff] %v4766_v6  ;;  %v4772_v21 = vadd.f32 %v681_v50, %v4725_v62  ;;  %8897 = vst [vmem:[#allocation27_spill] sm:$0xff] %v4785_v48 }
  0xf3   :  { %v683_v51 = vpop.f32.mrf.mxu1  ;;  %v612_v53 = vpop.f32.mrf.mxu0 }
  0xf4   :  { %8877 = vst [vmem:[#allocation7_spill] sm:$0xff] %v4666_v30  ;;  %1163 = vperm.xlu0 %4262, %v4666_v30   ;;  %1138 = vperm.xlu1 %4263, %v4664_v29   ;;  %v4732_v1 = vadd.f32 %v612_v53, %v4717_v60  ;;  %v4735_v2 = vadd.f32 %v683_v51, %v4721_v61  ;;  %8895 = vst [vmem:[#allocation25_spill] sm:$0xff] %v4772_v21 }
  0xf5   :  { %v685_v52 = vpop.f32.mrf.mxu1  ;;  %v4711_v58 = vpop.f32.mrf.mxu0 }
  0xf6   :  { %8885 = vst [vmem:[#allocation15_spill] sm:$0xff] %v4711_v58  ;;  %8888 = vst [vmem:[#allocation18_spill] sm:$0xff] %v4732_v1  ;;  %v4738_v4 = vadd.f32 %v685_v52, %v4725_v62  ;;  %v4953_v58 = vadd.f32 %v4638_v12, %v4717_v60 }
  0xf7   :  { %v4713_v59 = vpop.f32.mrf.mxu1  ;;  %v4727_v63 = vpop.f32.mrf.mxu0  ;;  %8889 = vst [vmem:[#allocation19_spill] sm:$0xff] %v4735_v2 }
  0xf8   :  { %1158 = vperm.xlu0 %4262, %v4672_v32   ;;  %1128 = vperm.xlu1 %4263, %v4670_v31   ;;  %8886 = vst [vmem:[#allocation16_spill] sm:$0xff] %v4713_v59  ;;  %8890 = vst [vmem:[#allocation20_spill] sm:$0xff] %v4738_v4 }
  0xf9   :  { %v4729_v0 = vpop.f32.mrf.mxu1  ;;  %v4744_v8 = vpop.f32.mrf.mxu0  ;;  %8909 = vst [vmem:[#allocation39_spill] sm:$0xff] %v4953_v58 }
  0xfa   :  { %8887 = vst [vmem:[#allocation17_spill] sm:$0xff] %v4729_v0  ;;  %8891 = vst [vmem:[#allocation21_spill] sm:$0xff] %v4744_v8  ;;  %v4995_v0 = vadd.f32 %v4636_v54, %v4717_v60 }
  0xfb   :  { %v4774_v22 = vpop.f32.mrf.mxu1  ;;  %v4797_v53 = vpop.f32.mrf.mxu0 }
  0xfc   :  { %1143 = vperm.xlu0 %4262, %v4676_v33   ;;  %8896 = vst [vmem:[#allocation26_spill] sm:$0xff] %v4774_v22  ;;  %8913 = vst [vmem:[#allocation43_spill] sm:$0xff] %v4995_v0 }
 0x100   :  { %1133 = vperm.xlu0 %4262, %v4679_v34  }
 0x167   :  { %v4740_v5 = vpop.permute.xlu1 %1153 }
 0x168   :  { %v4791_v50 = vsub.f32 %v4763_v14, %v4740_v5  ;;  %v4795_v52 = vsub.f32 %v4769_v19, %v4740_v5  ;;  %v4813_v19 = vadd.f32 %v4654_v20, %v4717_v60  ;;  %v4816_v14 = vadd.f32 %v673_v47, %v4721_v61 }
 0x16a   :  { %8898 = vst [vmem:[#allocation28_spill] sm:$0xff] %v4813_v19  ;;  %8899 = vst [vmem:[#allocation29_spill] sm:$0xff] %v4816_v14 }
 0x16f   :  { %v4742_v7 = vpop.permute.xlu0 %1163 }
 0x170   :  { %v4748_v9 = vsub.f32 %v4732_v1, %v4742_v7  ;;  %v4752_v37 = vsub.f32 %v4738_v4, %v4742_v7  ;;  %v4756_v10 = vsub.f32 %v4666_v30, %v4742_v7  ;;  %v4760_v13 = vsub.f32 %v4735_v2, %v4742_v7  ;;  %v4847_v4 = vpop.f32.mrf.mxu0 }
 0x171   :  { %v4827_v30 = vadd.f32 %v671_v46, %v4725_v62  ;;  %v4845_v46 = vsub.f32 %v4816_v14, %v4740_v5 }
 0x172   :  { %v1407_v25 = vmul.f32 %v4748_v9, %v4748_v9  ;;  %v1409_v28 = vmul.f32 %v4752_v37, %v4752_v37  ;;  %v1406_v24 = vmul.f32 %v4756_v10, %v4756_v10  ;;  %v1408_v27 = vmul.f32 %v4760_v13, %v4760_v13 }
 0x173   :  { %v4787_v51 = vpop.permute.xlu0 %1158  ;;  %8900 = vst [vmem:[#allocation30_spill] sm:$0xff] %v4827_v30 }
 0x174   :  { %1422 = vmatprep.subr.mxu0 %v1407_v25  ;;  %1492 = vmatprep.subr.mxu1 %v1409_v28  ;;  %v4801_v3 = vsub.f32 %v4766_v6, %v4787_v51  ;;  %v4805_v49 = vsub.f32 %v4772_v21, %v4787_v51  ;;  %v4809_v39 = vsub.f32 %v4672_v32, %v4787_v51  ;;  %v4818_v25 = vpop.f32.mrf.mxu1  ;;  %v4820_v28 = vpop.permute.xlu1 %1148 }
 0x175   :  { %1423 = vmatpush1.xpose.msra.mxu0 %v1406_v24  ;;  %1493 = vmatpush1.xpose.msra.mxu1 %v1408_v27  ;;  %v4824_v2 = vsub.f32 %v4785_v48, %v4787_v51  ;;  %v1375_v27 = vmul.f32 %v4791_v50, %v4791_v50  ;;  %v4841_v48 = vsub.f32 %v4658_v23, %v4740_v5 }
 0x176   :  { %v1391_v20 = vmul.f32 %v4801_v3, %v4801_v3  ;;  %v1393_v47 = vmul.f32 %v4805_v49, %v4805_v49  ;;  %v1390_v32 = vmul.f32 %v4809_v39, %v4809_v39  ;;  %v1377_v21 = vmul.f32 %v4795_v52, %v4795_v52  ;;  %v4863_v14 = vpop.f32.mrf.mxu1 }
 0x177   :  { %v1392_v24 = vmul.f32 %v4824_v2, %v4824_v2  ;;  %v4853_v1 = vsub.f32 %v4813_v19, %v4820_v28  ;;  %v4857_v6 = vsub.f32 %v4827_v30, %v4820_v28  ;;  %v4861_v23 = vadd.f32 %v4700_v45, %v4721_v61  ;;  %v4865_v56 = vpop.permute.xlu0 %1143 }
 0x178   :  { %1424 = vmatprep.subr.mxu0 %v1391_v20  ;;  %1494 = vmatprep.subr.mxu1 %v1393_v47  ;;  %v4869_v20 = vadd.f32 %v4644_v17, %v4717_v60  ;;  %v4873_v47 = vadd.f32 %v4698_v44, %v4725_v62  ;;  %v1374_v45 = vmul.f32 %v4841_v48, %v4841_v48  ;;  %v4905_v19 = vpop.f32.mrf.mxu1  ;;  %v4907_v18 = vpop.permute.xlu1 %1138 }
 0x179   :  { %8901 = vst [vmem:[#allocation31_spill] sm:$0xff] %v4861_v23  ;;  %1425 = vmatpush1.xpose.msra.mxu0 %v1390_v32  ;;  %1495 = vmatpush1.xpose.msra.mxu1 %v1392_v24  ;;  %v1376_v30 = vmul.f32 %v4845_v46, %v4845_v46  ;;  %v4881_v32 = vsub.f32 %v4661_v26, %v4820_v28  ;;  %v4887_v24 = vpop.f32.mrf.mxu0 }
 0x17a   :  { %8902 = vst [vmem:[#allocation32_spill] sm:$0xff] %v4869_v20  ;;  %8903 = vst [vmem:[#allocation33_spill] sm:$0xff] %v4873_v47  ;;  %1426 = vmatprep.subr.mxu0 %v1375_v27  ;;  %1496 = vmatprep.subr.mxu1 %v1377_v21  ;;  %v4885_v17 = vsub.f32 %v4861_v23, %v4820_v28  ;;  %v1359_v44 = vmul.f32 %v4853_v1, %v4853_v1  ;;  %v4947_v55 = vpop.f32.mrf.mxu1 }
 0x17b   :  { %v1361_v21 = vmul.f32 %v4857_v6, %v4857_v6  ;;  %v4895_v27 = vsub.f32 %v4869_v20, %v4865_v56  ;;  %v4899_v26 = vsub.f32 %v4873_v47, %v4865_v56  ;;  %v4903_v23 = vadd.f32 %v4696_v43, %v4721_v61  ;;  %v4949_v59 = vpop.permute.xlu0 %1133 }
 0x17c   :  { %v4915_v20 = vadd.f32 %v4694_v42, %v4725_v62  ;;  %v1358_v43 = vmul.f32 %v4881_v32, %v4881_v32  ;;  %v1360_v47 = vmul.f32 %v4885_v17, %v4885_v17  ;;  %8908 = vst [vmem:[#allocation38_spill] sm:$0xff] %v4949_v59  ;;  %v4989_v22 = vpop.f32.mrf.mxu1  ;;  %v4991_v8 = vpop.permute.xlu1 %1128 }
 0x17d   :  { %8904 = vst [vmem:[#allocation34_spill] sm:$0xff] %v4903_v23  ;;  %1427 = vmatpush1.xpose.msra.mxu0 %v1374_v45  ;;  %1497 = vmatpush1.xpose.msra.mxu1 %v1376_v30  ;;  %v4923_v45 = vsub.f32 %v4676_v33, %v4865_v56  ;;  %v4927_v15 = vsub.f32 %v4903_v23, %v4865_v56  ;;  %v4929_v30 = vpop.f32.mrf.mxu0  ;;  %8912 = vst [vmem:[#allocation42_spill] sm:$0xff] %v4991_v8 }
 0x17e   :  { %8906 = vst [vmem:[#allocation36_spill] sm:$0xff] %v4915_v20  ;;  %1428 = vmatprep.subr.mxu0 %v1359_v44  ;;  %1498 = vmatprep.subr.mxu1 %v1361_v21  ;;  %v1343_v42 = vmul.f32 %v4895_v27, %v4895_v27  ;;  %v1345_v44 = vmul.f32 %v4899_v26, %v4899_v26 }
 0x17f   :  { %v4937_v21 = vsub.f32 %v4911_v57, %v4907_v18  ;;  %v4941_v33 = vsub.f32 %v4915_v20, %v4907_v18  ;;  %v4945_v23 = vadd.f32 %v4692_v41, %v4721_v61  ;;  %v4957_v57 = vadd.f32 %v4690_v40, %v4725_v62 }
 0x180   :  { %v1342_v41 = vmul.f32 %v4923_v45, %v4923_v45  ;;  %v1344_v20 = vmul.f32 %v4927_v15, %v4927_v15 }
 0x181   :  { %8907 = vst [vmem:[#allocation37_spill] sm:$0xff] %v4945_v23  ;;  %1429 = vmatpush1.xpose.msra.mxu0 %v1358_v43  ;;  %1499 = vmatpush1.xpose.msra.mxu1 %v1360_v47  ;;  %8910 = vst [vmem:[#allocation40_spill] sm:$0xff] %v4957_v57  ;;  %v4965_v43 = vsub.f32 %v4664_v29, %v4907_v18  ;;  %v4969_v12 = vsub.f32 %v4945_v23, %v4907_v18  ;;  %v4971_v47 = vpop.f32.mrf.mxu0 }
 0x182   :  { %1430 = vmatprep.subr.mxu0 %v1343_v42  ;;  %1500 = vmatprep.subr.mxu1 %v1345_v44  ;;  %v1327_v40 = vmul.f32 %v4937_v21, %v4937_v21  ;;  %v1329_v42 = vmul.f32 %v4941_v33, %v4941_v33  ;;  %v4979_v44 = vsub.f32 %v4953_v58, %v4949_v59 }
 0x183   :  { %v4983_v29 = vsub.f32 %v4957_v57, %v4949_v59  ;;  %v4987_v23 = vadd.f32 %v4686_v38, %v4721_v61  ;;  %v4999_v58 = vadd.f32 %v4684_v36, %v4725_v62  ;;  %v1326_v38 = vmul.f32 %v4965_v43, %v4965_v43 }
 0x184   :  { %v1328_v57 = vmul.f32 %v4969_v12, %v4969_v12  ;;  %v1311_v36 = vmul.f32 %v4979_v44, %v4979_v44  ;;  %v5019_v62 = vsub.f32 %v4995_v0, %v4991_v8 }
 0x185   :  { %8911 = vst [vmem:[#allocation41_spill] sm:$0xff] %v4987_v23  ;;  %1431 = vmatpush1.xpose.msra.mxu0 %v1342_v41  ;;  %1501 = vmatpush1.xpose.msra.mxu1 %v1344_v20  ;;  %8914 = vst [vmem:[#allocation44_spill] sm:$0xff] %v4999_v58  ;;  %v5007_v41 = vsub.f32 %v4679_v34, %v4949_v59  ;;  %v5011_v54 = vsub.f32 %v4987_v23, %v4949_v59  ;;  %v5031_v23 = vpop.f32.mrf.mxu1 }
 0x186   :  { %1432 = vmatprep.subr.mxu0 %v1327_v40  ;;  %1502 = vmatprep.subr.mxu1 %v1329_v42  ;;  %v1313_v60 = vmul.f32 %v4983_v29, %v4983_v29  ;;  %v5023_v20 = vsub.f32 %v4999_v58, %v4991_v8  ;;  %v5027_v40 = vadd.f32 %v4682_v35, %v4721_v61  ;;  %v5029_v42 = vpop.f32.mrf.mxu0 }
 0x187   :  { %v1310_v34 = vmul.f32 %v5007_v41, %v5007_v41  ;;  %v1312_v0 = vmul.f32 %v5011_v54, %v5011_v54  ;;  %v5039_v58 = vsub.f32 %v4670_v31, %v4991_v8  ;;  %v1295_v61 = vmul.f32 %v5019_v62, %v5019_v62 }
 0x188   :  { %8915 = vst [vmem:[#allocation45_spill] sm:$0xff] %v5027_v40  ;;  %v5043_v35 = vsub.f32 %v5027_v40, %v4991_v8 }
 0x189   :  { %1433 = vmatpush1.xpose.msra.mxu0 %v1326_v38  ;;  %1503 = vmatpush1.xpose.msra.mxu1 %v1328_v57  ;;  %v1297_v57 = vmul.f32 %v5023_v20, %v5023_v20  ;;  %v5049_v38 = vpop.f32.mrf.mxu0 }
 0x18a   :  { %1434 = vmatprep.subr.mxu0 %v1311_v36  ;;  %1504 = vmatprep.subr.mxu1 %v1313_v60  ;;  %v5051_v36 = vpop.f32.mrf.mxu1  ;;  %v1294_v60 = vmul.f32 %v5039_v58, %v5039_v58  ;;  %v1296_v40 = vmul.f32 %v5043_v35, %v5043_v35 }
 0x18b   :  { %v5057_v31 = vpop.f32.mrf.mxu0 }
 0x18c   :  { %v5059_v8 = vpop.f32.mrf.mxu1 }
 0x18d   :  { %1435 = vmatpush1.xpose.msra.mxu0 %v1310_v34  ;;  %1505 = vmatpush1.xpose.msra.mxu1 %v1312_v0  ;;  %v748_v34 = vpop.f32.mrf.mxu0 }
 0x18e   :  { %1436 = vmatprep.subr.mxu0 %v1295_v61  ;;  %1506 = vmatprep.subr.mxu1 %v1297_v57  ;;  %v821_v0 = vpop.f32.mrf.mxu1 }
 0x18f   :  { %v752_v61 = vpop.f32.mrf.mxu0 }
 0x190   :  { %v825_v57 = vpop.f32.mrf.mxu1 }
 0x191   :  { %1437 = vmatpush1.xpose.msra.mxu0 %v1294_v60  ;;  %1507 = vmatpush1.xpose.msra.mxu1 %v1296_v40 }
 0x192   :  { %1438 = vmatprep.subr.mxu0 %v4748_v9  ;;  %1508 = vmatprep.subr.mxu1 %v4752_v37  ;;  %v754_v9 = vpop.f32.mrf.mxu0  ;;  %v827_v37 = vpop.f32.mrf.mxu1 }
 0x195   :  { %1439 = vmatpush1.xpose.msra.mxu0 %v4756_v10  ;;  %1509 = vmatpush1.xpose.msra.mxu1 %v4760_v13  ;;  %v829_v10 = vpop.f32.mrf.mxu1  ;;  %v5089_v13 = vsub.s32 6, %v4642_v16 }
 0x196   :  { %1440 = vmatprep.subr.mxu0 %v4801_v3  ;;  %1510 = vmatprep.subr.mxu1 %v4805_v49  ;;  %v756_v3 = vpop.f32.mrf.mxu0 }
 0x197   :  { %8919 = vst [vmem:[#allocation49_spill] sm:$0xff] %v5089_v13 }
 0x199   :  { %1441 = vmatpush1.xpose.msra.mxu0 %v4809_v39  ;;  %1511 = vmatpush1.xpose.msra.mxu1 %v4824_v2  ;;  %v5078_v39 = vsub.s32 5, %v4642_v16  ;;  %v5081_v2 = vsub.s32 7, %v4642_v16 }
 0x19a   :  { %1442 = vmatprep.subr.mxu0 %v4791_v50  ;;  %1512 = vmatprep.subr.mxu1 %v4795_v52 }
 0x19b   :  { %8916 = vst [vmem:[#allocation46_spill] sm:$0xff] %v5078_v39  ;;  %8917 = vst [vmem:[#allocation47_spill] sm:$0xff] %v5081_v2  ;;  %v5095_v50 = vrot.slane %v4652_v11, %v5078_v39  ;;  %v5099_v52 = vrot.slane %v4652_v11, %v5081_v2 }
 0x19d   :  { %1443 = vmatpush1.xpose.msra.mxu0 %v4841_v48  ;;  %1513 = vmatpush1.xpose.msra.mxu1 %v4845_v46  ;;  %v831_v48 = vpop.f32.mrf.mxu1  ;;  %v5160_v60 = vadd.f32 %v821_v0, %v5099_v52 }
 0x19e   :  { %1444 = vmatprep.subr.mxu0 %v4853_v1  ;;  %1514 = vmatprep.subr.mxu1 %v4857_v6  ;;  %v5086_v1 = vsub.s32 4, %v4642_v16  ;;  %v758_v6 = vpop.f32.mrf.mxu0  ;;  %v5107_v49 = vadd.f32 %v831_v48, %v5099_v52 }
 0x19f   :  { %8930 = vst [vmem:[#allocation60_spill] sm:$0xff] %v5160_v60 }
 0x1a0   :  { %8918 = vst [vmem:[#allocation48_spill] sm:$0xff] %v5086_v1  ;;  %8921 = vst [vmem:[#allocation51_spill] sm:$0xff] %v5107_v49  ;;  %v5111_v46 = vrot.slane %v4652_v11, %v5086_v1 }
 0x1a1   :  { %1445 = vmatpush1.xpose.msra.mxu0 %v4881_v32  ;;  %1515 = vmatpush1.xpose.msra.mxu1 %v4885_v17  ;;  %v5115_v32 = vrot.slane %v4652_v11, %v5089_v13  ;;  %v5117_v17 = vpop.f32.mrf.mxu0  ;;  %v5132_v11 = vadd.f32 %v754_v9, %v5095_v50  ;;  %v8951_v13 = vld [vmem:[#allocation17_spill] sm:$0xff] }
 0x1a2   :  { %1446 = vmatprep.subr.mxu0 %v4895_v27  ;;  %1516 = vmatprep.subr.mxu1 %v4899_v26  ;;  %v5104_v26 = vadd.f32 %v758_v6, %v5095_v50  ;;  %8922 = vst [vmem:[#allocation52_spill] sm:$0xff] %v5117_v17  ;;  %v5119_v27 = vpop.f32.mrf.mxu1  ;;  %v5155_v40 = vadd.f32 %v752_v61, %v5111_v46 }
 0x1a3   :  { %8923 = vst [vmem:[#allocation53_spill] sm:$0xff] %v5119_v27  ;;  %8926 = vst [vmem:[#allocation56_spill] sm:$0xff] %v5132_v11  ;;  %v5163_v9 = vadd.f32 %v825_v57, %v5115_v32  ;;  %v5187_v61 = vadd.f32 %v5049_v38, %v5095_v50  ;;  %v5191_v57 = vadd.f32 %v5057_v31, %v5111_v46  ;;  %v8959_v27 = vld [vmem:[#allocation16_spill] sm:$0xff] }
 0x1a4   :  { %8920 = vst [vmem:[#allocation50_spill] sm:$0xff] %v5104_v26  ;;  %8929 = vst [vmem:[#allocation59_spill] sm:$0xff] %v5155_v40  ;;  %v5205_v38 = vadd.f32 %v5059_v8, %v5115_v32  ;;  %v5377_v1 = vadd.f32 %v8951_v13, %v5099_v52  ;;  %v5421_v17 = vadd.f32 %v8959_v27, %v5115_v32 }
 0x1a5   :  { %1447 = vmatpush1.xpose.msra.mxu0 %v4923_v45  ;;  %1517 = vmatpush1.xpose.msra.mxu1 %v4927_v15  ;;  %v5129_v45 = vadd.f32 %v829_v10, %v5115_v32  ;;  %v5135_v15 = vadd.f32 %v827_v37, %v5099_v52  ;;  %8931 = vst [vmem:[#allocation61_spill] sm:$0xff] %v5163_v9  ;;  %8932 = vst [vmem:[#allocation62_spill] sm:$0xff] %v5187_v61 }
 0x1a6   :  { %1448 = vmatprep.subr.mxu0 %v4937_v21  ;;  %1518 = vmatprep.subr.mxu1 %v4941_v33  ;;  %v5126_v33 = vadd.f32 %v756_v3, %v5111_v46  ;;  %v5139_v21 = vsub.f32 %v5104_v26, %v4742_v7  ;;  %8933 = vst [vmem:[#allocation63_spill] sm:$0xff] %v5191_v57  ;;  %8936 = vst [vmem:[#allocation66_spill] sm:$0xff] %v5205_v38 }
 0x1a7   :  { %8925 = vst [vmem:[#allocation55_spill] sm:$0xff] %v5129_v45  ;;  %8927 = vst [vmem:[#allocation57_spill] sm:$0xff] %v5135_v15  ;;  %v5183_v0 = vsub.f32 %v5135_v15, %v4787_v51  ;;  %v5201_v10 = vadd.f32 %v5051_v36, %v5099_v52  ;;  %v5221_v8 = vsub.f32 %v5163_v9, %v4787_v51  ;;  %v8937_v36 = vmov 1.0  }
 0x1a8   :  { %8924 = vst [vmem:[#allocation54_spill] sm:$0xff] %v5126_v33  ;;  %v5333_v26 = vadd.f32 %v4818_v25, %v5099_v52  ;;  %8952 = vst [vmem:[#allocation17_spill] sm:$0xff] %v5377_v1 }
 0x1a9   :  { %1449 = vmatpush1.xpose.msra.mxu0 %v4965_v43  ;;  %1519 = vmatpush1.xpose.msra.mxu1 %v4969_v12  ;;  %v5143_v43 = vsub.f32 %v5107_v49, %v4742_v7  ;;  %v5147_v12 = vpop.f32.mrf.mxu1  ;;  %8935 = vst [vmem:[#allocation65_spill] sm:$0xff] %v5201_v10  ;;  %v5289_v49 = vadd.f32 %v4905_v19, %v5099_v52  ;;  %8960 = vst [vmem:[#allocation16_spill] sm:$0xff] %v5421_v17 }
 0x1aa   :  { %1450 = vmatprep.subr.mxu0 %v4979_v44  ;;  %1520 = vmatprep.subr.mxu1 %v4983_v29  ;;  %v5145_v29 = vpop.f32.mrf.mxu0  ;;  %v5152_v44 = vadd.f32 %v748_v34, %v5095_v50  ;;  %v1411_v34 = vmul.f32 %v5139_v21, %v5139_v21  ;;  %8947 = vst [vmem:[#allocation76_spill] sm:$0xff] %v5333_v26 }
 0x1ab   :  { %v5195_v3 = vpop.f32.mrf.mxu1  ;;  %8943 = vst [vmem:[#allocation72_spill] sm:$0xff] %v5289_v49 }
 0x1ac   :  { %8928 = vst [vmem:[#allocation58_spill] sm:$0xff] %v5152_v44  ;;  %v5193_v37 = vpop.f32.mrf.mxu0  ;;  %8934 = vst [vmem:[#allocation64_spill] sm:$0xff] %v5195_v3  ;;  %v5209_v31 = vsub.f32 %v5152_v44, %v4740_v5  ;;  %v5235_v44 = vadd.f32 %v4971_v47, %v5095_v50  ;;  %v5255_v47 = vsub.f32 %v5191_v57, %v4740_v5 }
 0x1ad   :  { %1451 = vmatpush1.xpose.msra.mxu0 %v5007_v41  ;;  %1521 = vmatpush1.xpose.msra.mxu1 %v5011_v54  ;;  %v5167_v41 = vsub.f32 %v5126_v33, %v4742_v7  ;;  %v5171_v54 = vsub.f32 %v5129_v45, %v4742_v7  ;;  %v5239_v45 = vadd.f32 %v5029_v42, %v5111_v46  ;;  %v5243_v33 = vpop.f32.mrf.mxu1 }
 0x1ae   :  { %1452 = vmatprep.subr.mxu0 %v5019_v62  ;;  %1522 = vmatprep.subr.mxu1 %v5023_v20  ;;  %v1413_v62 = vmul.f32 %v5143_v43, %v5143_v43  ;;  %v5179_v20 = vsub.f32 %v5132_v11, %v4787_v51  ;;  %8938 = vst [vmem:[#allocation67_spill] sm:$0xff] %v5235_v44  ;;  %v5241_v9 = vpop.f32.mrf.mxu0 }
 0x1af   :  { %v1410_v6 = vmul.f32 %v5167_v41, %v5167_v41  ;;  %8939 = vst [vmem:[#allocation68_spill] sm:$0xff] %v5239_v45  ;;  %v5285_v16 = vpop.f32.mrf.mxu1  ;;  %v5305_v19 = vsub.f32 %v5239_v45, %v4820_v28  ;;  %v5325_v45 = vadd.f32 %v4797_v53, %v5095_v50 }
 0x1b0   :  { %v1395_v48 = vmul.f32 %v5179_v20, %v5179_v20  ;;  %v5283_v57 = vpop.f32.mrf.mxu0 }
 0x1b1   :  { %1453 = vmatpush1.xpose.msra.mxu0 %v5039_v58  ;;  %1523 = vmatpush1.xpose.msra.mxu1 %v5043_v35  ;;  %v1412_v58 = vmul.f32 %v5171_v54, %v5171_v54  ;;  %v5217_v35 = vsub.f32 %v5155_v40, %v4787_v51  ;;  %v5247_v40 = vadd.f32 %v4989_v22, %v5099_v52  ;;  %v5329_v15 = vpop.f32.mrf.mxu1 }
 0x1b2   :  { %1562 = vmatprep.subr.mxu0 %v1411_v34  ;;  %1632 = vmatprep.subr.mxu1 %v1413_v62  ;;  %v1397_v34 = vmul.f32 %v5183_v0, %v5183_v0  ;;  %v5231_v62 = vsub.f32 %v5160_v60, %v4740_v5  ;;  %v5251_v60 = vadd.f32 %v5031_v23, %v5115_v32 }
 0x1b3   :  { %8940 = vst [vmem:[#allocation69_spill] sm:$0xff] %v5247_v40  ;;  %v1394_v42 = vmul.f32 %v5217_v35, %v5217_v35  ;;  %v5263_v22 = vsub.f32 %v5205_v38, %v4740_v5  ;;  %v1379_v23 = vmul.f32 %v5209_v31, %v5209_v31  ;;  %v5281_v38 = vadd.f32 %v4887_v24, %v5095_v50  ;;  %v5373_v11 = vpop.f32.mrf.mxu1 }
 0x1b4   :  { %1487 = vmatmul.mubr.f32.vlgmr.msra.gmra.mxu0 %v8937_v36  ;;  %1557 = vmatmul.mubr.f32.vlgmr.msra.gmra.mxu1 %v8937_v36  ;;  %8941 = vst [vmem:[#allocation70_spill] sm:$0xff] %v5251_v60  ;;  %v1378_v24 = vmul.f32 %v5255_v47, %v5255_v47  ;;  %8946 = vst [vmem:[#allocation75_spill] sm:$0xff] %v5325_v45  ;;  %v1362_v53 = vmul.f32 %v5305_v19, %v5305_v19 }
 0x1b5   :  { %1563 = vmatpush1.xpose.msra.mxu0 %v1410_v6  ;;  %1633 = vmatpush1.xpose.msra.mxu1 %v1412_v58  ;;  %v1396_v6 = vmul.f32 %v5221_v8, %v5221_v8  ;;  %v1381_v58 = vmul.f32 %v5231_v62, %v5231_v62  ;;  %8942 = vst [vmem:[#allocation71_spill] sm:$0xff] %v5281_v38 }
 0x1b6   :  { %1564 = vmatprep.subr.mxu0 %v1395_v48  ;;  %1634 = vmatprep.subr.mxu1 %v1397_v34  ;;  %v5273_v48 = vsub.f32 %v5187_v61, %v4820_v28  ;;  %v5277_v34 = vsub.f32 %v5201_v10, %v4820_v28  ;;  %v5293_v61 = vadd.f32 %v4929_v30, %v5111_v46 }
 0x1b7   :  { %1626 = vmatprep.mubr.f32.mxu0 %v8937_v36  ;;  %1696 = vmatprep.mubr.f32.mxu1 %v8937_v36  ;;  %v5297_v10 = vadd.f32 %v4947_v55, %v5115_v32  ;;  %v5309_v30 = vsub.f32 %v5251_v60, %v4820_v28  ;;  %v5327_v60 = vpop.f32.mrf.mxu0 }
 0x1b8   :  { %8944 = vst [vmem:[#allocation73_spill] sm:$0xff] %v5293_v61  ;;  %v1363_v55 = vmul.f32 %v5273_v48, %v5273_v48  ;;  %v5349_v25 = vsub.f32 %v5293_v61, %v4865_v56  ;;  %v5369_v61 = vadd.f32 %v4727_v63, %v5095_v50 }
 0x1b9   :  { %1565 = vmatpush1.xpose.msra.mxu0 %v1394_v42  ;;  %1635 = vmatpush1.xpose.msra.mxu1 %v1396_v6  ;;  %8945 = vst [vmem:[#allocation74_spill] sm:$0xff] %v5297_v10  ;;  %v1380_v42 = vmul.f32 %v5263_v22, %v5263_v22  ;;  %v1365_v6 = vmul.f32 %v5277_v34, %v5277_v34 }
 0x1ba   :  { %1566 = vmatprep.subr.mxu0 %v1379_v23  ;;  %1636 = vmatprep.subr.mxu1 %v1381_v58  ;;  %v5317_v23 = vsub.f32 %v5235_v44, %v4865_v56  ;;  %v5321_v58 = vsub.f32 %v5247_v40, %v4865_v56  ;;  %v5337_v44 = vadd.f32 %v4847_v4, %v5111_v46 }
 0x1bb   :  { %v5341_v40 = vadd.f32 %v4863_v14, %v5115_v32  ;;  %v5353_v4 = vsub.f32 %v5297_v10, %v4865_v56  ;;  %8950 = vst [vmem:[#allocation79_spill] sm:$0xff] %v5369_v61  ;;  %v5371_v10 = vpop.f32.mrf.mxu0  ;;  %v1346_v63 = vmul.f32 %v5349_v25, %v5349_v25 }
 0x1bc   :  { %8948 = vst [vmem:[#allocation77_spill] sm:$0xff] %v5337_v44  ;;  %v1347_v14 = vmul.f32 %v5317_v23, %v5317_v23  ;;  %v5393_v13 = vsub.f32 %v5337_v44, %v4907_v18 }
 0x1bd   :  { %1567 = vmatpush1.xpose.msra.mxu0 %v1378_v24  ;;  %1637 = vmatpush1.xpose.msra.mxu1 %v1380_v42  ;;  %8949 = vst [vmem:[#allocation78_spill] sm:$0xff] %v5341_v40  ;;  %v1364_v24 = vmul.f32 %v5309_v30, %v5309_v30  ;;  %v1349_v42 = vmul.f32 %v5321_v58, %v5321_v58 }
 0x1be   :  { %1568 = vmatprep.subr.mxu0 %v1363_v55  ;;  %1638 = vmatprep.subr.mxu1 %v1365_v6  ;;  %v5361_v55 = vsub.f32 %v5281_v38, %v4907_v18  ;;  %v5365_v6 = vsub.f32 %v5289_v49, %v4907_v18  ;;  %v8953_v38 = vld [vmem:[#allocation21_spill] sm:$0xff]  ;;  %v8955_v49 = vld [vmem:[#allocation26_spill] sm:$0xff]  ;;  %v1348_v50 = vmul.f32 %v5353_v4, %v5353_v4 }
 0x1bf   :  { %v5381_v2 = vadd.f32 %v8953_v38, %v5111_v46  ;;  %v5385_v39 = vadd.f32 %v8955_v49, %v5115_v32  ;;  %v5397_v52 = vsub.f32 %v5341_v40, %v4907_v18  ;;  %v8957_v40 = vld [vmem:[#allocation15_spill] sm:$0xff] }
 0x1c0   :  { %v1331_v49 = vmul.f32 %v5361_v55, %v5361_v55  ;;  %v1333_v38 = vmul.f32 %v5365_v6, %v5365_v6  ;;  %v5417_v44 = vadd.f32 %v8957_v40, %v5111_v46  ;;  %v8961_v40 = vld [vmem:[#allocation42_spill] sm:$0xff] }
 0x1c1   :  { %1569 = vmatpush1.xpose.msra.mxu0 %v1362_v53  ;;  %1639 = vmatpush1.xpose.msra.mxu1 %v1364_v24  ;;  %8954 = vst [vmem:[#allocation21_spill] sm:$0xff] %v5381_v2  ;;  %8956 = vst [vmem:[#allocation26_spill] sm:$0xff] %v5385_v39  ;;  %v5405_v53 = vsub.f32 %v5325_v45, %v4949_v59  ;;  %v5409_v24 = vsub.f32 %v5333_v26, %v4949_v59 }
 0x1c2   :  { %1570 = vmatprep.subr.mxu0 %v1347_v14  ;;  %1640 = vmatprep.subr.mxu1 %v1349_v42  ;;  %v5411_v14 = vpop.f32.mrf.mxu0  ;;  %v5413_v42 = vpop.f32.mrf.mxu1  ;;  %8958 = vst [vmem:[#allocation15_spill] sm:$0xff] %v5417_v44  ;;  %v1330_v26 = vmul.f32 %v5393_v13, %v5393_v13  ;;  %v1332_v45 = vmul.f32 %v5397_v52, %v5397_v52 }
 0x1c3   :  { %v5433_v46 = vsub.f32 %v5385_v39, %v4949_v59  ;;  %v1315_v32 = vmul.f32 %v5405_v53, %v5405_v53  ;;  %v1317_v27 = vmul.f32 %v5409_v24, %v5409_v24 }
 0x1c5   :  { %1571 = vmatpush1.xpose.msra.mxu0 %v1346_v63  ;;  %1641 = vmatpush1.xpose.msra.mxu1 %v1348_v50  ;;  %v5429_v63 = vsub.f32 %v5381_v2, %v4949_v59  ;;  %v5441_v50 = vsub.f32 %v5369_v61, %v8961_v40  ;;  %v5449_v2 = vpop.f32.mrf.mxu1  ;;  %v1316_v59 = vmul.f32 %v5433_v46, %v5433_v46 }
 0x1c6   :  { %1572 = vmatprep.subr.mxu0 %v1331_v49  ;;  %1642 = vmatprep.subr.mxu1 %v1333_v38  ;;  %v5445_v49 = vsub.f32 %v5377_v1, %v8961_v40  ;;  %v5447_v38 = vpop.f32.mrf.mxu0  ;;  %v5457_v61 = vsub.f32 %v5417_v44, %v8961_v40  ;;  %v5461_v1 = vsub.f32 %v5421_v17, %v8961_v40 }
 0x1c7   :  { %v1314_v39 = vmul.f32 %v5429_v63, %v5429_v63 }
 0x1c8   :  { %v1298_v44 = vmul.f32 %v5457_v61, %v5457_v61  ;;  %v1300_v17 = vmul.f32 %v5461_v1, %v5461_v1 }
 0x1c9   :  { %1573 = vmatpush1.xpose.msra.mxu0 %v1330_v26  ;;  %1643 = vmatpush1.xpose.msra.mxu1 %v1332_v45  ;;  %v1299_v26 = vmul.f32 %v5441_v50, %v5441_v50  ;;  %v1301_v45 = vmul.f32 %v5445_v49, %v5445_v49 }
 0x1ca   :  { %1574 = vmatprep.subr.mxu0 %v1315_v32  ;;  %1644 = vmatprep.subr.mxu1 %v1317_v27  ;;  %v5467_v32 = vpop.f32.mrf.mxu0  ;;  %v5469_v27 = vpop.f32.mrf.mxu1 }
 0x1cc   :  { %v5475_v40 = vpop.f32.mrf.mxu0  ;;  %v5477_v3 = vpop.f32.mrf.mxu1 }
 0x1cd   :  { %1575 = vmatpush1.xpose.msra.mxu0 %v1314_v39  ;;  %1645 = vmatpush1.xpose.msra.mxu1 %v1316_v59 }
 0x1ce   :  { %1576 = vmatprep.subr.mxu0 %v1299_v26  ;;  %1646 = vmatprep.subr.mxu1 %v1301_v45  ;;  %v894_v39 = vpop.f32.mrf.mxu0  ;;  %v967_v59 = vpop.f32.mrf.mxu1 }
 0x1d0   :  { %v898_v26 = vpop.f32.mrf.mxu0  ;;  %v971_v45 = vpop.f32.mrf.mxu1 }
 0x1d1   :  { %1577 = vmatpush1.xpose.msra.mxu0 %v1298_v44  ;;  %1647 = vmatpush1.xpose.msra.mxu1 %v1300_v17 }
 0x1d2   :  { %1578 = vmatprep.subr.mxu0 %v5139_v21  ;;  %1648 = vmatprep.subr.mxu1 %v5143_v43  ;;  %v900_v17 = vpop.f32.mrf.mxu0  ;;  %v973_v21 = vpop.f32.mrf.mxu1 }
 0x1d4   :  { %v902_v43 = vpop.f32.mrf.mxu0  ;;  %v975_v44 = vpop.f32.mrf.mxu1 }
 0x1d5   :  { %1579 = vmatpush1.xpose.msra.mxu0 %v5167_v41  ;;  %1649 = vmatpush1.xpose.msra.mxu1 %v5171_v54  ;;  %v5500_v41 = vld [vmem:[%s8574_s1 + $0x8] sm:$0xff]  ;;  %s4274_s1 = smov 64  }
 0x1d6   :  { %1580 = vmatprep.subr.mxu0 %v5179_v20  ;;  %1650 = vmatprep.subr.mxu1 %v5183_v0  ;;  %v904_v54 = vpop.f32.mrf.mxu0  ;;  %v977_v20 = vpop.f32.mrf.mxu1  ;;  %v8962_v0 = vld [vmem:[#allocation12_spill] sm:$0xff] }
 0x1d9   :  { %1581 = vmatpush1.xpose.msra.mxu0 %v5217_v35  ;;  %1651 = vmatpush1.xpose.msra.mxu1 %v5221_v8  ;;  %v8963_v35 = vld [vmem:[#allocation14_spill] sm:$0xff] }
 0x1da   :  { %1582 = vmatprep.subr.mxu0 %v5209_v31  ;;  %1652 = vmatprep.subr.mxu1 %v5231_v62  ;;  %v5506_v31 = vrot.slane %v5500_v41, %v8962_v0  ;;  %v5510_v8 = vrot.slane %v5500_v41, %v8963_v35 }
 0x1dc   :  { %v5515_v62 = vadd.f32 %v904_v54, %v5506_v31  ;;  %v5646_v0 = vadd.f32 %v5411_v14, %v5506_v31 }
 0x1dd   :  { %1583 = vmatpush1.xpose.msra.mxu0 %v5255_v47  ;;  %1653 = vmatpush1.xpose.msra.mxu1 %v5263_v22  ;;  %v5518_v47 = vadd.f32 %v977_v20, %v5510_v8  ;;  %v8966_v22 = vld [vmem:[#allocation3_spill] sm:$0xff]  ;;  %v5612_v20 = vadd.f32 %v5469_v27, %v5510_v8 }
 0x1de   :  { %1584 = vmatprep.subr.mxu0 %v5273_v48  ;;  %1654 = vmatprep.subr.mxu1 %v5277_v34  ;;  %8964 = vst [vmem:[#allocation80_spill] sm:$0xff] %v5515_v62  ;;  %v5522_v48 = vrot.slane %v5500_v41, %v8966_v22  ;;  %v8967_v34 = vld [vmem:[#allocation13_spill] sm:$0xff]  ;;  %8984 = vst [vmem:[#allocation98_spill] sm:$0xff] %v5646_v0 }
 0x1df   :  { %8965 = vst [vmem:[#allocation81_spill] sm:$0xff] %v5518_v47  ;;  %8982 = vst [vmem:[#allocation96_spill] sm:$0xff] %v5612_v20 }
 0x1e1   :  { %1585 = vmatpush1.xpose.msra.mxu0 %v5305_v19  ;;  %1655 = vmatpush1.xpose.msra.mxu1 %v5309_v30  ;;  %v5526_v19 = vrot.slane %v5500_v41, %v8967_v34  ;;  %v5528_v30 = vpop.f32.mrf.mxu0  ;;  %v5650_v34 = vadd.f32 %v5447_v38, %v5522_v48 }
 0x1e2   :  { %1586 = vmatprep.subr.mxu0 %v5317_v23  ;;  %1656 = vmatprep.subr.mxu1 %v5321_v58  ;;  %8968 = vst [vmem:[#allocation82_spill] sm:$0xff] %v5528_v30  ;;  %v5530_v23 = vpop.f32.mrf.mxu1  ;;  %v5537_v58 = vadd.f32 %v900_v17, %v5506_v31  ;;  %v5566_v17 = vadd.f32 %v898_v26, %v5522_v48  ;;  %v9004_v30 = vld [vmem:[#allocation53_spill] sm:$0xff] }
 0x1e3   :  { %8969 = vst [vmem:[#allocation83_spill] sm:$0xff] %v5530_v23  ;;  %8985 = vst [vmem:[#allocation99_spill] sm:$0xff] %v5650_v34 }
 0x1e4   :  { %8970 = vst [vmem:[#allocation84_spill] sm:$0xff] %v5537_v58  ;;  %8975 = vst [vmem:[#allocation89_spill] sm:$0xff] %v5566_v17 }
 0x1e5   :  { %1587 = vmatpush1.xpose.msra.mxu0 %v5349_v25  ;;  %1657 = vmatpush1.xpose.msra.mxu1 %v5353_v4  ;;  %v5540_v25 = vadd.f32 %v902_v43, %v5522_v48  ;;  %v5543_v4 = vadd.f32 %v975_v44, %v5526_v19  ;;  %v5602_v44 = vadd.f32 %v5475_v40, %v5522_v48 }
 0x1e6   :  { %1588 = vmatprep.subr.mxu0 %v5361_v55  ;;  %1658 = vmatprep.subr.mxu1 %v5365_v6  ;;  %v5546_v55 = vadd.f32 %v973_v21, %v5510_v8  ;;  %v5550_v6 = vsub.f32 %v5515_v62, %v4742_v7  ;;  %v5571_v21 = vadd.f32 %v971_v45, %v5526_v19 }
 0x1e7   :  { %8971 = vst [vmem:[#allocation85_spill] sm:$0xff] %v5540_v25  ;;  %8972 = vst [vmem:[#allocation86_spill] sm:$0xff] %v5543_v4  ;;  %v5575_v43 = vsub.f32 %v5540_v25, %v4742_v7  ;;  %v5598_v45 = vadd.f32 %v5467_v32, %v5506_v31  ;;  %v5616_v32 = vadd.f32 %v5477_v3, %v5526_v19 }
 0x1e8   :  { %8973 = vst [vmem:[#allocation87_spill] sm:$0xff] %v5546_v55  ;;  %8976 = vst [vmem:[#allocation90_spill] sm:$0xff] %v5571_v21  ;;  %v5594_v26 = vsub.f32 %v5546_v55, %v4787_v51  ;;  %v5620_v40 = vsub.f32 %v5566_v17, %v4787_v51  ;;  %v5630_v27 = vsub.f32 %v5571_v21, %v4787_v51 }
 0x1e9   :  { %1589 = vmatpush1.xpose.msra.mxu0 %v5393_v13  ;;  %1659 = vmatpush1.xpose.msra.mxu1 %v5397_v52  ;;  %v5554_v13 = vsub.f32 %v5518_v47, %v4742_v7  ;;  %v5556_v52 = vpop.f32.mrf.mxu0  ;;  %8978 = vst [vmem:[#allocation92_spill] sm:$0xff] %v5598_v45  ;;  %8979 = vst [vmem:[#allocation93_spill] sm:$0xff] %v5602_v44  ;;  %v1414_v35 = vmul.f32 %v5575_v43, %v5575_v43 }
 0x1ea   :  { %1590 = vmatprep.subr.mxu0 %v5405_v53  ;;  %1660 = vmatprep.subr.mxu1 %v5409_v24  ;;  %v5558_v53 = vpop.f32.mrf.mxu1  ;;  %v5563_v24 = vadd.f32 %v894_v39, %v5506_v31  ;;  %v5586_v39 = vadd.f32 %v967_v59, %v5510_v8  ;;  %8983 = vst [vmem:[#allocation97_spill] sm:$0xff] %v5616_v32 }
 0x1eb   :  { %v5604_v59 = vpop.f32.mrf.mxu0  ;;  %v1401_v3 = vmul.f32 %v5594_v26, %v5594_v26  ;;  %v1398_v14 = vmul.f32 %v5620_v40, %v5620_v40  ;;  %v1400_v38 = vmul.f32 %v5630_v27, %v5630_v27  ;;  %v5700_v17 = vadd.f32 %v5329_v15, %v5510_v8 }
 0x1ec   :  { %8974 = vst [vmem:[#allocation88_spill] sm:$0xff] %v5563_v24  ;;  %8977 = vst [vmem:[#allocation91_spill] sm:$0xff] %v5586_v39  ;;  %v5606_v54 = vpop.f32.mrf.mxu1  ;;  %v5716_v15 = vsub.f32 %v5650_v34, %v4820_v28  ;;  %v5736_v34 = vadd.f32 %v5241_v9, %v5506_v31  ;;  %v5744_v55 = vadd.f32 %v5243_v33, %v5510_v8 }
 0x1ed   :  { %1591 = vmatpush1.xpose.msra.mxu0 %v5429_v63  ;;  %1661 = vmatpush1.xpose.msra.mxu1 %v5433_v46  ;;  %v5579_v63 = vsub.f32 %v5543_v4, %v4742_v7  ;;  %v5583_v46 = vsub.f32 %v5537_v58, %v4787_v51  ;;  %8980 = vst [vmem:[#allocation94_spill] sm:$0xff] %v5604_v59  ;;  %8981 = vst [vmem:[#allocation95_spill] sm:$0xff] %v5606_v54  ;;  %v5652_v4 = vpop.f32.mrf.mxu0 }
 0x1ee   :  { %1592 = vmatprep.subr.mxu0 %v5441_v50  ;;  %1662 = vmatprep.subr.mxu1 %v5445_v49  ;;  %v1415_v50 = vmul.f32 %v5550_v6, %v5550_v6  ;;  %v1417_v49 = vmul.f32 %v5554_v13, %v5554_v13  ;;  %v5654_v21 = vpop.f32.mrf.mxu1  ;;  %8989 = vst [vmem:[#allocation103_spill] sm:$0xff] %v5700_v17  ;;  %8992 = vst [vmem:[#allocation106_spill] sm:$0xff] %v5736_v34 }
 0x1ef   :  { %8993 = vst [vmem:[#allocation107_spill] sm:$0xff] %v5744_v55  ;;  %v1366_v9 = vmul.f32 %v5716_v15, %v5716_v15  ;;  %v5788_v58 = vadd.f32 %v5147_v12, %v5510_v8  ;;  %v5832_v54 = vadd.f32 %v9004_v30, %v5526_v19 }
 0x1f0   :  { %v5696_v25 = vpop.f32.mrf.mxu1 }
 0x1f1   :  { %1593 = vmatpush1.xpose.msra.mxu0 %v5457_v61  ;;  %1663 = vmatpush1.xpose.msra.mxu1 %v5461_v1  ;;  %v1416_v1 = vmul.f32 %v5579_v63, %v5579_v63  ;;  %v1399_v61 = vmul.f32 %v5583_v46, %v5583_v46  ;;  %8997 = vst [vmem:[#allocation111_spill] sm:$0xff] %v5788_v58  ;;  %9005 = vst [vmem:[#allocation53_spill] sm:$0xff] %v5832_v54 }
 0x1f2   :  { %1702 = vmatprep.subr.mxu0 %v1415_v50  ;;  %1772 = vmatprep.subr.mxu1 %v1417_v49  ;;  %v5638_v50 = vsub.f32 %v5563_v24, %v4740_v5  ;;  %v5642_v49 = vsub.f32 %v5586_v39, %v4740_v5  ;;  %v5658_v24 = vadd.f32 %v5413_v42, %v5510_v8  ;;  %v5740_v47 = vpop.f32.mrf.mxu1 }
 0x1f3   :  { %v5662_v39 = vadd.f32 %v5449_v2, %v5526_v19  ;;  %v5674_v42 = vsub.f32 %v5616_v32, %v4740_v5  ;;  %v5692_v32 = vadd.f32 %v5327_v60, %v5506_v31 }
 0x1f4   :  { %1627 = vmatmul.mubr.f32.vlgmr.msra.gmra.mxu0 %v8937_v36  ;;  %1697 = vmatmul.mubr.f32.vlgmr.msra.gmra.mxu1 %v8937_v36  ;;  %8986 = vst [vmem:[#allocation100_spill] sm:$0xff] %v5658_v24  ;;  %v1383_v2 = vmul.f32 %v5638_v50, %v5638_v50  ;;  %v5784_v62 = vpop.f32.mrf.mxu1 }
 0x1f5   :  { %1703 = vmatpush1.xpose.msra.mxu0 %v1414_v35  ;;  %1773 = vmatpush1.xpose.msra.mxu1 %v1416_v1  ;;  %8987 = vst [vmem:[#allocation101_spill] sm:$0xff] %v5662_v39  ;;  %v5670_v35 = vsub.f32 %v5602_v44, %v4740_v5  ;;  %v1385_v1 = vmul.f32 %v5642_v49, %v5642_v49  ;;  %8988 = vst [vmem:[#allocation102_spill] sm:$0xff] %v5692_v32  ;;  %v5694_v44 = vpop.f32.mrf.mxu0 }
 0x1f6   :  { %1704 = vmatprep.subr.mxu0 %v1399_v61  ;;  %1774 = vmatprep.subr.mxu1 %v1401_v3  ;;  %v5684_v61 = vsub.f32 %v5598_v45, %v4820_v28  ;;  %v5688_v3 = vsub.f32 %v5612_v20, %v4820_v28  ;;  %v5704_v45 = vadd.f32 %v5371_v10, %v5522_v48 }
 0x1f7   :  { %1766 = vmatprep.mubr.f32.mxu0 %v8937_v36  ;;  %1836 = vmatprep.mubr.f32.mxu1 %v8937_v36  ;;  %v5708_v20 = vadd.f32 %v5373_v11, %v5526_v19  ;;  %v1382_v60 = vmul.f32 %v5670_v35, %v5670_v35  ;;  %v5720_v10 = vsub.f32 %v5662_v39, %v4820_v28  ;;  %v5738_v39 = vpop.f32.mrf.mxu0 }
 0x1f8   :  { %8990 = vst [vmem:[#allocation104_spill] sm:$0xff] %v5704_v45  ;;  %v1367_v11 = vmul.f32 %v5684_v61, %v5684_v61  ;;  %v5760_v33 = vsub.f32 %v5704_v45, %v4865_v56  ;;  %v5780_v45 = vadd.f32 %v5145_v29, %v5506_v31 }
 0x1f9   :  { %1705 = vmatpush1.xpose.msra.mxu0 %v1398_v14  ;;  %1775 = vmatpush1.xpose.msra.mxu1 %v1400_v38  ;;  %8991 = vst [vmem:[#allocation105_spill] sm:$0xff] %v5708_v20  ;;  %v1384_v14 = vmul.f32 %v5674_v42, %v5674_v42  ;;  %v1369_v38 = vmul.f32 %v5688_v3, %v5688_v3 }
 0x1fa   :  { %1706 = vmatprep.subr.mxu0 %v1383_v2  ;;  %1776 = vmatprep.subr.mxu1 %v1385_v1  ;;  %v5728_v2 = vsub.f32 %v5646_v0, %v4865_v56  ;;  %v5732_v1 = vsub.f32 %v5658_v24, %v4865_v56  ;;  %v5748_v0 = vadd.f32 %v5283_v57, %v5522_v48 }
 0x1fb   :  { %v5752_v24 = vadd.f32 %v5285_v16, %v5526_v19  ;;  %v5764_v57 = vsub.f32 %v5708_v20, %v4865_v56  ;;  %8996 = vst [vmem:[#allocation110_spill] sm:$0xff] %v5780_v45  ;;  %v5782_v20 = vpop.f32.mrf.mxu0  ;;  %v1350_v29 = vmul.f32 %v5760_v33, %v5760_v33 }
 0x1fc   :  { %8994 = vst [vmem:[#allocation108_spill] sm:$0xff] %v5748_v0  ;;  %v1351_v16 = vmul.f32 %v5728_v2, %v5728_v2  ;;  %v5804_v12 = vsub.f32 %v5748_v0, %v4907_v18  ;;  %v5824_v0 = vpop.f32.mrf.mxu1 }
 0x1fd   :  { %1707 = vmatpush1.xpose.msra.mxu0 %v1382_v60  ;;  %1777 = vmatpush1.xpose.msra.mxu1 %v1384_v14  ;;  %8995 = vst [vmem:[#allocation109_spill] sm:$0xff] %v5752_v24  ;;  %v1368_v60 = vmul.f32 %v5720_v10, %v5720_v10  ;;  %v1353_v14 = vmul.f32 %v5732_v1, %v5732_v1 }
 0x1fe   :  { %1708 = vmatprep.subr.mxu0 %v1367_v11  ;;  %1778 = vmatprep.subr.mxu1 %v1369_v38  ;;  %v5772_v11 = vsub.f32 %v5692_v32, %v4907_v18  ;;  %v5776_v38 = vsub.f32 %v5700_v17, %v4907_v18  ;;  %v5792_v32 = vadd.f32 %v5193_v37, %v5522_v48  ;;  %v8999_v17 = vld [vmem:[#allocation64_spill] sm:$0xff] }
 0x1ff   :  { %v5796_v22 = vadd.f32 %v8999_v17, %v5526_v19  ;;  %v1352_v31 = vmul.f32 %v5764_v57, %v5764_v57  ;;  %v5808_v37 = vsub.f32 %v5752_v24, %v4907_v18  ;;  %v9002_v24 = vld [vmem:[#allocation52_spill] sm:$0xff] }
 0x200   :  { %8998 = vst [vmem:[#allocation112_spill] sm:$0xff] %v5792_v32  ;;  %v1335_v8 = vmul.f32 %v5772_v11, %v5772_v11  ;;  %v1337_v17 = vmul.f32 %v5776_v38, %v5776_v38  ;;  %v5828_v23 = vadd.f32 %v9002_v24, %v5522_v48  ;;  %v9006_v24 = vld [vmem:[#allocation42_spill] sm:$0xff] }
 0x201   :  { %1709 = vmatpush1.xpose.msra.mxu0 %v1366_v9  ;;  %1779 = vmatpush1.xpose.msra.mxu1 %v1368_v60  ;;  %9000 = vst [vmem:[#allocation64_spill] sm:$0xff] %v5796_v22  ;;  %v9001_v9 = vld [vmem:[#allocation38_spill] sm:$0xff] }
 0x202   :  { %1710 = vmatprep.subr.mxu0 %v1351_v16  ;;  %1780 = vmatprep.subr.mxu1 %v1353_v14  ;;  %v5816_v60 = vsub.f32 %v5736_v34, %v9001_v9  ;;  %v5820_v16 = vsub.f32 %v5744_v55, %v9001_v9  ;;  %v5822_v14 = vpop.f32.mrf.mxu0  ;;  %9003 = vst [vmem:[#allocation52_spill] sm:$0xff] %v5828_v23 }
 0x203   :  { %v1334_v55 = vmul.f32 %v5804_v12, %v5804_v12  ;;  %v1336_v34 = vmul.f32 %v5808_v37, %v5808_v37  ;;  %v5844_v48 = vsub.f32 %v5796_v22, %v9001_v9 }
 0x204   :  { %v1319_v19 = vmul.f32 %v5816_v60, %v5816_v60  ;;  %v1321_v30 = vmul.f32 %v5820_v16, %v5820_v16 }
 0x205   :  { %1711 = vmatpush1.xpose.msra.mxu0 %v1350_v29  ;;  %1781 = vmatpush1.xpose.msra.mxu1 %v1352_v31  ;;  %v5840_v29 = vsub.f32 %v5792_v32, %v9001_v9  ;;  %v5852_v31 = vsub.f32 %v5780_v45, %v9006_v24  ;;  %v5860_v32 = vpop.f32.mrf.mxu1  ;;  %v1320_v9 = vmul.f32 %v5844_v48, %v5844_v48 }
 0x206   :  { %1712 = vmatprep.subr.mxu0 %v1335_v8  ;;  %1782 = vmatprep.subr.mxu1 %v1337_v17  ;;  %v5856_v8 = vsub.f32 %v5788_v58, %v9006_v24  ;;  %v5858_v17 = vpop.f32.mrf.mxu0  ;;  %v5868_v45 = vsub.f32 %v5828_v23, %v9006_v24  ;;  %v5872_v58 = vsub.f32 %v5832_v54, %v9006_v24 }
 0x207   :  { %v1318_v22 = vmul.f32 %v5840_v29, %v5840_v29 }
 0x208   :  { %v1302_v23 = vmul.f32 %v5868_v45, %v5868_v45  ;;  %v1304_v54 = vmul.f32 %v5872_v58, %v5872_v58 }
 0x209   :  { %1713 = vmatpush1.xpose.msra.mxu0 %v1334_v55  ;;  %1783 = vmatpush1.xpose.msra.mxu1 %v1336_v34  ;;  %v1303_v55 = vmul.f32 %v5852_v31, %v5852_v31  ;;  %v1305_v34 = vmul.f32 %v5856_v8, %v5856_v8 }
 0x20a   :  { %1714 = vmatprep.subr.mxu0 %v1319_v19  ;;  %1784 = vmatprep.subr.mxu1 %v1321_v30  ;;  %v5878_v19 = vpop.f32.mrf.mxu0  ;;  %v5880_v30 = vpop.f32.mrf.mxu1 }
 0x20c   :  { %v5886_v24 = vpop.f32.mrf.mxu0  ;;  %v5888_v59 = vpop.f32.mrf.mxu1 }
 0x20d   :  { %1715 = vmatpush1.xpose.msra.mxu0 %v1318_v22  ;;  %1785 = vmatpush1.xpose.msra.mxu1 %v1320_v9 }
 0x20e   :  { %1716 = vmatprep.subr.mxu0 %v1303_v55  ;;  %1786 = vmatprep.subr.mxu1 %v1305_v34  ;;  %v1040_v22 = vpop.f32.mrf.mxu0  ;;  %v1113_v9 = vpop.f32.mrf.mxu1 }
 0x210   :  { %v1044_v55 = vpop.f32.mrf.mxu0  ;;  %v1117_v34 = vpop.f32.mrf.mxu1 }
 0x211   :  { %1717 = vmatpush1.xpose.msra.mxu0 %v1302_v23  ;;  %1787 = vmatpush1.xpose.msra.mxu1 %v1304_v54 }
 0x212   :  { %1718 = vmatprep.subr.mxu0 %v5550_v6  ;;  %1788 = vmatprep.subr.mxu1 %v5554_v13  ;;  %v1046_v23 = vpop.f32.mrf.mxu0  ;;  %v1119_v6 = vpop.f32.mrf.mxu1 }
 0x214   :  { %v1048_v13 = vpop.f32.mrf.mxu0 }
 0x215   :  { %1719 = vmatpush1.xpose.msra.mxu0 %v5575_v43  ;;  %1789 = vmatpush1.xpose.msra.mxu1 %v5579_v63  ;;  %v1121_v43 = vpop.f32.mrf.mxu1 }
 0x216   :  { %1720 = vmatprep.subr.mxu0 %v5583_v46  ;;  %1790 = vmatprep.subr.mxu1 %v5594_v26  ;;  %v1050_v63 = vpop.f32.mrf.mxu0  ;;  %v9007_v26 = vld [vmem:[#allocation46_spill] sm:$0xff] }
 0x217   :  { %v1123_v46 = vpop.f32.mrf.mxu1  ;;  %v5912_v54 = vrot.slane %v5500_v41, %v9007_v26 }
 0x219   :  { %1721 = vmatpush1.xpose.msra.mxu0 %v5620_v40  ;;  %1791 = vmatpush1.xpose.msra.mxu1 %v5630_v27  ;;  %v9008_v40 = vld [vmem:[#allocation47_spill] sm:$0xff]  ;;  %v6162_v26 = vadd.f32 %v5556_v52, %v5912_v54 }
 0x21a   :  { %1722 = vmatprep.subr.mxu0 %v5638_v50  ;;  %1792 = vmatprep.subr.mxu1 %v5642_v49  ;;  %v5916_v27 = vrot.slane %v5500_v41, %v9008_v40  ;;  %v5921_v50 = vadd.f32 %v1050_v63, %v5912_v54 }
 0x21c   :  { %v5924_v49 = vadd.f32 %v1123_v46, %v5916_v27 }
 0x21d   :  { %1723 = vmatpush1.xpose.msra.mxu0 %v5670_v35  ;;  %1793 = vmatpush1.xpose.msra.mxu1 %v5674_v42  ;;  %v9009_v35 = vld [vmem:[#allocation48_spill] sm:$0xff] }
 0x21e   :  { %1724 = vmatprep.subr.mxu0 %v5684_v61  ;;  %1794 = vmatprep.subr.mxu1 %v5688_v3  ;;  %v5928_v42 = vrot.slane %v5500_v41, %v9009_v35  ;;  %v9010_v61 = vld [vmem:[#allocation49_spill] sm:$0xff] }
 0x21f   :  { %v5932_v3 = vrot.slane %v5500_v41, %v9010_v61  ;;  %v5948_v41 = vadd.f32 %v1119_v6, %v5916_v27  ;;  %v6048_v6 = vadd.f32 %v5824_v0, %v5916_v27  ;;  %v9021_v61 = vld [vmem:[#allocation94_spill] sm:$0xff] }
 0x220   :  { %v6170_v35 = vadd.f32 %v9021_v61, %v5928_v42 }
 0x221   :  { %1725 = vmatpush1.xpose.msra.mxu0 %v5716_v15  ;;  %1795 = vmatpush1.xpose.msra.mxu1 %v5720_v10  ;;  %v5939_v15 = vadd.f32 %v1048_v13, %v5928_v42  ;;  %v5942_v10 = vadd.f32 %v1121_v43, %v5932_v3  ;;  %9012 = vst [vmem:[#allocation114_spill] sm:$0xff] %v6048_v6 }
 0x222   :  { %1726 = vmatprep.subr.mxu0 %v5728_v2  ;;  %1796 = vmatprep.subr.mxu1 %v5732_v1  ;;  %v5945_v2 = vadd.f32 %v1046_v23, %v5912_v54  ;;  %v5952_v1 = vsub.f32 %v5921_v50, %v4742_v7  ;;  %v6044_v23 = vadd.f32 %v5858_v17, %v5928_v42 }
 0x223   :  { %v6052_v13 = vadd.f32 %v5860_v32, %v5932_v3  ;;  %v6134_v40 = vadd.f32 %v5696_v25, %v5932_v3  ;;  %9022 = vst [vmem:[#allocation94_spill] sm:$0xff] %v6170_v35 }
 0x225   :  { %1727 = vmatpush1.xpose.msra.mxu0 %v5760_v33  ;;  %1797 = vmatpush1.xpose.msra.mxu1 %v5764_v57  ;;  %v5956_v33 = vsub.f32 %v5924_v49, %v4742_v7  ;;  %v5961_v57 = vadd.f32 %v1040_v22, %v5912_v54  ;;  %v6006_v22 = vadd.f32 %v5880_v30, %v5916_v27 }
 0x226   :  { %1728 = vmatprep.subr.mxu0 %v5772_v11  ;;  %1798 = vmatprep.subr.mxu1 %v5776_v38  ;;  %v5964_v11 = vadd.f32 %v1044_v55, %v5928_v42  ;;  %v5969_v38 = vadd.f32 %v1113_v9, %v5916_v27  ;;  %v6010_v9 = vadd.f32 %v5888_v59, %v5932_v3 }
 0x227   :  { %v6026_v59 = vsub.f32 %v5961_v57, %v4740_v5  ;;  %9019 = vst [vmem:[#allocation121_spill] sm:$0xff] %v6134_v40 }
 0x228   :  { %v6064_v0 = vsub.f32 %v6010_v9, %v4740_v5 }
 0x229   :  { %1729 = vmatpush1.xpose.msra.mxu0 %v5804_v12  ;;  %1799 = vmatpush1.xpose.msra.mxu1 %v5808_v37  ;;  %v5972_v12 = vadd.f32 %v1117_v34, %v5932_v3  ;;  %v5976_v37 = vsub.f32 %v5939_v15, %v4742_v7  ;;  %v6036_v34 = vsub.f32 %v5969_v38, %v4740_v5 }
 0x22a   :  { %1730 = vmatprep.subr.mxu0 %v5816_v60  ;;  %1800 = vmatprep.subr.mxu1 %v5820_v16  ;;  %v5980_v60 = vsub.f32 %v5942_v10, %v4742_v7  ;;  %v1419_v16 = vmul.f32 %v5952_v1, %v5952_v1  ;;  %v6000_v7 = vadd.f32 %v5886_v24, %v5928_v42 }
 0x22b   :  { %v1418_v24 = vmul.f32 %v5976_v37, %v5976_v37  ;;  %v1387_v32 = vmul.f32 %v6026_v59, %v6026_v59  ;;  %v1389_v63 = vmul.f32 %v6036_v34, %v6036_v34 }
 0x22c   :  { %v6060_v17 = vsub.f32 %v6000_v7, %v4740_v5  ;;  %v6082_v5 = vadd.f32 %v5738_v39, %v5912_v54 }
 0x22d   :  { %1731 = vmatpush1.xpose.msra.mxu0 %v5840_v29  ;;  %1801 = vmatpush1.xpose.msra.mxu1 %v5844_v48  ;;  %v1421_v29 = vmul.f32 %v5956_v33, %v5956_v33  ;;  %v5988_v48 = vsub.f32 %v5945_v2, %v4787_v51 }
 0x22e   :  { %1732 = vmatprep.subr.mxu0 %v5852_v31  ;;  %1802 = vmatprep.subr.mxu1 %v5856_v8  ;;  %v5992_v31 = vsub.f32 %v5948_v41, %v4787_v51  ;;  %v5996_v8 = vadd.f32 %v5878_v19, %v5912_v54  ;;  %v6014_v19 = vsub.f32 %v5964_v11, %v4787_v51 }
 0x22f   :  { %v1403_v30 = vmul.f32 %v5988_v48, %v5988_v48  ;;  %v1386_v39 = vmul.f32 %v6060_v17, %v6060_v17 }
 0x230   :  { %v1405_v55 = vmul.f32 %v5992_v31, %v5992_v31  ;;  %v6074_v46 = vsub.f32 %v5996_v8, %v4820_v28 }
 0x231   :  { %1733 = vmatpush1.xpose.msra.mxu0 %v5868_v45  ;;  %1803 = vmatpush1.xpose.msra.mxu1 %v5872_v58  ;;  %v1420_v58 = vmul.f32 %v5980_v60, %v5980_v60  ;;  %v6022_v45 = vsub.f32 %v5972_v12, %v4787_v51  ;;  %v6040_v51 = vadd.f32 %v5822_v14, %v5912_v54 }
 0x232   :  { %1842 = vmatprep.subr.mxu0 %v1419_v16  ;;  %1912 = vmatprep.subr.mxu1 %v1421_v29  ;;  %v1402_v14 = vmul.f32 %v6014_v19, %v6014_v19  ;;  %v6078_v16 = vsub.f32 %v6006_v22, %v4820_v28  ;;  %v6086_v29 = vadd.f32 %v5740_v47, %v5916_v27 }
 0x233   :  { %9011 = vst [vmem:[#allocation113_spill] sm:$0xff] %v6040_v51  ;;  %v1404_v43 = vmul.f32 %v6022_v45, %v6022_v45  ;;  %v6102_v47 = vsub.f32 %v6044_v23, %v4820_v28 }
 0x234   :  { %1767 = vmatmul.mubr.f32.vlgmr.msra.gmra.mxu0 %v8937_v36  ;;  %1837 = vmatmul.mubr.f32.vlgmr.msra.gmra.mxu1 %v8937_v36  ;;  %9013 = vst [vmem:[#allocation115_spill] sm:$0xff] %v6086_v29 }
 0x235   :  { %1843 = vmatpush1.xpose.msra.mxu0 %v1418_v24  ;;  %1913 = vmatpush1.xpose.msra.mxu1 %v1420_v58  ;;  %v6090_v24 = vadd.f32 %v5782_v20, %v5928_v42  ;;  %v6094_v58 = vadd.f32 %v5784_v62, %v5932_v3  ;;  %v6106_v20 = vsub.f32 %v6052_v13, %v4820_v28 }
 0x236   :  { %1844 = vmatprep.subr.mxu0 %v1403_v30  ;;  %1914 = vmatprep.subr.mxu1 %v1405_v55  ;;  %v1388_v30 = vmul.f32 %v6064_v0, %v6064_v0  ;;  %v1371_v62 = vmul.f32 %v6074_v46, %v6074_v46  ;;  %v1373_v55 = vmul.f32 %v6078_v16, %v6078_v16 }
 0x237   :  { %1906 = vmatprep.mubr.f32.mxu0 %v8937_v36  ;;  %1976 = vmatprep.mubr.f32.mxu1 %v8937_v36  ;;  %9014 = vst [vmem:[#allocation116_spill] sm:$0xff] %v6090_v24  ;;  %9015 = vst [vmem:[#allocation117_spill] sm:$0xff] %v6094_v58  ;;  %v6126_v28 = vadd.f32 %v5654_v21, %v5916_v27  ;;  %v6142_v21 = vsub.f32 %v6090_v24, %v4865_v56 }
 0x239   :  { %1845 = vmatpush1.xpose.msra.mxu0 %v1402_v14  ;;  %1915 = vmatpush1.xpose.msra.mxu1 %v1404_v43  ;;  %v6114_v14 = vsub.f32 %v6040_v51, %v4865_v56  ;;  %v6118_v43 = vsub.f32 %v6048_v6, %v4865_v56  ;;  %9017 = vst [vmem:[#allocation119_spill] sm:$0xff] %v6126_v28  ;;  %v9028_v51 = vld [vmem:[#allocation42_spill] sm:$0xff] }
 0x23a   :  { %1846 = vmatprep.subr.mxu0 %v1387_v32  ;;  %1916 = vmatprep.subr.mxu1 %v1389_v63  ;;  %v6122_v32 = vadd.f32 %v5652_v4, %v5912_v54  ;;  %v6130_v63 = vadd.f32 %v5694_v44, %v5928_v42  ;;  %v1370_v4 = vmul.f32 %v6102_v47, %v6102_v47 }
 0x23b   :  { %v6146_v44 = vsub.f32 %v6094_v58, %v4865_v56  ;;  %v1355_v25 = vmul.f32 %v6114_v14, %v6114_v14  ;;  %v6166_v56 = vadd.f32 %v5558_v53, %v5916_v27  ;;  %v9023_v58 = vld [vmem:[#allocation95_spill] sm:$0xff]  ;;  %v1354_v52 = vmul.f32 %v6142_v21, %v6142_v21 }
 0x23c   :  { %9016 = vst [vmem:[#allocation118_spill] sm:$0xff] %v6122_v32  ;;  %9018 = vst [vmem:[#allocation120_spill] sm:$0xff] %v6130_v63  ;;  %v6174_v24 = vadd.f32 %v9023_v58, %v5932_v3  ;;  %v1210_v53 = vsub.f32 %v6130_v63, %v4907_v18  ;;  %v1212_v27 = vsub.f32 %v6134_v40, %v4907_v18 }
 0x23d   :  { %1847 = vmatpush1.xpose.msra.mxu0 %v1386_v39  ;;  %1917 = vmatpush1.xpose.msra.mxu1 %v1388_v30  ;;  %v1372_v39 = vmul.f32 %v6106_v20, %v6106_v20  ;;  %v1357_v30 = vmul.f32 %v6118_v43, %v6118_v43  ;;  %9020 = vst [vmem:[#allocation122_spill] sm:$0xff] %v6166_v56 }
 0x23e   :  { %1848 = vmatprep.subr.mxu0 %v1371_v62  ;;  %1918 = vmatprep.subr.mxu1 %v1373_v55  ;;  %v6154_v62 = vsub.f32 %v6082_v5, %v4907_v18  ;;  %v6158_v55 = vsub.f32 %v6086_v29, %v4907_v18  ;;  %9024 = vst [vmem:[#allocation95_spill] sm:$0xff] %v6174_v24  ;;  %v9027_v18 = vld [vmem:[#allocation83_spill] sm:$0xff] }
 0x23f   :  { %v1356_v54 = vmul.f32 %v6146_v44, %v6146_v44  ;;  %v6198_v40 = vadd.f32 %v9027_v18, %v5932_v3  ;;  %v1338_v6 = vmul.f32 %v1210_v53, %v1210_v53  ;;  %v1340_v29 = vmul.f32 %v1212_v27, %v1212_v27 }
 0x240   :  { %v1339_v61 = vmul.f32 %v6154_v62, %v6154_v62  ;;  %v1341_v58 = vmul.f32 %v6158_v55, %v6158_v55 }
 0x241   :  { %1849 = vmatpush1.xpose.msra.mxu0 %v1370_v4  ;;  %1919 = vmatpush1.xpose.msra.mxu1 %v1372_v39  ;;  %v9025_v4 = vld [vmem:[#allocation38_spill] sm:$0xff] }
 0x242   :  { %1850 = vmatprep.subr.mxu0 %v1355_v25  ;;  %1920 = vmatprep.subr.mxu1 %v1357_v30  ;;  %v1195_v39 = vsub.f32 %v6122_v32, %v9025_v4  ;;  %v1197_v25 = vsub.f32 %v6126_v28, %v9025_v4  ;;  %v9026_v30 = vld [vmem:[#allocation82_spill] sm:$0xff]  ;;  %v1194_v32 = vsub.f32 %v6170_v35, %v9025_v4 }
 0x243   :  { %v6194_v63 = vadd.f32 %v9026_v30, %v5928_v42  ;;  %v1196_v28 = vsub.f32 %v6174_v24, %v9025_v4  ;;  %v1179_v42 = vsub.f32 %v6162_v26, %v9028_v51  ;;  %v1181_v30 = vsub.f32 %v6166_v56, %v9028_v51 }
 0x244   :  { %v1322_v3 = vmul.f32 %v1194_v32, %v1194_v32  ;;  %v1180_v4 = vsub.f32 %v6198_v40, %v9028_v51 }
 0x245   :  { %1851 = vmatpush1.xpose.msra.mxu0 %v1354_v52  ;;  %1921 = vmatpush1.xpose.msra.mxu1 %v1356_v54  ;;  %v1323_v52 = vmul.f32 %v1195_v39, %v1195_v39  ;;  %v1325_v54 = vmul.f32 %v1197_v25, %v1197_v25  ;;  %v1307_v18 = vmul.f32 %v1179_v42, %v1179_v42 }
 0x246   :  { %1852 = vmatprep.subr.mxu0 %v1339_v61  ;;  %1922 = vmatprep.subr.mxu1 %v1341_v58  ;;  %v1324_v61 = vmul.f32 %v1196_v28, %v1196_v28  ;;  %v1178_v58 = vsub.f32 %v6194_v63, %v9028_v51  ;;  %v1309_v24 = vmul.f32 %v1181_v30, %v1181_v30 }
 0x247   :  { %v1308_v56 = vmul.f32 %v1180_v4, %v1180_v4 }
 0x248   :  { %v1306_v35 = vmul.f32 %v1178_v58, %v1178_v58 }
 0x249   :  { %1853 = vmatpush1.xpose.msra.mxu0 %v1338_v6  ;;  %1923 = vmatpush1.xpose.msra.mxu1 %v1340_v29  ;;  %v9037_v6 = vld [vmem:[#allocation28_spill] sm:$0xff] }
 0x24a   :  { %1854 = vmatprep.subr.mxu0 %v1323_v52  ;;  %1924 = vmatprep.subr.mxu1 %v1325_v54  ;;  %v9049_v52 = vld [vmem:[#allocation33_spill] sm:$0xff] }
 0x24d   :  { %1855 = vmatpush1.xpose.msra.mxu0 %v1322_v3  ;;  %1925 = vmatpush1.xpose.msra.mxu1 %v1324_v61  ;;  %v9052_v61 = vld [vmem:[#allocation37_spill] sm:$0xff] }
 0x24e   :  { %1856 = vmatprep.subr.mxu0 %v1307_v18  ;;  %1926 = vmatprep.subr.mxu1 %v1309_v24  ;;  %v9054_v18 = vld [vmem:[#allocation43_spill] sm:$0xff] }
 0x251   :  { %1857 = vmatpush1.xpose.msra.mxu0 %v1306_v35  ;;  %1927 = vmatpush1.xpose.msra.mxu1 %v1308_v56  ;;  %v9029_v35 = vld [vmem:[#allocation23_spill] sm:$0xff]  ;;  %v9045_v56 = vmov 0  }
 0x252   :  { %1858 = vmatprep.subr.mxu0 %v5952_v1  ;;  %1928 = vmatprep.subr.mxu1 %v5956_v33  ;;  %v9030_v1 = vld [vmem:[#allocation18_spill] sm:$0xff] }
 0x253   :  { %v2086_v33 = vpack.c.bf16 %v9030_v1, %v9029_v35  ;;  %v9055_v35 = vld [vmem:[#allocation39_spill] sm:$0xff] }
 0x254   :  { %v2038_v1 = vpack.c.bf16 %v9055_v35, %v9054_v18 }
 0x255   :  { %1859 = vmatpush1.xpose.msra.mxu0 %v5976_v37  ;;  %1929 = vmatpush1.xpose.msra.mxu1 %v5980_v60  ;;  %v9031_v37 = vld [vmem:[#allocation25_spill] sm:$0xff]  ;;  %v9032_v60 = vld [vmem:[#allocation20_spill] sm:$0xff] }
 0x256   :  { %1860 = vmatprep.subr.mxu0 %v5988_v48  ;;  %1930 = vmatprep.subr.mxu1 %v5992_v31  ;;  %v2088_v48 = vpack.c.bf16 %v9032_v60, %v9031_v37  ;;  %v9033_v31 = vld [vmem:[#allocation9_spill] sm:$0xff]  ;;  %v9057_v37 = vld [vmem:[#allocation40_spill] sm:$0xff] }
 0x259   :  { %1861 = vmatpush1.xpose.msra.mxu0 %v6014_v19  ;;  %1931 = vmatpush1.xpose.msra.mxu1 %v6022_v45  ;;  %v9034_v19 = vld [vmem:[#allocation7_spill] sm:$0xff] }
 0x25a   :  { %1862 = vmatprep.subr.mxu0 %v6026_v59  ;;  %1932 = vmatprep.subr.mxu1 %v6036_v34  ;;  %v2085_v45 = vpack.c.bf16 %v9034_v19, %v9033_v31  ;;  %v9035_v59 = vld [vmem:[#allocation27_spill] sm:$0xff] }
 0x25b   :  { %v9036_v34 = vld [vmem:[#allocation19_spill] sm:$0xff] }
 0x25c   :  { %v2087_v51 = vpack.c.bf16 %v9036_v34, %v9035_v59  ;;  %v9059_v31 = vld [vmem:[#allocation11_spill] sm:$0xff]  ;;  %v9061_v59 = vld [vmem:[#allocation41_spill] sm:$0xff] }
 0x25d   :  { %1863 = vmatpush1.xpose.msra.mxu0 %v6060_v17  ;;  %1933 = vmatpush1.xpose.msra.mxu1 %v6064_v0  ;;  %v9038_v17 = vld [vmem:[#allocation22_spill] sm:$0xff] }
 0x25e   :  { %1864 = vmatprep.subr.mxu0 %v6074_v46  ;;  %1934 = vmatprep.subr.mxu1 %v6078_v16  ;;  %v2070_v0 = vpack.c.bf16 %v9038_v17, %v9037_v6  ;;  %v9039_v46 = vld [vmem:[#allocation30_spill] sm:$0xff]  ;;  %v9040_v16 = vld [vmem:[#allocation24_spill] sm:$0xff] }
 0x25f   :  { %v2072_v29 = vpack.c.bf16 %v9040_v16, %v9039_v46  ;;  %v9063_v6 = vld [vmem:[#allocation50_spill] sm:$0xff]  ;;  %v9065_v46 = vld [vmem:[#allocation51_spill] sm:$0xff] }
 0x261   :  { %1865 = vmatpush1.xpose.msra.mxu0 %v6102_v47  ;;  %1935 = vmatpush1.xpose.msra.mxu1 %v6106_v20 }
 0x262   :  { %1866 = vmatprep.subr.mxu0 %v6114_v14  ;;  %1936 = vmatprep.subr.mxu1 %v6118_v43 }
 0x265   :  { %1867 = vmatpush1.xpose.msra.mxu0 %v6142_v21  ;;  %1937 = vmatpush1.xpose.msra.mxu1 %v6146_v44  ;;  %v9043_v44 = vld [vmem:[#allocation31_spill] sm:$0xff] }
 0x266   :  { %1868 = vmatprep.subr.mxu0 %v6154_v62  ;;  %1938 = vmatprep.subr.mxu1 %v6158_v55  ;;  %v9044_v62 = vld [vmem:[#allocation29_spill] sm:$0xff] }
 0x267   :  { %v2071_v55 = vpack.c.bf16 %v9044_v62, %v9043_v44 }
 0x269   :  { %1869 = vmatpush1.xpose.msra.mxu0 %v1210_v53  ;;  %1939 = vmatpush1.xpose.msra.mxu1 %v1212_v27  ;;  %v9046_v53 = vld [vmem:[#allocation35_spill] sm:$0xff]  ;;  %v9047_v27 = vld [vmem:[#allocation32_spill] sm:$0xff] }
 0x26a   :  { %1870 = vmatprep.subr.mxu0 %v1195_v39  ;;  %1940 = vmatprep.subr.mxu1 %v1197_v25  ;;  %v2054_v39 = vpack.c.bf16 %v9047_v27, %v9046_v53  ;;  %v9048_v25 = vld [vmem:[#allocation36_spill] sm:$0xff] }
 0x26b   :  { %v2056_v54 = vpack.c.bf16 %v9049_v52, %v9048_v25 }
 0x26d   :  { %1871 = vmatpush1.xpose.msra.mxu0 %v1194_v32  ;;  %1941 = vmatpush1.xpose.msra.mxu1 %v1196_v28  ;;  %v9041_v32 = vld [vmem:[#allocation5_spill] sm:$0xff]  ;;  %v9042_v28 = vld [vmem:[#allocation4_spill] sm:$0xff] }
 0x26e   :  { %1872 = vmatprep.subr.mxu0 %v1179_v42  ;;  %1942 = vmatprep.subr.mxu1 %v1181_v30  ;;  %v2069_v21 = vpack.c.bf16 %v9042_v28, %v9041_v32  ;;  %v9050_v42 = vld [vmem:[#allocation6_spill] sm:$0xff] }
 0x26f   :  { %v9051_v30 = vld [vmem:[#allocation10_spill] sm:$0xff] }
 0x270   :  { %v2053_v3 = vpack.c.bf16 %v9051_v30, %v9050_v42 }
 0x271   :  { %1873 = vmatpush1.xpose.msra.mxu0 %v1178_v58  ;;  %1943 = vmatpush1.xpose.msra.mxu1 %v1180_v4  ;;  %v9053_v58 = vld [vmem:[#allocation34_spill] sm:$0xff] }
 0x272   :  { %2205 = vmatprep.subr.bf16.mxu0 %v2086_v33  ;;  %2278 = vmatprep.subr.bf16.mxu1 %v2088_v48  ;;  %v2055_v4 = vpack.c.bf16 %v9053_v58, %v9052_v61  ;;  %v9056_v33 = vld [vmem:[#allocation44_spill] sm:$0xff] }
 0x273   :  { %v2040_v60 = vpack.c.bf16 %v9057_v37, %v9056_v33  ;;  %v9058_v48 = vld [vmem:[#allocation8_spill] sm:$0xff] }
 0x274   :  { %v1488_v24 = vpop.f32.mrf.mxu0  ;;  %1907 = vmatmul.mubr.f32.vlgmr.msra.gmra.mxu0 %v8937_v36  ;;  %1977 = vmatmul.mubr.f32.vlgmr.msra.gmra.mxu1 %v8937_v36  ;;  %v1558_v47 = vpop.f32.mrf.mxu1  ;;  %v2037_v19 = vpack.c.bf16 %v9059_v31, %v9058_v48  ;;  %v1989_v31 = vld [vmem:[%s8575_s4] sm:$0x1] }
 0x275   :  { %v1559_v20 = vadd.f32 %v1558_v47, %v1488_v24  ;;  %2206 = vmatpush1.bf16.msra.mxu0 %v2085_v45  ;;  %2279 = vmatpush1.bf16.msra.mxu1 %v2087_v51  ;;  %v9060_v45 = vld [vmem:[#allocation45_spill] sm:$0xff]  ;;  %v9062_v51 = vld [vmem:[#allocation56_spill] sm:$0xff] }
 0x276   :  { %v1490_v14 = vpop.f32.mrf.mxu0  ;;  %2207 = vmatprep.subr.bf16.mxu0 %v2070_v0  ;;  %2280 = vmatprep.subr.bf16.mxu1 %v2072_v29  ;;  %v1560_v43 = vpop.f32.mrf.mxu1  ;;  %v2039_v34 = vpack.c.bf16 %v9061_v59, %v9060_v45  ;;  %v2090_v17 = vpack.c.bf16 %v9063_v6, %v9062_v51  ;;  %v9064_v0 = vld [vmem:[#allocation57_spill] sm:$0xff]  ;;  %v2011_v59 = vld [vmem:[%s8576_s5] sm:$0xff]  ;;  %v9067_v51 = vld [vmem:[#allocation3_spill] sm:$0xff] }
 0x277   :  { %2229 = vmatprep.mubr.bf16.mxu0 %v9045_v56  ;;  %2302 = vmatprep.mubr.bf16.mxu1 %v9045_v56  ;;  %v2092_v16 = vpack.c.bf16 %v9065_v46, %v9064_v0 }
 0x279   :  { %2208 = vmatpush1.bf16.msra.mxu0 %v2069_v21  ;;  %2281 = vmatpush1.bf16.msra.mxu1 %v2071_v55 }
 0x27a   :  { %2209 = vmatprep.subr.bf16.mxu0 %v2054_v39  ;;  %2282 = vmatprep.subr.bf16.mxu1 %v2056_v54 }
 0x27d   :  { %2210 = vmatpush1.bf16.msra.mxu0 %v2053_v3  ;;  %2283 = vmatpush1.bf16.msra.mxu1 %v2055_v4  ;;  %v4275_v4 = vmov 1966171168  }
 0x27e   :  { %2211 = vmatprep.subr.bf16.mxu0 %v2038_v1  ;;  %2284 = vmatprep.subr.bf16.mxu1 %v2040_v60  ;;  %v1994_v18 = vunpack.c.l.s4 %v4275_v4  ;;  %v9066_v1 = vld [vmem:[#allocation2_spill] sm:$0xff] }
 0x280   :  { %v1995_v35 = vunpack.c.0.s8 %v1994_v18  ;;  %v9082_v18 = vld [vmem:[#allocation72_spill] sm:$0xff] }
 0x281   :  { %2212 = vmatpush1.bf16.msra.mxu0 %v2037_v19  ;;  %2285 = vmatpush1.bf16.msra.mxu1 %v2039_v34  ;;  %v2012_v34 = vld [vmem:[%s8576_s5 + $0x8] sm:$0xff] }
 0x282   :  { %2351 = vmatprep.subr.bf16.mxu0 %v2090_v17  ;;  %2424 = vmatprep.subr.bf16.mxu1 %v2092_v16  ;;  %v1998_v33 = vsub.s32 %v1995_v35, %v9066_v1  ;;  %v9068_v16 = vld [vmem:[#allocation59_spill] sm:$0xff]  ;;  %v9083_v35 = vld [vmem:[#allocation69_spill] sm:$0xff] }
 0x283   :  { %v2060_v1 = vpack.c.bf16 %v9083_v35, %v9082_v18  ;;  %v9101_v18 = vld [vmem:[#allocation85_spill] sm:$0xff] }
 0x2b4   :  { %v1628_v29 = vpop.f32.mrf.mxu0  ;;  %v1698_v24 = vpop.f32.mrf.mxu1 }
 0x2b5   :  { %v1629_v47 = vadd.f32 %v1628_v29, %v1559_v20  ;;  %v9069_v29 = vld [vmem:[#allocation54_spill] sm:$0xff] }
 0x2b6   :  { %v1630_v14 = vpop.f32.mrf.mxu0  ;;  %v1700_v43 = vpop.f32.mrf.mxu1 }
 0x2b7   :  { %v1699_v32 = vadd.f32 %v1698_v24, %v1629_v47  ;;  %v2089_v24 = vpack.c.bf16 %v9069_v29, %v9068_v16  ;;  %v9070_v47 = vld [vmem:[#allocation61_spill] sm:$0xff]  ;;  %v9071_v14 = vld [vmem:[#allocation55_spill] sm:$0xff] }
 0x2b8   :  { %v2091_v43 = vpack.c.bf16 %v9071_v14, %v9070_v47  ;;  %v9090_v29 = vld [vmem:[#allocation17_spill] sm:$0xff] }
 0x2f4   :  { %v1768_v28 = vpop.f32.mrf.mxu0  ;;  %v1838_v21 = vpop.f32.mrf.mxu1 }
 0x2f5   :  { %v1769_v55 = vadd.f32 %v1768_v28, %v1699_v32  ;;  %v2013_v32 = vld [vmem:[%s8576_s5 + $0x10] sm:$0xff]  ;;  %v2014_v28 = vld [vmem:[%s8576_s5 + $0x18] sm:$0xff] }
 0x2f6   :  { %v1770_v44 = vpop.f32.mrf.mxu0  ;;  %v1840_v62 = vpop.f32.mrf.mxu1 }
 0x2f7   :  { %v1839_v53 = vadd.f32 %v1838_v21, %v1769_v55  ;;  %v9072_v21 = vld [vmem:[#allocation62_spill] sm:$0xff]  ;;  %v9074_v55 = vld [vmem:[#allocation65_spill] sm:$0xff] }
 0x2f8   :  { %v9073_v44 = vld [vmem:[#allocation58_spill] sm:$0xff] }
 0x2f9   :  { %v2074_v62 = vpack.c.bf16 %v9073_v44, %v9072_v21  ;;  %v9094_v44 = vld [vmem:[#allocation16_spill] sm:$0xff] }
 0x334   :  { %v1908_v27 = vpop.f32.mrf.mxu0  ;;  %v1978_v39 = vpop.f32.mrf.mxu1 }
 0x335   :  { %v1909_v25 = vadd.f32 %v1908_v27, %v1839_v53  ;;  %v9075_v53 = vld [vmem:[#allocation60_spill] sm:$0xff] }
 0x336   :  { %v1910_v52 = vpop.f32.mrf.mxu0  ;;  %v1980_v54 = vpop.f32.mrf.mxu1  ;;  %v2076_v27 = vpack.c.bf16 %v9075_v53, %v9074_v55  ;;  %v9096_v53 = vld [vmem:[#allocation84_spill] sm:$0xff] }
 0x337   :  { %v1979_v42 = vadd.f32 %v1978_v39, %v1909_v25  ;;  %v9076_v52 = vld [vmem:[#allocation68_spill] sm:$0xff]  ;;  %v9077_v54 = vld [vmem:[#allocation63_spill] sm:$0xff] }
 0x339   :  { %v1982_v30 = vmul.f32 0.00048828125, %v1979_v42  ;;  %v2073_v42 = vpack.c.bf16 %v9077_v54, %v9076_v52  ;;  %v9099_v52 = vld [vmem:[#allocation81_spill] sm:$0xff] }
 0x33b   :  { %v1983_v3 = vmul.f32 %v1982_v30, %v1982_v30 }
 0x33d   :  { %1985 = vrot.lane.b32.xlu0 %v1983_v3, %s4274_s1  ;;  %v9079_v3 = vld [vmem:[#allocation66_spill] sm:$0xff] }
 0x3af   :  { %v1986_v20 = vpop.permute.xlu0 %1985 }
 0x3b0   :  { %v1988_v61 = vsub.f32 %v1982_v30, %v1986_v20  ;;  %v9078_v30 = vld [vmem:[#allocation70_spill] sm:$0xff] }
 0x3b1   :  { %v2075_v20 = vpack.c.bf16 %v9079_v3, %v9078_v30  ;;  %v2017_v30 = vld [vmem:[%s8576_s5 + $0x30] sm:$0xff]  ;;  %v2018_v3 = vld [vmem:[%s8576_s5 + $0x38] sm:$0xff] }
 0x3b2   :  { %v1990_v58 = vadd.f32 0.001, %v1988_v61  ;;  %v9080_v61 = vld [vmem:[#allocation71_spill] sm:$0xff] }
 0x3b4   :  { %4268 = vrsqrt.f32 %v1990_v58  ;;  %v9081_v58 = vld [vmem:[#allocation67_spill] sm:$0xff] }
 0x3b5   :  { %v2058_v4 = vpack.c.bf16 %v9081_v58, %v9080_v61 }
 0x3c1   :  { %v4269_v37 = vpop.eup %4268 }
 0x3c2   :  { %v1999_v60 = vrot.slane %v4269_v37, %v1998_v33  ;;  %v9084_v37 = vld [vmem:[#allocation77_spill] sm:$0xff] }
 0x3c4   :  { %v2006_v48 = vrot.slane %v1999_v60, %v1998_v33  ;;  %v9085_v60 = vld [vmem:[#allocation73_spill] sm:$0xff] }
 0x3c6   :  { %2007 = vrot.lane.b32.xlu1 %v2006_v48, %s4274_s1  ;;  %v2057_v48 = vpack.c.bf16 %v9085_v60, %v9084_v37  ;;  %v9103_v37 = vld [vmem:[#allocation86_spill] sm:$0xff] }
 0x438   :  { %v2008_v19 = vpop.permute.xlu1 %2007 }
 0x439   :  { %v2010_v45 = vmul.f32 %v2008_v19, %v1989_v31  ;;  %v9086_v31 = vld [vmem:[#allocation78_spill] sm:$0xff] }
 0x43a   :  { %v9087_v19 = vld [vmem:[#allocation74_spill] sm:$0xff] }
 0x43b   :  { %v2023_v6 = vrot.slane %v2010_v45, %v9067_v51  ;;  %v2059_v45 = vpack.c.bf16 %v9087_v19, %v9086_v31  ;;  %v9106_v19 = vld [vmem:[#allocation96_spill] sm:$0xff] }
 0x43d   :  { %v2025_v17 = vmul.f32 %v2023_v6, %v2011_v59  ;;  %v2026_v0 = vmul.f32 %v2023_v6, %v2012_v34  ;;  %v2027_v39 = vmul.f32 %v2023_v6, %v2013_v32  ;;  %v2028_v25 = vmul.f32 %v2023_v6, %v2014_v28  ;;  %v2015_v59 = vld [vmem:[%s8576_s5 + $0x20] sm:$0xff]  ;;  %v2016_v34 = vld [vmem:[%s8576_s5 + $0x28] sm:$0xff]  ;;  %v9093_v28 = vld [vmem:[#allocation21_spill] sm:$0xff] }
 0x43e   :  { %v2029_v14 = vmul.f32 %v2023_v6, %v2015_v59  ;;  %v9092_v32 = vld [vmem:[#allocation15_spill] sm:$0xff]  ;;  %v2032_v61 = vmul.f32 %v2023_v6, %v2018_v3 }
 0x43f   :  { %v6287_v46 = vpack.c.bf16 %v2026_v0, %v2025_v17  ;;  %v6317_v33 = vpack.c.bf16 %v2028_v25, %v2027_v39  ;;  %v9088_v17 = vld [vmem:[#allocation79_spill] sm:$0xff]  ;;  %v2041_v21 = vpack.c.bf16 %v9093_v28, %v9092_v32  ;;  %v9115_v28 = vld [vmem:[#allocation100_spill] sm:$0xff] }
 0x440   :  { %v9089_v0 = vld [vmem:[#allocation75_spill] sm:$0xff] }
 0x441   :  { %4210 = vmatmul.mubr.msk.bf16.vlgmr.msra.gmra.mxu0 %vm529_vm0, %v6287_v46  ;;  %4214 = vmatmul.mubr.msk.bf16.vlgmr.msra.gmra.mxu1 %vm529_vm0, %v6287_v46  ;;  %v2042_v16 = vpack.c.bf16 %v9089_v0, %v9088_v17  ;;  %v9098_v25 = vld [vmem:[#allocation87_spill] sm:$0xff]  ;;  %v9109_v17 = vld [vmem:[#allocation93_spill] sm:$0xff] }
 0x442   :  { %2352 = vmatpush1.bf16.msra.mxu0 %v2089_v24  ;;  %2425 = vmatpush1.bf16.msra.mxu1 %v2091_v43  ;;  %v9091_v24 = vld [vmem:[#allocation76_spill] sm:$0xff]  ;;  %v2030_v43 = vmul.f32 %v2023_v6, %v2016_v34  ;;  %v2096_v54 = vpack.c.bf16 %v9099_v52, %v9098_v25  ;;  %v9108_v34 = vld [vmem:[#allocation99_spill] sm:$0xff]  ;;  %v9120_v25 = vld [vmem:[#allocation110_spill] sm:$0xff] }
 0x443   :  { %2353 = vmatprep.subr.bf16.mxu0 %v2074_v62  ;;  %2426 = vmatprep.subr.bf16.mxu1 %v2076_v27  ;;  %v2044_v47 = vpack.c.bf16 %v9091_v24, %v9090_v29  ;;  %v9095_v62 = vld [vmem:[#allocation26_spill] sm:$0xff]  ;;  %v9097_v27 = vld [vmem:[#allocation80_spill] sm:$0xff]  ;;  %v2077_v0 = vpack.c.bf16 %v9109_v17, %v9108_v34  ;;  %v9111_v29 = vld [vmem:[#allocation97_spill] sm:$0xff] }
 0x444   :  { %2239 = vmatprep.mubr.bf16.mxu0 %v9045_v56  ;;  %2312 = vmatprep.mubr.bf16.mxu1 %v9045_v56  ;;  %v2043_v55 = vpack.c.bf16 %v9095_v62, %v9094_v44  ;;  %v2094_v39 = vpack.c.bf16 %v9097_v27, %v9096_v53  ;;  %v9114_v32 = vld [vmem:[#allocation103_spill] sm:$0xff]  ;;  %v9116_v44 = vld [vmem:[#allocation108_spill] sm:$0xff]  ;;  %v9118_v53 = vld [vmem:[#allocation109_spill] sm:$0xff] }
 0x445   :  { %v9117_v62 = vld [vmem:[#allocation104_spill] sm:$0xff]  ;;  %v9119_v27 = vld [vmem:[#allocation105_spill] sm:$0xff]  ;;  %v9121_v52 = vld [vmem:[#allocation106_spill] sm:$0xff] }
 0x446   :  { %2354 = vmatpush1.bf16.msra.mxu0 %v2073_v42  ;;  %2427 = vmatpush1.bf16.msra.mxu1 %v2075_v20  ;;  %v6347_v42 = vpack.c.bf16 %v2030_v43, %v2029_v14  ;;  %v2031_v20 = vmul.f32 %v2023_v6, %v2017_v30  ;;  %v9105_v6 = vld [vmem:[#allocation88_spill] sm:$0xff]  ;;  %v9113_v14 = vld [vmem:[#allocation98_spill] sm:$0xff]  ;;  %v9122_v30 = vld [vmem:[#allocation111_spill] sm:$0xff] }
 0x447   :  { %2355 = vmatprep.subr.bf16.mxu0 %v2058_v4  ;;  %2428 = vmatprep.subr.bf16.mxu1 %v2060_v1  ;;  %v9100_v4 = vld [vmem:[#allocation89_spill] sm:$0xff]  ;;  %v9102_v1 = vld [vmem:[#allocation90_spill] sm:$0xff]  ;;  %v9123_v3 = vld [vmem:[#allocation107_spill] sm:$0xff] }
 0x448   :  { %v6361_v58 = vpack.c.bf16 %v2032_v61, %v2031_v20  ;;  %v2093_v35 = vpack.c.bf16 %v9101_v18, %v9100_v4  ;;  %v2095_v60 = vpack.c.bf16 %v9103_v37, %v9102_v1  ;;  %v2048_v20 = vpack.c.bf16 %v9123_v3, %v9122_v30  ;;  %v9124_v61 = vld [vmem:[#allocation52_spill] sm:$0xff] }
 0x449   :  { %4211 = vmatmul.mubr.msk.bf16.gmra.mxu0 %vm529_vm0, %v6317_v33  ;;  %4215 = vmatmul.mubr.msk.bf16.gmra.mxu1 %vm529_vm0, %v6317_v33  ;;  %v9125_v4 = vld [vmem:[#allocation112_spill] sm:$0xff] }
 0x44a   :  { %2356 = vmatpush1.bf16.msra.mxu0 %v2057_v48  ;;  %2429 = vmatpush1.bf16.msra.mxu1 %v2059_v45  ;;  %v9104_v48 = vld [vmem:[#allocation92_spill] sm:$0xff]  ;;  %v9107_v45 = vld [vmem:[#allocation91_spill] sm:$0xff]  ;;  %v2045_v18 = vpack.c.bf16 %v9125_v4, %v9124_v61 }
 0x44b   :  { %2357 = vmatprep.subr.bf16.mxu0 %v2042_v16  ;;  %2430 = vmatprep.subr.bf16.mxu1 %v2044_v47  ;;  %v2078_v31 = vpack.c.bf16 %v9105_v6, %v9104_v48  ;;  %v2080_v59 = vpack.c.bf16 %v9107_v45, %v9106_v19  ;;  %v9110_v16 = vld [vmem:[#allocation101_spill] sm:$0xff]  ;;  %v9112_v47 = vld [vmem:[#allocation102_spill] sm:$0xff]  ;;  %v9127_v1 = vld [vmem:[#allocation64_spill] sm:$0xff]  ;;  %v2100_v48 = vpack.c.bf16 %v5924_v49, %v5948_v41 }
 0x44c   :  { %2249 = vmatprep.mubr.bf16.mxu0 %v9045_v56  ;;  %2322 = vmatprep.mubr.bf16.mxu1 %v9045_v56  ;;  %v2079_v24 = vpack.c.bf16 %v9111_v29, %v9110_v16  ;;  %v2062_v43 = vpack.c.bf16 %v9113_v14, %v9112_v47  ;;  %v2099_v49 = vpack.c.bf16 %v5942_v10, %v5972_v12  ;;  %v9130_v12 = vld [vmem:[#allocation114_spill] sm:$0xff]  ;;  %v9132_v6 = vld [vmem:[#allocation116_spill] sm:$0xff] }
 0x44d   :  { %v2084_v41 = vpack.c.bf16 %v5969_v38, %v6006_v22  ;;  %v2083_v10 = vpack.c.bf16 %v6010_v9, %v6052_v13  ;;  %v9129_v38 = vld [vmem:[#allocation115_spill] sm:$0xff]  ;;  %v9131_v22 = vld [vmem:[#allocation120_spill] sm:$0xff]  ;;  %v9135_v13 = vld [vmem:[#allocation118_spill] sm:$0xff] }
 0x44e   :  { %2358 = vmatpush1.bf16.msra.mxu0 %v2041_v21  ;;  %2431 = vmatpush1.bf16.msra.mxu1 %v2043_v55  ;;  %v2064_v21 = vpack.c.bf16 %v9115_v28, %v9114_v32  ;;  %v2061_v55 = vpack.c.bf16 %v9117_v62, %v9116_v44  ;;  %v2050_v19 = vpack.c.bf16 %v9135_v13, %v6162_v26  ;;  %v9136_v45 = vld [vmem:[#allocation122_spill] sm:$0xff] }
 0x44f   :  { %2497 = vmatprep.subr.bf16.mxu0 %v2094_v39  ;;  %2570 = vmatprep.subr.bf16.mxu1 %v2096_v54  ;;  %v2063_v39 = vpack.c.bf16 %v9119_v27, %v9118_v53  ;;  %v2046_v54 = vpack.c.bf16 %v9121_v52, %v9120_v25 }
 0x451   :  { %4212 = vmatmul.mubr.msk.bf16.gmra.mxu0 %vm529_vm0, %v6347_v42  ;;  %4216 = vmatmul.mubr.msk.bf16.gmra.mxu1 %vm529_vm0, %v6347_v42 }
 0x452   :  { %2259 = vmatprep.mubr.bf16.mxu0 %v9045_v56  ;;  %2332 = vmatprep.mubr.bf16.mxu1 %v9045_v56 }
 0x459   :  { %4213 = vmatmul.mubr.msk.bf16.gmra.mxu0 %vm529_vm0, %v6361_v58  ;;  %4217 = vmatmul.mubr.msk.bf16.gmra.mxu1 %vm529_vm0, %v6361_v58 }
 0x45a   :  { %2375 = vmatprep.mubr.bf16.mxu0 %v9045_v56  ;;  %2448 = vmatprep.mubr.bf16.mxu1 %v9045_v56 }
 0x461   :  { %4218 = vmatmul.mubr.msk.bf16.vlgmr.msra.gmra.mxu0 %vm529_vm0, %v6287_v46  ;;  %4222 = vmatmul.mubr.msk.bf16.vlgmr.msra.gmra.mxu1 %vm529_vm0, %v6287_v46 }
 0x462   :  { %2498 = vmatpush1.bf16.msra.mxu0 %v2093_v35  ;;  %2571 = vmatpush1.bf16.msra.mxu1 %v2095_v60  ;;  %v9126_v35 = vld [vmem:[#allocation53_spill] sm:$0xff]  ;;  %v2098_v60 = vpack.c.bf16 %v5921_v50, %v5945_v2  ;;  %v2097_v50 = vpack.c.bf16 %v5939_v15, %v5964_v11  ;;  %v2082_v2 = vpack.c.bf16 %v5961_v57, %v5996_v8 }
 0x463   :  { %2499 = vmatprep.subr.bf16.mxu0 %v2078_v31  ;;  %2572 = vmatprep.subr.bf16.mxu1 %v2080_v59  ;;  %v2047_v37 = vpack.c.bf16 %v9127_v1, %v9126_v35  ;;  %v2081_v15 = vpack.c.bf16 %v6000_v7, %v6044_v23  ;;  %v9128_v57 = vld [vmem:[#allocation113_spill] sm:$0xff]  ;;  %v2068_v8 = vpack.c.bf16 %v9130_v12, %v9129_v38  ;;  %v9137_v59 = vld [vmem:[#allocation119_spill] sm:$0xff] }
 0x464   :  { %2385 = vmatprep.mubr.bf16.mxu0 %v9045_v56  ;;  %2458 = vmatprep.mubr.bf16.mxu1 %v9045_v56  ;;  %v2066_v11 = vpack.c.bf16 %v9128_v57, %v6082_v5  ;;  %v2065_v7 = vpack.c.bf16 %v9132_v6, %v9131_v22  ;;  %v9133_v23 = vld [vmem:[#allocation121_spill] sm:$0xff]  ;;  %v2052_v34 = vpack.c.bf16 %v9137_v59, %v9136_v45  ;;  %v9138_v5 = vld [vmem:[#allocation94_spill] sm:$0xff] }
 0x465   :  { %v9134_v31 = vld [vmem:[#allocation117_spill] sm:$0xff]  ;;  %v2049_v17 = vpack.c.bf16 %v9138_v5, %v6194_v63 }
 0x466   :  { %2500 = vmatpush1.bf16.msra.mxu0 %v2077_v0  ;;  %2573 = vmatpush1.bf16.msra.mxu1 %v2079_v24  ;;  %v2067_v9 = vpack.c.bf16 %v9134_v31, %v9133_v23  ;;  %v9139_v0 = vld [vmem:[#allocation95_spill] sm:$0xff] }
 0x467   :  { %2501 = vmatprep.subr.bf16.mxu0 %v2062_v43  ;;  %2574 = vmatprep.subr.bf16.mxu1 %v2064_v21  ;;  %v2051_v16 = vpack.c.bf16 %v9139_v0, %v6198_v40 }
 0x469   :  { %4219 = vmatmul.mubr.msk.bf16.gmra.mxu0 %vm529_vm0, %v6317_v33  ;;  %4223 = vmatmul.mubr.msk.bf16.gmra.mxu1 %vm529_vm0, %v6317_v33 }
 0x46a   :  { %2502 = vmatpush1.bf16.msra.mxu0 %v2061_v55  ;;  %2575 = vmatpush1.bf16.msra.mxu1 %v2063_v39  ;;  %v6534_v39 = vld [vmem:[%s8577_s2] sm:$0xff] }
 0x46b   :  { %2503 = vmatprep.subr.bf16.mxu0 %v2046_v54  ;;  %2576 = vmatprep.subr.bf16.mxu1 %v2048_v20  ;;  %9140 = vst [vmem:[#allocation38_spill] sm:$0xff] %v6534_v39  ;;  %v2108_v3 = vrot.slane %v6534_v39, %v9067_v51 }
 0x46c   :  { %2395 = vmatprep.mubr.bf16.mxu0 %v9045_v56  ;;  %2468 = vmatprep.mubr.bf16.mxu1 %v9045_v56 }
 0x46e   :  { %2504 = vmatpush1.bf16.msra.mxu0 %v2045_v18  ;;  %2577 = vmatpush1.bf16.msra.mxu1 %v2047_v37 }
 0x46f   :  { %2643 = vmatprep.subr.bf16.mxu0 %v2098_v60  ;;  %2716 = vmatprep.subr.bf16.mxu1 %v2100_v48 }
 0x471   :  { %4220 = vmatmul.mubr.msk.bf16.gmra.mxu0 %vm529_vm0, %v6347_v42  ;;  %4224 = vmatmul.mubr.msk.bf16.gmra.mxu1 %vm529_vm0, %v6347_v42 }
 0x472   :  { %2405 = vmatprep.mubr.bf16.mxu0 %v9045_v56  ;;  %2478 = vmatprep.mubr.bf16.mxu1 %v9045_v56 }
 0x479   :  { %4221 = vmatmul.mubr.msk.bf16.gmra.mxu0 %vm529_vm0, %v6361_v58  ;;  %4225 = vmatmul.mubr.msk.bf16.gmra.mxu1 %vm529_vm0, %v6361_v58 }
 0x47a   :  { %2521 = vmatprep.mubr.bf16.mxu0 %v9045_v56  ;;  %2594 = vmatprep.mubr.bf16.mxu1 %v9045_v56 }
 0x481   :  { %4226 = vmatmul.mubr.msk.bf16.vlgmr.msra.gmra.mxu0 %vm529_vm0, %v6287_v46  ;;  %4230 = vmatmul.mubr.msk.bf16.vlgmr.msra.gmra.mxu1 %vm529_vm0, %v6287_v46 }
 0x482   :  { %2644 = vmatpush1.bf16.msra.mxu0 %v2097_v50  ;;  %2717 = vmatpush1.bf16.msra.mxu1 %v2099_v49 }
 0x483   :  { %2645 = vmatprep.subr.bf16.mxu0 %v2082_v2  ;;  %2718 = vmatprep.subr.bf16.mxu1 %v2084_v41 }
 0x484   :  { %2531 = vmatprep.mubr.bf16.mxu0 %v9045_v56  ;;  %2604 = vmatprep.mubr.bf16.mxu1 %v9045_v56 }
 0x486   :  { %2646 = vmatpush1.bf16.msra.mxu0 %v2081_v15  ;;  %2719 = vmatpush1.bf16.msra.mxu1 %v2083_v10 }
 0x487   :  { %2647 = vmatprep.subr.bf16.mxu0 %v2066_v11  ;;  %2720 = vmatprep.subr.bf16.mxu1 %v2068_v8 }
 0x489   :  { %4227 = vmatmul.mubr.msk.bf16.gmra.mxu0 %vm529_vm0, %v6317_v33  ;;  %4231 = vmatmul.mubr.msk.bf16.gmra.mxu1 %vm529_vm0, %v6317_v33 }
 0x48a   :  { %2648 = vmatpush1.bf16.msra.mxu0 %v2065_v7  ;;  %2721 = vmatpush1.bf16.msra.mxu1 %v2067_v9 }
 0x48b   :  { %2649 = vmatprep.subr.bf16.mxu0 %v2050_v19  ;;  %2722 = vmatprep.subr.bf16.mxu1 %v2052_v34 }
 0x48c   :  { %2541 = vmatprep.mubr.bf16.mxu0 %v9045_v56  ;;  %2614 = vmatprep.mubr.bf16.mxu1 %v9045_v56 }
 0x48e   :  { %2650 = vmatpush1.bf16.msra.mxu0 %v2049_v17  ;;  %2723 = vmatpush1.bf16.msra.mxu1 %v2051_v16 }
 0x491   :  { %4228 = vmatmul.mubr.msk.bf16.gmra.mxu0 %vm529_vm0, %v6347_v42  ;;  %4232 = vmatmul.mubr.msk.bf16.gmra.mxu1 %vm529_vm0, %v6347_v42 }
 0x492   :  { %2551 = vmatprep.mubr.bf16.mxu0 %v9045_v56  ;;  %2624 = vmatprep.mubr.bf16.mxu1 %v9045_v56 }
 0x499   :  { %4229 = vmatmul.mubr.msk.bf16.gmra.mxu0 %vm529_vm0, %v6361_v58  ;;  %4233 = vmatmul.mubr.msk.bf16.gmra.mxu1 %vm529_vm0, %v6361_v58 }
 0x49a   :  { %2667 = vmatprep.mubr.bf16.mxu0 %v9045_v56  ;;  %2740 = vmatprep.mubr.bf16.mxu1 %v9045_v56 }
 0x4a1   :  { %4234 = vmatmul.mubr.msk.bf16.vlgmr.msra.gmra.mxu0 %vm529_vm0, %v6287_v46  ;;  %4238 = vmatmul.mubr.msk.bf16.vlgmr.msra.gmra.mxu1 %vm529_vm0, %v6287_v46 }
 0x4a2   :  { %2677 = vmatprep.mubr.bf16.mxu0 %v9045_v56  ;;  %2750 = vmatprep.mubr.bf16.mxu1 %v9045_v56 }
 0x4a9   :  { %4235 = vmatmul.mubr.msk.bf16.gmra.mxu0 %vm529_vm0, %v6317_v33  ;;  %4239 = vmatmul.mubr.msk.bf16.gmra.mxu1 %vm529_vm0, %v6317_v33 }
 0x4aa   :  { %2687 = vmatprep.mubr.bf16.mxu0 %v9045_v56  ;;  %2760 = vmatprep.mubr.bf16.mxu1 %v9045_v56 }
 0x4b1   :  { %4236 = vmatmul.mubr.msk.bf16.gmra.mxu0 %vm529_vm0, %v6347_v42  ;;  %4240 = vmatmul.mubr.msk.bf16.gmra.mxu1 %vm529_vm0, %v6347_v42 }
 0x4b2   :  { %2697 = vmatprep.mubr.bf16.mxu0 %v9045_v56  ;;  %2770 = vmatprep.mubr.bf16.mxu1 %v9045_v56 }
 0x4b9   :  { %4237 = vmatmul.mubr.msk.bf16.gmra.mxu0 %vm529_vm0, %v6361_v58  ;;  %4241 = vmatmul.mubr.msk.bf16.gmra.mxu1 %vm529_vm0, %v6361_v58 }
 0x4ba   :  { %3141 = vmatprep.mubr.f32.mxu0 %v8937_v36  ;;  %3212 = vmatprep.mubr.f32.mxu1 %v8937_v36 }
 0x501   :  { %v2231_v26 = vpop.f32.mrf.mxu0  ;;  %v6501_v40 = vpop.f32.mrf.mxu1 }
 0x502   :  { %v6583_v8 = vadd.f32 %v2231_v26, %v2108_v3 }
 0x503   :  { %v6503_v63 = vpop.f32.mrf.mxu0  ;;  %v6505_v46 = vpop.f32.mrf.mxu1 }
 0x504   :  { %9152 = vst [vmem:[#allocation28_spill] sm:$0xff] %v6583_v8 }
 0x505   :  { %v2235_v33 = vpop.f32.mrf.mxu0  ;;  %v6507_v42 = vpop.f32.mrf.mxu1 }
 0x506   :  { %v6597_v9 = vadd.f32 %v2235_v33, %v2108_v3 }
 0x507   :  { %v6509_v29 = vpop.f32.mrf.mxu0  ;;  %v6511_v24 = vpop.f32.mrf.mxu1 }
 0x508   :  { %9158 = vst [vmem:[#allocation31_spill] sm:$0xff] %v6597_v9 }
 0x509   :  { %v2241_v47 = vpop.f32.mrf.mxu0  ;;  %v6513_v58 = vpop.f32.mrf.mxu1 }
 0x50a   :  { %v6569_v15 = vadd.f32 %v2241_v47, %v2108_v3 }
 0x50b   :  { %v6515_v14 = vpop.f32.mrf.mxu0  ;;  %v6517_v43 = vpop.f32.mrf.mxu1 }
 0x50c   :  { %9146 = vst [vmem:[#allocation25_spill] sm:$0xff] %v6569_v15 }
 0x50d   :  { %v2245_v32 = vpop.f32.mrf.mxu0  ;;  %v6519_v28 = vpop.f32.mrf.mxu1 }
 0x50e   :  { %v6585_v22 = vadd.f32 %v2245_v32, %v2108_v3 }
 0x50f   :  { %v6521_v21 = vpop.f32.mrf.mxu0  ;;  %v6523_v44 = vpop.f32.mrf.mxu1 }
 0x510   :  { %9153 = vst [vmem:[#allocation22_spill] sm:$0xff] %v6585_v22 }
 0x511   :  { %v2251_v62 = vpop.f32.mrf.mxu0  ;;  %v6525_v55 = vpop.f32.mrf.mxu1 }
 0x512   :  { %v6555_v60 = vadd.f32 %v2251_v62, %v2108_v3 }
 0x513   :  { %v6527_v53 = vpop.f32.mrf.mxu0  ;;  %v6529_v27 = vpop.f32.mrf.mxu1 }
 0x514   :  { %9142 = vst [vmem:[#allocation83_spill] sm:$0xff] %v6555_v60 }
 0x515   :  { %v2255_v25 = vpop.f32.mrf.mxu0  ;;  %v6536_v52 = vpop.f32.mrf.mxu1 }
 0x516   :  { %v6571_v10 = vadd.f32 %v2255_v25, %v2108_v3 }
 0x517   :  { %v6538_v54 = vpop.f32.mrf.mxu0  ;;  %v6540_v30 = vpop.f32.mrf.mxu1 }
 0x518   :  { %9147 = vst [vmem:[#allocation20_spill] sm:$0xff] %v6571_v10 }
 0x519   :  { %v2261_v20 = vpop.f32.mrf.mxu0  ;;  %v6544_v61 = vpop.f32.mrf.mxu1 }
 0x51a   :  { %v6546_v4 = vadd.f32 %v2261_v20, %v2108_v3 }
 0x51b   :  { %v6548_v18 = vpop.f32.mrf.mxu0  ;;  %v6550_v35 = vpop.f32.mrf.mxu1 }
 0x51c   :  { %9141 = vst [vmem:[#allocation82_spill] sm:$0xff] %v6546_v4  ;;  %2813 = vperm.xlu1 %4263, %v6546_v4  }
 0x51d   :  { %v2265_v1 = vpop.f32.mrf.mxu0  ;;  %v6553_v37 = vpop.f32.mrf.mxu1 }
 0x51e   :  { %v6557_v48 = vadd.f32 %v2265_v1, %v2108_v3 }
 0x51f   :  { %v6559_v50 = vpop.f32.mrf.mxu0  ;;  %v6561_v49 = vpop.f32.mrf.mxu1 }
 0x520   :  { %9143 = vst [vmem:[#allocation42_spill] sm:$0xff] %v6557_v48  ;;  %2818 = vperm.xlu0 %4262, %v6557_v48   ;;  %2803 = vperm.xlu1 %4263, %v6555_v60  }
 0x521   :  { %v6565_v2 = vpop.f32.mrf.mxu0  ;;  %v6567_v41 = vpop.f32.mrf.mxu1 }
 0x522   :  { %9144 = vst [vmem:[#allocation23_spill] sm:$0xff] %v6565_v2  ;;  %9145 = vst [vmem:[#allocation18_spill] sm:$0xff] %v6567_v41 }
 0x523   :  { %v6573_v57 = vpop.f32.mrf.mxu0  ;;  %v6575_v11 = vpop.f32.mrf.mxu1 }
 0x524   :  { %9148 = vst [vmem:[#allocation9_spill] sm:$0xff] %v6573_v57  ;;  %9149 = vst [vmem:[#allocation7_spill] sm:$0xff] %v6575_v11  ;;  %2808 = vperm.xlu0 %4262, %v6571_v10   ;;  %2793 = vperm.xlu1 %4263, %v6569_v15  }
 0x525   :  { %v6579_v38 = vpop.f32.mrf.mxu0  ;;  %v6581_v12 = vpop.f32.mrf.mxu1 }
 0x526   :  { %9150 = vst [vmem:[#allocation27_spill] sm:$0xff] %v6579_v38  ;;  %9151 = vst [vmem:[#allocation19_spill] sm:$0xff] %v6581_v12 }
 0x527   :  { %v6587_v6 = vpop.f32.mrf.mxu0  ;;  %v6589_v7 = vpop.f32.mrf.mxu1 }
 0x528   :  { %9154 = vst [vmem:[#allocation30_spill] sm:$0xff] %v6587_v6  ;;  %9155 = vst [vmem:[#allocation24_spill] sm:$0xff] %v6589_v7  ;;  %2798 = vperm.xlu0 %4262, %v6585_v22   ;;  %2783 = vperm.xlu1 %4263, %v6583_v8  }
 0x529   :  { %v6593_v23 = vpop.f32.mrf.mxu0  ;;  %v6595_v31 = vpop.f32.mrf.mxu1 }
 0x52a   :  { %9156 = vst [vmem:[#allocation5_spill] sm:$0xff] %v6593_v23  ;;  %9157 = vst [vmem:[#allocation4_spill] sm:$0xff] %v6595_v31 }
 0x52b   :  { %v6599_v13 = vpop.f32.mrf.mxu0  ;;  %v6601_v19 = vpop.f32.mrf.mxu1 }
 0x52c   :  { %9159 = vst [vmem:[#allocation29_spill] sm:$0xff] %v6599_v13  ;;  %9160 = vst [vmem:[#allocation35_spill] sm:$0xff] %v6601_v19  ;;  %2788 = vperm.xlu0 %4262, %v6597_v9  }
 0x52d   :  { %v6604_v45 = vpop.f32.mrf.mxu0  ;;  %v6606_v59 = vpop.f32.mrf.mxu1 }
 0x52e   :  { %9161 = vst [vmem:[#allocation32_spill] sm:$0xff] %v6604_v45  ;;  %9162 = vst [vmem:[#allocation36_spill] sm:$0xff] %v6606_v59 }
 0x52f   :  { %v6608_v34 = vpop.f32.mrf.mxu0  ;;  %v6610_v5 = vpop.f32.mrf.mxu1 }
 0x530   :  { %9163 = vst [vmem:[#allocation33_spill] sm:$0xff] %v6608_v34  ;;  %9164 = vst [vmem:[#allocation6_spill] sm:$0xff] %v6610_v5 }
 0x531   :  { %v6612_v17 = vpop.f32.mrf.mxu0  ;;  %v6614_v0 = vpop.f32.mrf.mxu1 }
 0x532   :  { %9165 = vst [vmem:[#allocation10_spill] sm:$0xff] %v6612_v17  ;;  %9166 = vst [vmem:[#allocation37_spill] sm:$0xff] %v6614_v0 }
 0x533   :  { %v6616_v16 = vpop.f32.mrf.mxu0  ;;  %v6618_v26 = vpop.f32.mrf.mxu1 }
 0x534   :  { %9167 = vst [vmem:[#allocation34_spill] sm:$0xff] %v6616_v16  ;;  %9168 = vst [vmem:[#allocation43_spill] sm:$0xff] %v6618_v26 }
 0x535   :  { %v6620_v33 = vpop.f32.mrf.mxu0  ;;  %v6622_v47 = vpop.f32.mrf.mxu1 }
 0x536   :  { %9169 = vst [vmem:[#allocation39_spill] sm:$0xff] %v6620_v33  ;;  %9170 = vst [vmem:[#allocation44_spill] sm:$0xff] %v6622_v47 }
 0x537   :  { %v6624_v32 = vpop.f32.mrf.mxu0  ;;  %v6626_v62 = vpop.f32.mrf.mxu1 }
 0x538   :  { %9171 = vst [vmem:[#allocation40_spill] sm:$0xff] %v6624_v32  ;;  %9172 = vst [vmem:[#allocation8_spill] sm:$0xff] %v6626_v62 }
 0x539   :  { %v6628_v25 = vpop.f32.mrf.mxu0  ;;  %v6630_v3 = vpop.f32.mrf.mxu1 }
 0x53a   :  { %9173 = vst [vmem:[#allocation11_spill] sm:$0xff] %v6628_v25  ;;  %9174 = vst [vmem:[#allocation45_spill] sm:$0xff] %v6630_v3 }
 0x53b   :  { %v6632_v20 = vpop.f32.mrf.mxu0  ;;  %v6634_v1 = vpop.f32.mrf.mxu1 }
 0x53c   :  { %9175 = vst [vmem:[#allocation41_spill] sm:$0xff] %v6632_v20  ;;  %9176 = vst [vmem:[#allocation56_spill] sm:$0xff] %v6634_v1 }
 0x53d   :  { %v6636_v56 = vpop.f32.mrf.mxu0  ;;  %v6638_v51 = vpop.f32.mrf.mxu1 }
 0x53e   :  { %9177 = vst [vmem:[#allocation50_spill] sm:$0xff] %v6636_v56  ;;  %9178 = vst [vmem:[#allocation57_spill] sm:$0xff] %v6638_v51 }
 0x53f   :  { %v6640_v41 = vpop.f32.mrf.mxu0  ;;  %v6642_v2 = vpop.f32.mrf.mxu1 }
 0x540   :  { %9179 = vst [vmem:[#allocation51_spill] sm:$0xff] %v6640_v41  ;;  %9180 = vst [vmem:[#allocation2_spill] sm:$0xff] %v6642_v2 }
 0x541   :  { %v6644_v11 = vpop.f32.mrf.mxu0  ;;  %v6646_v57 = vpop.f32.mrf.mxu1 }
 0x542   :  { %9181 = vst [vmem:[#allocation59_spill] sm:$0xff] %v6644_v11  ;;  %9182 = vst [vmem:[#allocation54_spill] sm:$0xff] %v6646_v57 }
 0x543   :  { %v6648_v12 = vpop.f32.mrf.mxu0  ;;  %v6650_v38 = vpop.f32.mrf.mxu1 }
 0x544   :  { %9183 = vst [vmem:[#allocation61_spill] sm:$0xff] %v6648_v12  ;;  %9184 = vst [vmem:[#allocation55_spill] sm:$0xff] %v6650_v38 }
 0x545   :  { %v6652_v7 = vpop.f32.mrf.mxu0  ;;  %v6654_v6 = vpop.f32.mrf.mxu1 }
 0x546   :  { %9185 = vst [vmem:[#allocation62_spill] sm:$0xff] %v6652_v7  ;;  %9186 = vst [vmem:[#allocation58_spill] sm:$0xff] %v6654_v6 }
 0x547   :  { %v6656_v31 = vpop.f32.mrf.mxu0  ;;  %v6658_v23 = vpop.f32.mrf.mxu1 }
 0x548   :  { %9187 = vst [vmem:[#allocation65_spill] sm:$0xff] %v6656_v31  ;;  %9188 = vst [vmem:[#allocation60_spill] sm:$0xff] %v6658_v23 }
 0x549   :  { %v6660_v19 = vpop.f32.mrf.mxu0  ;;  %v6662_v13 = vpop.f32.mrf.mxu1 }
 0x54a   :  { %9189 = vst [vmem:[#allocation68_spill] sm:$0xff] %v6660_v19  ;;  %9190 = vst [vmem:[#allocation63_spill] sm:$0xff] %v6662_v13 }
 0x54b   :  { %v6664_v59 = vpop.f32.mrf.mxu0  ;;  %v6666_v11 = vpop.f32.mrf.mxu1 }
 0x54c   :  { %9191 = vst [vmem:[#allocation70_spill] sm:$0xff] %v6664_v59  ;;  %9192 = vst [vmem:[#allocation66_spill] sm:$0xff] %v6666_v11 }
 0x54d   :  { %v6668_v57 = vpop.f32.mrf.mxu0  ;;  %v6670_v12 = vpop.f32.mrf.mxu1 }
 0x54e   :  { %9193 = vst [vmem:[#allocation71_spill] sm:$0xff] %v6668_v57  ;;  %9194 = vst [vmem:[#allocation67_spill] sm:$0xff] %v6670_v12 }
 0x54f   :  { %v6672_v38 = vpop.f32.mrf.mxu0  ;;  %v6674_v7 = vpop.f32.mrf.mxu1 }
 0x550   :  { %9195 = vst [vmem:[#allocation72_spill] sm:$0xff] %v6672_v38  ;;  %9196 = vst [vmem:[#allocation69_spill] sm:$0xff] %v6674_v7 }
 0x551   :  { %v6676_v6 = vpop.f32.mrf.mxu0  ;;  %v6678_v31 = vpop.f32.mrf.mxu1 }
 0x552   :  { %9197 = vst [vmem:[#allocation77_spill] sm:$0xff] %v6676_v6  ;;  %9198 = vst [vmem:[#allocation73_spill] sm:$0xff] %v6678_v31 }
 0x553   :  { %v6680_v23 = vpop.f32.mrf.mxu0  ;;  %v6682_v19 = vpop.f32.mrf.mxu1 }
 0x554   :  { %9199 = vst [vmem:[#allocation78_spill] sm:$0xff] %v6680_v23  ;;  %9200 = vst [vmem:[#allocation74_spill] sm:$0xff] %v6682_v19 }
 0x555   :  { %v6684_v13 = vpop.f32.mrf.mxu0  ;;  %v6686_v59 = vpop.f32.mrf.mxu1 }
 0x556   :  { %9201 = vst [vmem:[#allocation79_spill] sm:$0xff] %v6684_v13  ;;  %9202 = vst [vmem:[#allocation75_spill] sm:$0xff] %v6686_v59 }
 0x557   :  { %v6688_v11 = vpop.f32.mrf.mxu0  ;;  %v6690_v57 = vpop.f32.mrf.mxu1 }
 0x558   :  { %9203 = vst [vmem:[#allocation17_spill] sm:$0xff] %v6688_v11  ;;  %9204 = vst [vmem:[#allocation76_spill] sm:$0xff] %v6690_v57 }
 0x559   :  { %v6692_v12 = vpop.f32.mrf.mxu0  ;;  %v6694_v38 = vpop.f32.mrf.mxu1 }
 0x55a   :  { %9205 = vst [vmem:[#allocation15_spill] sm:$0xff] %v6692_v12  ;;  %9206 = vst [vmem:[#allocation21_spill] sm:$0xff] %v6694_v38 }
 0x55b   :  { %v6696_v7 = vpop.f32.mrf.mxu0  ;;  %v6698_v6 = vpop.f32.mrf.mxu1 }
 0x55c   :  { %9207 = vst [vmem:[#allocation16_spill] sm:$0xff] %v6696_v7  ;;  %9208 = vst [vmem:[#allocation26_spill] sm:$0xff] %v6698_v6  ;;  %v9219_v6 = vld [vmem:[#allocation13_spill] sm:$0xff] }
 0x55d   :  { %v6700_v31 = vpop.f32.mrf.mxu0  ;;  %v6702_v23 = vpop.f32.mrf.mxu1 }
 0x55e   :  { %9209 = vst [vmem:[#allocation84_spill] sm:$0xff] %v6700_v31  ;;  %9210 = vst [vmem:[#allocation80_spill] sm:$0xff] %v6702_v23  ;;  %v6722_v31 = vrot.slane %v6534_v39, %v9219_v6  ;;  %v9220_v23 = vld [vmem:[#allocation12_spill] sm:$0xff] }
 0x55f   :  { %v6704_v19 = vpop.f32.mrf.mxu0  ;;  %v6706_v13 = vpop.f32.mrf.mxu1 }
 0x560   :  { %9211 = vst [vmem:[#allocation87_spill] sm:$0xff] %v6704_v19  ;;  %9212 = vst [vmem:[#allocation81_spill] sm:$0xff] %v6706_v13  ;;  %v6726_v19 = vrot.slane %v6534_v39, %v9220_v23  ;;  %v9221_v13 = vld [vmem:[#allocation14_spill] sm:$0xff]  ;;  %v6792_v34 = vadd.f32 %v6544_v61, %v6722_v31  ;;  %v6830_v62 = vadd.f32 %v6536_v52, %v6722_v31 }
 0x561   :  { %v6708_v59 = vpop.f32.mrf.mxu0  ;;  %v6710_v11 = vpop.f32.mrf.mxu1  ;;  %v6868_v51 = vadd.f32 %v6525_v55, %v6722_v31 }
 0x562   :  { %9213 = vst [vmem:[#allocation89_spill] sm:$0xff] %v6708_v59  ;;  %9214 = vst [vmem:[#allocation85_spill] sm:$0xff] %v6710_v11  ;;  %v6730_v59 = vrot.slane %v6534_v39, %v9221_v13  ;;  %v6750_v6 = vadd.f32 %v6548_v18, %v6726_v19  ;;  %v6800_v17 = vadd.f32 %v6538_v54, %v6726_v19 }
 0x563   :  { %v6712_v57 = vpop.f32.mrf.mxu0  ;;  %v6714_v12 = vpop.f32.mrf.mxu1  ;;  %9237 = vst [vmem:[#allocation106_spill] sm:$0xff] %v6792_v34  ;;  %9245 = vst [vmem:[#allocation115_spill] sm:$0xff] %v6830_v62  ;;  %v6838_v3 = vadd.f32 %v6527_v53, %v6726_v19  ;;  %v6876_v2 = vadd.f32 %v6521_v21, %v6726_v19 }
 0x564   :  { %9215 = vst [vmem:[#allocation90_spill] sm:$0xff] %v6712_v57  ;;  %9216 = vst [vmem:[#allocation86_spill] sm:$0xff] %v6714_v12  ;;  %v6738_v12 = vadd.f32 %v6553_v37, %v6722_v31  ;;  %v6804_v26 = vadd.f32 %v6540_v30, %v6730_v59  ;;  %v6842_v25 = vadd.f32 %v6529_v27, %v6730_v59 }
 0x565   :  { %v6716_v38 = vpop.f32.mrf.mxu0  ;;  %v6718_v7 = vpop.f32.mrf.mxu1  ;;  %9227 = vst [vmem:[#allocation97_spill] sm:$0xff] %v6750_v6  ;;  %9239 = vst [vmem:[#allocation107_spill] sm:$0xff] %v6800_v17  ;;  %v6880_v41 = vadd.f32 %v6523_v44, %v6730_v59 }
 0x566   :  { %9217 = vst [vmem:[#allocation92_spill] sm:$0xff] %v6716_v38  ;;  %9218 = vst [vmem:[#allocation88_spill] sm:$0xff] %v6718_v7  ;;  %v6742_v7 = vadd.f32 %v6559_v50, %v6726_v19  ;;  %v6746_v38 = vadd.f32 %v6561_v49, %v6730_v59 }
 0x567   :  { %v6732_v11 = vpop.f32.mrf.mxu0  ;;  %v6734_v57 = vpop.f32.mrf.mxu1  ;;  %9224 = vst [vmem:[#allocation99_spill] sm:$0xff] %v6738_v12  ;;  %9240 = vst [vmem:[#allocation52_spill] sm:$0xff] %v6804_v26 }
 0x568   :  { %9222 = vst [vmem:[#allocation96_spill] sm:$0xff] %v6732_v11  ;;  %9223 = vst [vmem:[#allocation91_spill] sm:$0xff] %v6734_v57  ;;  %v6754_v11 = vadd.f32 %v6550_v35, %v6730_v59 }
 0x569   :  { %9225 = vst [vmem:[#allocation93_spill] sm:$0xff] %v6742_v7  ;;  %9226 = vst [vmem:[#allocation101_spill] sm:$0xff] %v6746_v38  ;;  %v6776_v13 = vpop.f32.mrf.mxu0  ;;  %v6778_v23 = vpop.f32.mrf.mxu1 }
 0x56a   :  { %9228 = vst [vmem:[#allocation102_spill] sm:$0xff] %v6754_v11  ;;  %9247 = vst [vmem:[#allocation120_spill] sm:$0xff] %v6838_v3 }
 0x56b   :  { %v6808_v61 = vpop.f32.mrf.mxu0  ;;  %v6810_v16 = vpop.f32.mrf.mxu1  ;;  %9248 = vst [vmem:[#allocation116_spill] sm:$0xff] %v6842_v25  ;;  %9253 = vst [vmem:[#allocation119_spill] sm:$0xff] %v6868_v51 }
 0x56c   :  { %9255 = vst [vmem:[#allocation95_spill] sm:$0xff] %v6876_v2  ;;  %9256 = vst [vmem:[#allocation123_spill] sm:$0xff] %v6880_v41 }
 0x56d   :  { %v6846_v52 = vpop.f32.mrf.mxu0  ;;  %v6848_v36 = vpop.f32.mrf.mxu1 }
 0x56f   :  { %v6884_v55 = vpop.f32.mrf.mxu0  ;;  %v6886_v39 = vpop.f32.mrf.mxu1 }
 0x597   :  { %v6756_v57 = vpop.permute.xlu1 %2813 }
 0x598   :  { %9229 = vst [vmem:[#allocation98_spill] sm:$0xff] %v6756_v57  ;;  %v6784_v45 = vsub.f32 %v6750_v6, %v6756_v57  ;;  %v6788_v5 = vsub.f32 %v6754_v11, %v6756_v57  ;;  %v6814_v47 = vsub.f32 %v6546_v4, %v6756_v57  ;;  %v6818_v54 = vsub.f32 %v6792_v34, %v6756_v57 }
 0x59a   :  { %9235 = vst [vmem:[#allocation105_spill] sm:$0xff] %v6784_v45  ;;  %9236 = vst [vmem:[#allocation110_spill] sm:$0xff] %v6788_v5 }
 0x59b   :  { %v6758_v37 = vpop.permute.xlu0 %2818  ;;  %9241 = vst [vmem:[#allocation112_spill] sm:$0xff] %v6814_v47  ;;  %9242 = vst [vmem:[#allocation53_spill] sm:$0xff] %v6818_v54  ;;  %v6832_v32 = vpop.permute.xlu1 %2803 }
 0x59c   :  { %9230 = vst [vmem:[#allocation103_spill] sm:$0xff] %v6758_v37  ;;  %v6762_v50 = vsub.f32 %v6742_v7, %v6758_v37  ;;  %v6766_v49 = vsub.f32 %v6746_v38, %v6758_v37  ;;  %v6770_v18 = vsub.f32 %v6557_v48, %v6758_v37  ;;  %v6774_v35 = vsub.f32 %v6738_v12, %v6758_v37 }
 0x59d   :  { %9246 = vst [vmem:[#allocation114_spill] sm:$0xff] %v6832_v32  ;;  %v6860_v27 = vsub.f32 %v6838_v3, %v6832_v32  ;;  %v6864_v20 = vsub.f32 %v6842_v25, %v6832_v32  ;;  %v6894_v21 = vsub.f32 %v6868_v51, %v6832_v32 }
 0x59e   :  { %9231 = vst [vmem:[#allocation100_spill] sm:$0xff] %v6762_v50  ;;  %9232 = vst [vmem:[#allocation108_spill] sm:$0xff] %v6766_v49  ;;  %3077 = vmatprep.subr.mxu0 %v6762_v50  ;;  %3148 = vmatprep.subr.mxu1 %v6766_v49 }
 0x59f   :  { %9233 = vst [vmem:[#allocation104_spill] sm:$0xff] %v6770_v18  ;;  %9234 = vst [vmem:[#allocation109_spill] sm:$0xff] %v6774_v35  ;;  %3078 = vmatpush1.xpose.msra.mxu0 %v6770_v18  ;;  %3149 = vmatpush1.xpose.msra.mxu1 %v6774_v35  ;;  %v6796_v0 = vpop.permute.xlu0 %2808  ;;  %v6990_v35 = vadd.f32 %v6503_v63, %v6726_v19  ;;  %v6994_v18 = vadd.f32 %v6505_v46, %v6730_v59 }
 0x5a0   :  { %9238 = vst [vmem:[#allocation111_spill] sm:$0xff] %v6796_v0  ;;  %3079 = vmatprep.subr.mxu0 %v6784_v45  ;;  %3150 = vmatprep.subr.mxu1 %v6788_v5  ;;  %v6822_v30 = vsub.f32 %v6800_v17, %v6796_v0  ;;  %v6826_v33 = vsub.f32 %v6804_v26, %v6796_v0  ;;  %9251 = vst [vmem:[#allocation118_spill] sm:$0xff] %v6860_v27 }
 0x5a1   :  { %v6852_v1 = vsub.f32 %v6571_v10, %v6796_v0  ;;  %v6856_v53 = vsub.f32 %v6830_v62, %v6796_v0  ;;  %9252 = vst [vmem:[#allocation122_spill] sm:$0xff] %v6864_v20  ;;  %9258 = vst [vmem:[#allocation125_spill] sm:$0xff] %v6894_v21  ;;  %v6956_v5 = vadd.f32 %v6511_v24, %v6730_v59 }
 0x5a2   :  { %9243 = vst [vmem:[#allocation64_spill] sm:$0xff] %v6822_v30  ;;  %9244 = vst [vmem:[#allocation113_spill] sm:$0xff] %v6826_v33 }
 0x5a3   :  { %3080 = vmatpush1.xpose.msra.mxu0 %v6814_v47  ;;  %3151 = vmatpush1.xpose.msra.mxu1 %v6818_v54  ;;  %9249 = vst [vmem:[#allocation121_spill] sm:$0xff] %v6852_v1  ;;  %9250 = vst [vmem:[#allocation117_spill] sm:$0xff] %v6856_v53  ;;  %v6870_v56 = vpop.permute.xlu0 %2798  ;;  %v6924_v54 = vpop.f32.mrf.mxu1  ;;  %v6952_v47 = vadd.f32 %v6509_v29, %v6726_v19 }
 0x5a4   :  { %3081 = vmatprep.subr.mxu0 %v6822_v30  ;;  %3152 = vmatprep.subr.mxu1 %v6826_v33  ;;  %9254 = vst [vmem:[#allocation94_spill] sm:$0xff] %v6870_v56  ;;  %v6898_v44 = vsub.f32 %v6876_v2, %v6870_v56  ;;  %v6914_v33 = vadd.f32 %v6515_v14, %v6726_v19  ;;  %9272 = vst [vmem:[#allocation139_spill] sm:$0xff] %v6956_v5 }
 0x5a5   :  { %v6918_v30 = vadd.f32 %v6517_v43, %v6730_v59  ;;  %9271 = vst [vmem:[#allocation138_spill] sm:$0xff] %v6952_v47  ;;  %v6962_v45 = vpop.f32.mrf.mxu1  ;;  %9278 = vst [vmem:[#allocation145_spill] sm:$0xff] %v6990_v35  ;;  %v7016_v19 = vadd.f32 %v6501_v40, %v6722_v31 }
 0x5a6   :  { %9259 = vst [vmem:[#allocation126_spill] sm:$0xff] %v6898_v44  ;;  %9263 = vst [vmem:[#allocation130_spill] sm:$0xff] %v6914_v33 }
 0x5a7   :  { %3082 = vmatpush1.xpose.msra.mxu0 %v6852_v1  ;;  %3153 = vmatpush1.xpose.msra.mxu1 %v6856_v53  ;;  %v6890_v1 = vsub.f32 %v6555_v60, %v6832_v32  ;;  %v6908_v53 = vpop.permute.xlu1 %2793  ;;  %9264 = vst [vmem:[#allocation131_spill] sm:$0xff] %v6918_v30  ;;  %9279 = vst [vmem:[#allocation146_spill] sm:$0xff] %v6994_v18  ;;  %v2766_v49 = vpop.f32.mrf.mxu1 }
 0x5a8   :  { %3083 = vmatprep.subr.mxu0 %v6860_v27  ;;  %3154 = vmatprep.subr.mxu1 %v6864_v20  ;;  %v6902_v27 = vsub.f32 %v6880_v41, %v6870_v56  ;;  %v6906_v20 = vadd.f32 %v6519_v28, %v6722_v31  ;;  %9262 = vst [vmem:[#allocation129_spill] sm:$0xff] %v6908_v53  ;;  %v6922_v28 = vpop.f32.mrf.mxu0  ;;  %9282 = vst [vmem:[#allocation149_spill] sm:$0xff] %v7016_v19 }
 0x5a9   :  { %9257 = vst [vmem:[#allocation124_spill] sm:$0xff] %v6890_v1  ;;  %v6936_v43 = vsub.f32 %v6914_v33, %v6908_v53 }
 0x5aa   :  { %9260 = vst [vmem:[#allocation127_spill] sm:$0xff] %v6902_v27  ;;  %9261 = vst [vmem:[#allocation128_spill] sm:$0xff] %v6906_v20  ;;  %v6932_v14 = vsub.f32 %v6906_v20, %v6870_v56 }
 0x5ab   :  { %3084 = vmatpush1.xpose.msra.mxu0 %v6890_v1  ;;  %3155 = vmatpush1.xpose.msra.mxu1 %v6894_v21  ;;  %v6928_v1 = vsub.f32 %v6585_v22, %v6870_v56  ;;  %9267 = vst [vmem:[#allocation134_spill] sm:$0xff] %v6936_v43  ;;  %v6946_v21 = vpop.permute.xlu0 %2788 }
 0x5ac   :  { %3085 = vmatprep.subr.mxu0 %v6898_v44  ;;  %3156 = vmatprep.subr.mxu1 %v6902_v27  ;;  %9266 = vst [vmem:[#allocation133_spill] sm:$0xff] %v6932_v14  ;;  %v6940_v44 = vsub.f32 %v6918_v30, %v6908_v53  ;;  %v6944_v27 = vadd.f32 %v6513_v58, %v6722_v31  ;;  %9270 = vst [vmem:[#allocation137_spill] sm:$0xff] %v6946_v21  ;;  %v6960_v58 = vpop.f32.mrf.mxu0 }
 0x5ad   :  { %9265 = vst [vmem:[#allocation132_spill] sm:$0xff] %v6928_v1  ;;  %v6974_v24 = vsub.f32 %v6952_v47, %v6946_v21  ;;  %v7000_v50 = vsub.f32 %v6597_v9, %v6946_v21 }
 0x5ae   :  { %9268 = vst [vmem:[#allocation135_spill] sm:$0xff] %v6940_v44  ;;  %9269 = vst [vmem:[#allocation136_spill] sm:$0xff] %v6944_v27  ;;  %v6970_v29 = vsub.f32 %v6944_v27, %v6908_v53 }
 0x5af   :  { %3086 = vmatpush1.xpose.msra.mxu0 %v6928_v1  ;;  %3157 = vmatpush1.xpose.msra.mxu1 %v6932_v14  ;;  %v6966_v1 = vsub.f32 %v6569_v15, %v6908_v53  ;;  %9274 = vst [vmem:[#allocation141_spill] sm:$0xff] %v6974_v24  ;;  %v6984_v14 = vpop.permute.xlu1 %2783 }
 0x5b0   :  { %3087 = vmatprep.subr.mxu0 %v6936_v43  ;;  %3158 = vmatprep.subr.mxu1 %v6940_v44  ;;  %9273 = vst [vmem:[#allocation140_spill] sm:$0xff] %v6970_v29  ;;  %v6978_v43 = vsub.f32 %v6956_v5, %v6946_v21  ;;  %v6982_v44 = vadd.f32 %v6507_v42, %v6722_v31  ;;  %9277 = vst [vmem:[#allocation144_spill] sm:$0xff] %v6984_v14  ;;  %v2693_v42 = vpop.f32.mrf.mxu0 }
 0x5b1   :  { %v7008_v63 = vsub.f32 %v6990_v35, %v6984_v14  ;;  %v7012_v46 = vsub.f32 %v6994_v18, %v6984_v14 }
 0x5b2   :  { %9275 = vst [vmem:[#allocation142_spill] sm:$0xff] %v6978_v43  ;;  %9276 = vst [vmem:[#allocation143_spill] sm:$0xff] %v6982_v44  ;;  %v2695_v59 = vpop.f32.mrf.mxu0 }
 0x5b3   :  { %3088 = vmatpush1.xpose.msra.mxu0 %v6966_v1  ;;  %3159 = vmatpush1.xpose.msra.mxu1 %v6970_v29  ;;  %v7004_v29 = vsub.f32 %v6982_v44, %v6946_v21  ;;  %9280 = vst [vmem:[#allocation147_spill] sm:$0xff] %v7008_v63  ;;  %9281 = vst [vmem:[#allocation148_spill] sm:$0xff] %v7012_v46  ;;  %v2768_v21 = vpop.f32.mrf.mxu1 }
 0x5b4   :  { %3089 = vmatprep.subr.mxu0 %v6974_v24  ;;  %3160 = vmatprep.subr.mxu1 %v6978_v43  ;;  %v7024_v43 = vsub.f32 %v6583_v8, %v6984_v14  ;;  %v7028_v24 = vsub.f32 %v7016_v19, %v6984_v14  ;;  %v2699_v40 = vpop.f32.mrf.mxu0 }
 0x5b5   :  { %v2772_v31 = vpop.f32.mrf.mxu1 }
 0x5b6   :  { %9283 = vst [vmem:[#allocation150_spill] sm:$0xff] %v7024_v43  ;;  %9284 = vst [vmem:[#allocation151_spill] sm:$0xff] %v7028_v24  ;;  %v2701_v14 = vpop.f32.mrf.mxu0 }
 0x5b7   :  { %3090 = vmatpush1.xpose.msra.mxu0 %v7000_v50  ;;  %3161 = vmatpush1.xpose.msra.mxu1 %v7004_v29 }
 0x5b8   :  { %3091 = vmatprep.subr.mxu0 %v7008_v63  ;;  %3162 = vmatprep.subr.mxu1 %v7012_v46  ;;  %v2774_v46 = vpop.f32.mrf.mxu1 }
 0x5bb   :  { %3092 = vmatpush1.xpose.msra.mxu0 %v7024_v43  ;;  %3163 = vmatpush1.xpose.msra.mxu1 %v7028_v24  ;;  %v9292_v43 = vld [vmem:[#allocation47_spill] sm:$0xff] }
 0x5bc   :  { %3093 = vmatprep.subr.mxu0 %v6742_v7  ;;  %3164 = vmatprep.subr.mxu1 %v6746_v38  ;;  %v7043_v38 = vld [vmem:[%s8577_s2 + $0x8] sm:$0xff] }
 0x5bd   :  { %9285 = vst [vmem:[#allocation152_spill] sm:$0xff] %v7043_v38  ;;  %v7061_v63 = vrot.slane %v7043_v38, %v9292_v43 }
 0x5bf   :  { %3094 = vmatpush1.xpose.msra.mxu0 %v6557_v48  ;;  %3165 = vmatpush1.xpose.msra.mxu1 %v6738_v12  ;;  %v9286_v48 = vld [vmem:[#allocation48_spill] sm:$0xff]  ;;  %9293 = vst [vmem:[#allocation47_spill] sm:$0xff] %v7061_v63 }
 0x5c0   :  { %3095 = vmatprep.subr.mxu0 %v6750_v6  ;;  %3166 = vmatprep.subr.mxu1 %v6754_v11  ;;  %v7049_v12 = vrot.slane %v7043_v38, %v9286_v48  ;;  %v9288_v11 = vld [vmem:[#allocation49_spill] sm:$0xff]  ;;  %v2776_v6 = vpop.f32.mrf.mxu1 }
 0x5c1   :  { %v7053_v7 = vrot.slane %v7043_v38, %v9288_v11 }
 0x5c2   :  { %9287 = vst [vmem:[#allocation48_spill] sm:$0xff] %v7049_v12 }
 0x5c3   :  { %3096 = vmatpush1.xpose.msra.mxu0 %v6546_v4  ;;  %3167 = vmatpush1.xpose.msra.mxu1 %v6792_v34  ;;  %9289 = vst [vmem:[#allocation153_spill] sm:$0xff] %v7053_v7  ;;  %v2703_v4 = vpop.f32.mrf.mxu0  ;;  %v9290_v34 = vld [vmem:[#allocation46_spill] sm:$0xff] }
 0x5c4   :  { %3097 = vmatprep.subr.mxu0 %v6800_v17  ;;  %3168 = vmatprep.subr.mxu1 %v6804_v26  ;;  %v7057_v24 = vrot.slane %v7043_v38, %v9290_v34  ;;  %v7065_v26 = vadd.f32 %v6776_v13, %v7049_v12  ;;  %v7069_v17 = vadd.f32 %v6778_v23, %v7053_v7 }
 0x5c5   :  { %v7079_v38 = vadd.f32 %v6810_v16, %v7061_v63  ;;  %v7083_v13 = vadd.f32 %v6846_v52, %v7049_v12  ;;  %v7089_v23 = vadd.f32 %v6848_v36, %v7053_v7  ;;  %v7097_v16 = vadd.f32 %v6886_v39, %v7061_v63 }
 0x5c6   :  { %9291 = vst [vmem:[#allocation46_spill] sm:$0xff] %v7057_v24  ;;  %9294 = vst [vmem:[#allocation154_spill] sm:$0xff] %v7065_v26  ;;  %v7075_v11 = vadd.f32 %v6808_v61, %v7057_v24  ;;  %v7093_v61 = vadd.f32 %v6884_v55, %v7057_v24  ;;  %v7101_v52 = vadd.f32 %v6922_v28, %v7049_v12 }
 0x5c7   :  { %9295 = vst [vmem:[#allocation155_spill] sm:$0xff] %v7069_v17  ;;  %3098 = vmatpush1.xpose.msra.mxu0 %v6571_v10  ;;  %3169 = vmatpush1.xpose.msra.mxu1 %v6830_v62  ;;  %9297 = vst [vmem:[#allocation157_spill] sm:$0xff] %v7079_v38  ;;  %v2705_v10 = vpop.f32.mrf.mxu0  ;;  %v2778_v62 = vpop.f32.mrf.mxu1  ;;  %v7109_v36 = vadd.f32 %v6960_v58, %v7057_v24  ;;  %v7113_v55 = vadd.f32 %v6962_v45, %v7061_v63 }
 0x5c8   :  { %9296 = vst [vmem:[#allocation156_spill] sm:$0xff] %v7075_v11  ;;  %9298 = vst [vmem:[#allocation158_spill] sm:$0xff] %v7083_v13  ;;  %3099 = vmatprep.subr.mxu0 %v6838_v3  ;;  %3170 = vmatprep.subr.mxu1 %v6842_v25  ;;  %v7105_v25 = vadd.f32 %v6924_v54, %v7053_v7  ;;  %v7116_v39 = vadd.f32 %v2693_v42, %v7049_v12 }
 0x5c9   :  { %9299 = vst [vmem:[#allocation159_spill] sm:$0xff] %v7089_v23  ;;  %9300 = vst [vmem:[#allocation160_spill] sm:$0xff] %v7093_v61  ;;  %v7119_v28 = vadd.f32 %v2766_v49, %v7053_v7  ;;  %v7122_v3 = vadd.f32 %v2695_v59, %v7057_v24  ;;  %v7125_v54 = vadd.f32 %v2768_v21, %v7061_v63 }
 0x5ca   :  { %9301 = vst [vmem:[#allocation161_spill] sm:$0xff] %v7097_v16  ;;  %9302 = vst [vmem:[#allocation162_spill] sm:$0xff] %v7101_v52  ;;  %v7130_v58 = vadd.f32 %v2703_v4, %v7049_v12  ;;  %v7133_v45 = vadd.f32 %v2705_v10, %v7057_v24  ;;  %v7136_v42 = vadd.f32 %v2778_v62, %v7061_v63 }
 0x5cb   :  { %9303 = vst [vmem:[#allocation163_spill] sm:$0xff] %v7105_v25  ;;  %9304 = vst [vmem:[#allocation164_spill] sm:$0xff] %v7109_v36  ;;  %3100 = vmatpush1.xpose.msra.mxu0 %v6555_v60  ;;  %3171 = vmatpush1.xpose.msra.mxu1 %v6868_v51  ;;  %v7141_v49 = vadd.f32 %v2699_v40, %v7049_v12  ;;  %v7144_v21 = vadd.f32 %v2701_v14, %v7057_v24  ;;  %v9388_v12 = vld [vmem:[#allocation10_spill] sm:$0xff]  ;;  %v9390_v24 = vld [vmem:[#allocation33_spill] sm:$0xff] }
 0x5cc   :  { %9305 = vst [vmem:[#allocation165_spill] sm:$0xff] %v7113_v55  ;;  %9306 = vst [vmem:[#allocation166_spill] sm:$0xff] %v7116_v39  ;;  %3101 = vmatprep.subr.mxu0 %v6876_v2  ;;  %3172 = vmatprep.subr.mxu1 %v6880_v41  ;;  %v7147_v59 = vadd.f32 %v2774_v46, %v7061_v63  ;;  %v7150_v4 = vadd.f32 %v2776_v6, %v7053_v7 }
 0x5cd   :  { %9307 = vst [vmem:[#allocation167_spill] sm:$0xff] %v7119_v28  ;;  %9308 = vst [vmem:[#allocation168_spill] sm:$0xff] %v7122_v3  ;;  %v7153_v10 = vadd.f32 %v2772_v31, %v7053_v7  ;;  %v7157_v62 = vsub.f32 %v7133_v45, %v6758_v37  ;;  %v7161_v40 = vsub.f32 %v7136_v42, %v6758_v37 }
 0x5ce   :  { %9309 = vst [vmem:[#allocation169_spill] sm:$0xff] %v7125_v54  ;;  %9310 = vst [vmem:[#allocation170_spill] sm:$0xff] %v7130_v58  ;;  %v7165_v14 = vsub.f32 %v7130_v58, %v6758_v37  ;;  %v7171_v6 = vsub.f32 %v7150_v4, %v6758_v37  ;;  %v7175_v46 = vsub.f32 %v7144_v21, %v6756_v57  ;;  %v9385_v58 = vld [vmem:[#allocation44_spill] sm:$0xff] }
 0x5cf   :  { %9311 = vst [vmem:[#allocation171_spill] sm:$0xff] %v7133_v45  ;;  %9312 = vst [vmem:[#allocation172_spill] sm:$0xff] %v7136_v42  ;;  %3102 = vmatpush1.xpose.msra.mxu0 %v6585_v22  ;;  %3173 = vmatpush1.xpose.msra.mxu1 %v6906_v20  ;;  %v7179_v31 = vsub.f32 %v7147_v59, %v6756_v57  ;;  %v7185_v22 = vsub.f32 %v7141_v49, %v6756_v57  ;;  %v9386_v45 = vld [vmem:[#allocation34_spill] sm:$0xff] }
 0x5d0   :  { %9313 = vst [vmem:[#allocation173_spill] sm:$0xff] %v7141_v49  ;;  %9314 = vst [vmem:[#allocation174_spill] sm:$0xff] %v7144_v21  ;;  %3103 = vmatprep.subr.mxu0 %v6914_v33  ;;  %3174 = vmatprep.subr.mxu1 %v6918_v30  ;;  %v7189_v20 = vsub.f32 %v7153_v10, %v6756_v57  ;;  %v7193_v41 = vsub.f32 %v7122_v3, %v6796_v0  ;;  %v9382_v3 = vld [vmem:[#allocation40_spill] sm:$0xff]  ;;  %v9384_v21 = vld [vmem:[#allocation39_spill] sm:$0xff] }
 0x5d1   :  { %9315 = vst [vmem:[#allocation175_spill] sm:$0xff] %v7147_v59  ;;  %9316 = vst [vmem:[#allocation176_spill] sm:$0xff] %v7150_v4  ;;  %v7197_v2 = vsub.f32 %v7125_v54, %v6796_v0  ;;  %v7201_v33 = vsub.f32 %v7116_v39, %v6796_v0  ;;  %v7205_v30 = vsub.f32 %v7119_v28, %v6796_v0  ;;  %v9383_v49 = vld [vmem:[#allocation8_spill] sm:$0xff] }
 0x5d2   :  { %9317 = vst [vmem:[#allocation177_spill] sm:$0xff] %v7153_v10  ;;  %9318 = vst [vmem:[#allocation178_spill] sm:$0xff] %v7157_v62  ;;  %v7209_v60 = vsub.f32 %v7109_v36, %v6832_v32  ;;  %v7213_v51 = vsub.f32 %v7113_v55, %v6832_v32  ;;  %v7217_v54 = vsub.f32 %v7101_v52, %v6832_v32 }
 0x5d3   :  { %9319 = vst [vmem:[#allocation179_spill] sm:$0xff] %v7161_v40  ;;  %9320 = vst [vmem:[#allocation180_spill] sm:$0xff] %v7165_v14  ;;  %v7221_v39 = vsub.f32 %v7105_v25, %v6832_v32  ;;  %v7225_v28 = vsub.f32 %v7093_v61, %v6870_v56  ;;  %3104 = vmatpush1.xpose.msra.mxu0 %v6569_v15  ;;  %3175 = vmatpush1.xpose.msra.mxu1 %v6944_v27  ;;  %v9401_v14 = vld [vmem:[#allocation24_spill] sm:$0xff] }
 0x5d4   :  { %9321 = vst [vmem:[#allocation181_spill] sm:$0xff] %v7171_v6  ;;  %9322 = vst [vmem:[#allocation182_spill] sm:$0xff] %v7175_v46  ;;  %v7231_v55 = vsub.f32 %v7097_v16, %v6870_v56  ;;  %v7235_v52 = vsub.f32 %v7083_v13, %v6870_v56  ;;  %v7239_v25 = vsub.f32 %v7089_v23, %v6870_v56  ;;  %3105 = vmatprep.subr.mxu0 %v6952_v47  ;;  %v9347_v16 = vld [vmem:[#allocation110_spill] sm:$0xff] }
 0x5d5   :  { %9323 = vst [vmem:[#allocation183_spill] sm:$0xff] %v7179_v31  ;;  %9324 = vst [vmem:[#allocation184_spill] sm:$0xff] %v7185_v22  ;;  %3176 = vmatprep.subr.mxu1 %v6956_v5  ;;  %v7245_v15 = vsub.f32 %v7075_v11, %v6908_v53  ;;  %v7249_v27 = vsub.f32 %v7079_v38, %v6908_v53  ;;  %v7253_v13 = vsub.f32 %v7065_v26, %v6908_v53  ;;  %v9342_v5 = vld [vmem:[#allocation100_spill] sm:$0xff]  ;;  %v9346_v26 = vld [vmem:[#allocation105_spill] sm:$0xff] }
 0x5d6   :  { %9325 = vst [vmem:[#allocation185_spill] sm:$0xff] %v7189_v20  ;;  %9326 = vst [vmem:[#allocation186_spill] sm:$0xff] %v7193_v41  ;;  %v7257_v23 = vsub.f32 %v7069_v17, %v6908_v53  ;;  %v3062_v47 = vmul.f32 %v9342_v5, %v9342_v5  ;;  %v9343_v38 = vld [vmem:[#allocation108_spill] sm:$0xff]  ;;  %v3048_v5 = vmul.f32 %v9347_v16, %v9347_v16  ;;  %v9354_v16 = vld [vmem:[#allocation118_spill] sm:$0xff] }
 0x5d7   :  { %9327 = vst [vmem:[#allocation187_spill] sm:$0xff] %v7197_v2  ;;  %9328 = vst [vmem:[#allocation188_spill] sm:$0xff] %v7201_v33  ;;  %3106 = vmatpush1.xpose.msra.mxu0 %v6597_v9  ;;  %3177 = vmatpush1.xpose.msra.mxu1 %v6982_v44  ;;  %v3064_v11 = vmul.f32 %v9343_v38, %v9343_v38  ;;  %v9344_v17 = vld [vmem:[#allocation104_spill] sm:$0xff]  ;;  %v9345_v44 = vld [vmem:[#allocation109_spill] sm:$0xff] }
 0x5d8   :  { %9329 = vst [vmem:[#allocation189_spill] sm:$0xff] %v7205_v30  ;;  %9330 = vst [vmem:[#allocation190_spill] sm:$0xff] %v7209_v60  ;;  %3107 = vmatprep.subr.mxu0 %v6990_v35  ;;  %3178 = vmatprep.subr.mxu1 %v6994_v18  ;;  %v3061_v9 = vmul.f32 %v9344_v17, %v9344_v17  ;;  %v3063_v35 = vmul.f32 %v9345_v44, %v9345_v44  ;;  %v9348_v38 = vld [vmem:[#allocation112_spill] sm:$0xff]  ;;  %v9351_v44 = vld [vmem:[#allocation113_spill] sm:$0xff] }
 0x5d9   :  { %9331 = vst [vmem:[#allocation191_spill] sm:$0xff] %v7213_v51  ;;  %9332 = vst [vmem:[#allocation192_spill] sm:$0xff] %v7217_v54  ;;  %v3046_v18 = vmul.f32 %v9346_v26, %v9346_v26  ;;  %v9350_v17 = vld [vmem:[#allocation64_spill] sm:$0xff]  ;;  %v3032_v61 = vmul.f32 %v9351_v44, %v9351_v44  ;;  %v9394_v60 = vld [vmem:[#allocation29_spill] sm:$0xff] }
 0x5da   :  { %9333 = vst [vmem:[#allocation193_spill] sm:$0xff] %v7221_v39  ;;  %9334 = vst [vmem:[#allocation194_spill] sm:$0xff] %v7225_v28  ;;  %v9392_v28 = vld [vmem:[#allocation32_spill] sm:$0xff]  ;;  %v9395_v33 = vld [vmem:[#allocation35_spill] sm:$0xff] }
 0x5db   :  { %9335 = vst [vmem:[#allocation195_spill] sm:$0xff] %v7231_v55  ;;  %9336 = vst [vmem:[#allocation196_spill] sm:$0xff] %v7235_v52  ;;  %3108 = vmatpush1.xpose.msra.mxu0 %v6583_v8  ;;  %3179 = vmatpush1.xpose.msra.mxu1 %v7016_v19  ;;  %v3030_v19 = vmul.f32 %v9350_v17, %v9350_v17  ;;  %v9358_v17 = vld [vmem:[#allocation126_spill] sm:$0xff]  ;;  %v9393_v54 = vld [vmem:[#allocation36_spill] sm:$0xff] }
 0x5dc   :  { %9337 = vst [vmem:[#allocation197_spill] sm:$0xff] %v7239_v25  ;;  %9338 = vst [vmem:[#allocation198_spill] sm:$0xff] %v7245_v15  ;;  %3125 = vmatprep.subr.mxu0 %v3062_v47  ;;  %3196 = vmatprep.subr.mxu1 %v3064_v11  ;;  %v3045_v47 = vmul.f32 %v9348_v38, %v9348_v38  ;;  %v9349_v11 = vld [vmem:[#allocation53_spill] sm:$0xff]  ;;  %v9355_v38 = vld [vmem:[#allocation122_spill] sm:$0xff]  ;;  %v2998_v44 = vmul.f32 %v9358_v17, %v9358_v17 }
 0x5dd   :  { %9339 = vst [vmem:[#allocation199_spill] sm:$0xff] %v7249_v27  ;;  %9340 = vst [vmem:[#allocation200_spill] sm:$0xff] %v7253_v13  ;;  %v3047_v8 = vmul.f32 %v9349_v11, %v9349_v11  ;;  %v3016_v11 = vmul.f32 %v9355_v38, %v9355_v38  ;;  %v9362_v38 = vld [vmem:[#allocation134_spill] sm:$0xff]  ;;  %v9387_v13 = vld [vmem:[#allocation43_spill] sm:$0xff] }
 0x5de   :  { %9341 = vst [vmem:[#allocation201_spill] sm:$0xff] %v7257_v23  ;;  %v9389_v15 = vld [vmem:[#allocation37_spill] sm:$0xff]  ;;  %v9391_v52 = vld [vmem:[#allocation6_spill] sm:$0xff]  ;;  %v9399_v22 = vld [vmem:[#allocation4_spill] sm:$0xff] }
 0x5df   :  { %3126 = vmatpush2.xpose.msra.mxu0 %v3061_v9  ;;  %3197 = vmatpush2.xpose.msra.mxu1 %v3063_v35  ;;  %v9352_v9 = vld [vmem:[#allocation121_spill] sm:$0xff]  ;;  %v9400_v46 = vld [vmem:[#allocation30_spill] sm:$0xff] }
 0x5e0   :  { %3127 = vmatprep.subr.mxu0 %v3046_v18  ;;  %3198 = vmatprep.subr.mxu1 %v3048_v5  ;;  %v3029_v26 = vmul.f32 %v9352_v9, %v9352_v9  ;;  %v9353_v18 = vld [vmem:[#allocation117_spill] sm:$0xff]  ;;  %v3014_v5 = vmul.f32 %v9354_v16, %v9354_v16  ;;  %v9359_v9 = vld [vmem:[#allocation127_spill] sm:$0xff] }
 0x5e1   :  { %v3031_v35 = vmul.f32 %v9353_v18, %v9353_v18  ;;  %v3000_v18 = vmul.f32 %v9359_v9, %v9359_v9  ;;  %v9361_v16 = vld [vmem:[#allocation133_spill] sm:$0xff] }
 0x5e3   :  { %3128 = vmatpush2.xpose.msra.mxu0 %v3045_v47  ;;  %3199 = vmatpush2.xpose.msra.mxu1 %v3047_v8  ;;  %v9356_v47 = vld [vmem:[#allocation124_spill] sm:$0xff] }
 0x5e4   :  { %3129 = vmatprep.subr.mxu0 %v3030_v19  ;;  %3200 = vmatprep.subr.mxu1 %v3032_v61  ;;  %v3013_v8 = vmul.f32 %v9356_v47, %v9356_v47  ;;  %v9357_v19 = vld [vmem:[#allocation125_spill] sm:$0xff]  ;;  %v9363_v47 = vld [vmem:[#allocation135_spill] sm:$0xff] }
 0x5e5   :  { %v3015_v61 = vmul.f32 %v9357_v19, %v9357_v19  ;;  %v2984_v19 = vmul.f32 %v9363_v47, %v9363_v47 }
 0x5e7   :  { %3130 = vmatpush2.xpose.msra.mxu0 %v3029_v26  ;;  %3201 = vmatpush2.xpose.msra.mxu1 %v3031_v35  ;;  %v9360_v26 = vld [vmem:[#allocation132_spill] sm:$0xff] }
 0x5e8   :  { %3131 = vmatprep.subr.mxu0 %v3014_v5  ;;  %3202 = vmatprep.subr.mxu1 %v3016_v11  ;;  %v2997_v35 = vmul.f32 %v9360_v26, %v9360_v26  ;;  %v2999_v5 = vmul.f32 %v9361_v16, %v9361_v16  ;;  %v2982_v11 = vmul.f32 %v9362_v38, %v9362_v38 }
 0x5e9   :  { %v2967_v16 = vmul.f32 %v7004_v29, %v7004_v29  ;;  %v9371_v29 = vld [vmem:[#allocation2_spill] sm:$0xff] }
 0x5eb   :  { %3132 = vmatpush2.xpose.msra.mxu0 %v3013_v8  ;;  %3203 = vmatpush2.xpose.msra.mxu1 %v3015_v61  ;;  %v2981_v8 = vmul.f32 %v6966_v1, %v6966_v1  ;;  %v9364_v61 = vld [vmem:[#allocation140_spill] sm:$0xff]  ;;  %v9367_v1 = vld [vmem:[#allocation38_spill] sm:$0xff] }
 0x5ec   :  { %3133 = vmatprep.subr.mxu0 %v2998_v44  ;;  %3204 = vmatprep.subr.mxu1 %v3000_v18  ;;  %v2983_v17 = vmul.f32 %v9364_v61, %v9364_v61  ;;  %v9365_v44 = vld [vmem:[#allocation141_spill] sm:$0xff]  ;;  %v9366_v18 = vld [vmem:[#allocation142_spill] sm:$0xff]  ;;  %v7327_v38 = vrot.slane %v9367_v1, %v9292_v43  ;;  %v7343_v43 = vrot.slane %v9367_v1, %v9286_v48 }
 0x5ed   :  { %v2966_v9 = vmul.f32 %v9365_v44, %v9365_v44  ;;  %v2968_v26 = vmul.f32 %v9366_v18, %v9366_v18  ;;  %v9375_v48 = vld [vmem:[#allocation50_spill] sm:$0xff] }
 0x5ee   :  { %v7413_v59 = vadd.f32 %v9383_v49, %v7327_v38  ;;  %v7437_v4 = vadd.f32 %v9384_v21, %v7343_v43  ;;  %v7451_v7 = vadd.f32 %v9387_v13, %v7327_v38  ;;  %v7473_v27 = vadd.f32 %v9388_v12, %v7343_v43 }
 0x5ef   :  { %3134 = vmatpush2.xpose.msra.mxu0 %v2997_v35  ;;  %3205 = vmatpush2.xpose.msra.mxu1 %v2999_v5  ;;  %v2965_v35 = vmul.f32 %v7000_v50, %v7000_v50  ;;  %v7323_v5 = vrot.slane %v9367_v1, %v9290_v34  ;;  %v9370_v50 = vld [vmem:[#allocation51_spill] sm:$0xff]  ;;  %v7339_v34 = vadd.f32 %v9371_v29, %v7327_v38  ;;  %v9378_v29 = vld [vmem:[#allocation56_spill] sm:$0xff] }
 0x5f0   :  { %3135 = vmatprep.subr.mxu0 %v2982_v11  ;;  %3206 = vmatprep.subr.mxu1 %v2984_v19  ;;  %v9368_v11 = vld [vmem:[#allocation147_spill] sm:$0xff]  ;;  %v9369_v19 = vld [vmem:[#allocation148_spill] sm:$0xff]  ;;  %v7433_v49 = vsub.f32 %v7413_v59, %v6796_v0  ;;  %v7469_v13 = vsub.f32 %v7451_v7, %v6832_v32  ;;  %v7487_v55 = vadd.f32 %v9391_v52, %v7327_v38 }
 0x5f1   :  { %v2950_v47 = vmul.f32 %v9368_v11, %v9368_v11  ;;  %v7335_v61 = vadd.f32 %v9370_v50, %v7323_v5  ;;  %v7359_v11 = vsub.f32 %v7339_v34, %v6758_v37  ;;  %v7409_v10 = vadd.f32 %v9382_v3, %v7323_v5 }
 0x5f2   :  { %v7447_v23 = vadd.f32 %v9386_v45, %v7323_v5  ;;  %v7483_v25 = vadd.f32 %v9390_v24, %v7323_v5  ;;  %v7505_v52 = vsub.f32 %v7487_v55, %v6870_v56  ;;  %v7509_v39 = vadd.f32 %v9392_v28, %v7343_v43 }
 0x5f3   :  { %3136 = vmatpush2.xpose.msra.mxu0 %v2981_v8  ;;  %3207 = vmatpush2.xpose.msra.mxu1 %v2983_v17  ;;  %v2952_v8 = vmul.f32 %v9369_v19, %v9369_v19  ;;  %v9372_v17 = vld [vmem:[#allocation49_spill] sm:$0xff]  ;;  %v7429_v3 = vsub.f32 %v7409_v10, %v6796_v0  ;;  %v2390_v30 = vadd.f32 %v9394_v60, %v7323_v5 }
 0x5f4   :  { %3137 = vmatprep.subr.mxu0 %v2966_v9  ;;  %3208 = vmatprep.subr.mxu1 %v2968_v26  ;;  %v7347_v44 = vrot.slane %v9367_v1, %v9372_v17  ;;  %v9373_v9 = vld [vmem:[#allocation150_spill] sm:$0xff]  ;;  %v9374_v26 = vld [vmem:[#allocation151_spill] sm:$0xff]  ;;  %v9376_v1 = vld [vmem:[#allocation57_spill] sm:$0xff]  ;;  %v7375_v17 = vadd.f32 %v9378_v29, %v7327_v38  ;;  %v7465_v45 = vsub.f32 %v7447_v23, %v6832_v32 }
 0x5f5   :  { %v2949_v18 = vmul.f32 %v9373_v9, %v9373_v9  ;;  %v9381_v29 = vld [vmem:[#allocation45_spill] sm:$0xff]  ;;  %v7501_v24 = vsub.f32 %v7483_v25, %v6870_v56  ;;  %v2463_v2 = vadd.f32 %v9395_v33, %v7327_v38  ;;  %v7525_v28 = vsub.f32 %v7509_v39, %v6870_v56 }
 0x5f6   :  { %v7367_v19 = vadd.f32 %v9376_v1, %v7347_v44  ;;  %v9380_v1 = vld [vmem:[#allocation11_spill] sm:$0xff]  ;;  %v7403_v36 = vadd.f32 %v9381_v29, %v7347_v44  ;;  %v7441_v42 = vadd.f32 %v9385_v58, %v7347_v44  ;;  %v7457_v58 = vsub.f32 %v7437_v4, %v6796_v0  ;;  %v9398_v33 = vld [vmem:[#allocation5_spill] sm:$0xff] }
 0x5f7   :  { %3138 = vmatpush2.xpose.msra.mxu0 %v2965_v35  ;;  %3209 = vmatpush2.xpose.msra.mxu1 %v2967_v16  ;;  %v2951_v35 = vmul.f32 %v9374_v26, %v9374_v26  ;;  %v7355_v16 = vsub.f32 %v7335_v61, %v6758_v37  ;;  %v9379_v26 = vmov 1.0   ;;  %v7477_v63 = vadd.f32 %v9389_v15, %v7347_v44 }
 0x5f8   :  { %3139 = vmatprep.subr.mxu0 %v2950_v47  ;;  %3210 = vmatprep.subr.mxu1 %v2952_v8  ;;  %v7363_v47 = vadd.f32 %v9375_v48, %v7343_v43  ;;  %v9377_v8 = vld [vmem:[#allocation41_spill] sm:$0xff]  ;;  %v7395_v48 = vsub.f32 %v7375_v17, %v6756_v57  ;;  %v7423_v29 = vsub.f32 %v7403_v36, %v6756_v57 }
 0x5f9   :  { %v7371_v50 = vadd.f32 %v9377_v8, %v7323_v5  ;;  %v7399_v8 = vadd.f32 %v9380_v1, %v7343_v43  ;;  %v7461_v21 = vsub.f32 %v7441_v42, %v6796_v0  ;;  %v7493_v15 = vsub.f32 %v7473_v27, %v6832_v32 }
 0x5fa   :  { %v7381_v9 = vsub.f32 %v7363_v47, %v6758_v37  ;;  %v7497_v12 = vsub.f32 %v7477_v63, %v6832_v32  ;;  %v7513_v51 = vadd.f32 %v9393_v54, %v7347_v44  ;;  %v7532_v41 = vsub.f32 %v2390_v30, %v6908_v53 }
 0x5fb   :  { %3140 = vmatpush2.xpose.msra.mxu0 %v2949_v18  ;;  %3211 = vmatpush2.xpose.msra.mxu1 %v2951_v35  ;;  %v7385_v18 = vsub.f32 %v7367_v19, %v6758_v37  ;;  %v7391_v35 = vsub.f32 %v7371_v50, %v6756_v57  ;;  %v7419_v1 = vsub.f32 %v7399_v8, %v6756_v57  ;;  %v9409_v37 = vld [vmem:[#allocation7_spill] sm:$0xff] }
 0x5fc   :  { %3219 = vmatprep.subr.mxu0 %v7355_v16  ;;  %3290 = vmatprep.subr.mxu1 %v7359_v11  ;;  %v7529_v54 = vsub.f32 %v7513_v51, %v6870_v56  ;;  %9396 = vst [vmem:[#allocation100_spill] sm:$0xff] %v7532_v41  ;;  %v7535_v60 = vsub.f32 %v2463_v2, %v6908_v53 }
 0x5fd   :  { %v2388_v20 = vadd.f32 %v9398_v33, %v7343_v43  ;;  %v2461_v31 = vadd.f32 %v9399_v22, %v7347_v44  ;;  %v2384_v6 = vadd.f32 %v9400_v46, %v7323_v5  ;;  %v2457_v40 = vadd.f32 %v9401_v14, %v7327_v38  ;;  %v9404_v22 = vld [vmem:[#allocation137_spill] sm:$0xff]  ;;  %v9406_v46 = vld [vmem:[#allocation27_spill] sm:$0xff] }
 0x5fe   :  { %3142 = vmatmul.mubr.f32.vlgmr.msra.gmra.mxu0 %v9379_v26  ;;  %3213 = vmatmul.mubr.f32.vlgmr.msra.gmra.mxu1 %v9379_v26  ;;  %9397 = vst [vmem:[#allocation108_spill] sm:$0xff] %v7535_v60  ;;  %v2382_v0 = vadd.f32 %v9406_v46, %v7343_v43  ;;  %v9407_v14 = vld [vmem:[#allocation19_spill] sm:$0xff] }
 0x5ff   :  { %3220 = vmatpush1.xpose.msra.mxu0 %v7381_v9  ;;  %3291 = vmatpush1.xpose.msra.mxu1 %v7385_v18  ;;  %v7550_v62 = vsub.f32 %v2388_v20, %v6908_v53  ;;  %v7553_v33 = vsub.f32 %v2461_v31, %v6908_v53  ;;  %v7556_v56 = vsub.f32 %v2384_v6, %v9404_v22 }
 0x600   :  { %3221 = vmatprep.subr.mxu0 %v7391_v35  ;;  %3292 = vmatprep.subr.mxu1 %v7395_v48  ;;  %v7559_v32 = vsub.f32 %v2457_v40, %v9404_v22  ;;  %v2455_v57 = vadd.f32 %v9407_v14, %v7347_v44  ;;  %v9410_v14 = vld [vmem:[#allocation144_spill] sm:$0xff] }
 0x601   :  { %3283 = vmatprep.mubr.f32.mxu0 %v9379_v26  ;;  %3354 = vmatprep.mubr.f32.mxu1 %v9379_v26  ;;  %9402 = vst [vmem:[#allocation104_spill] sm:$0xff] %v7550_v62  ;;  %9403 = vst [vmem:[#allocation109_spill] sm:$0xff] %v7553_v33  ;;  %v9408_v26 = vld [vmem:[#allocation9_spill] sm:$0xff] }
 0x602   :  { %9405 = vst [vmem:[#allocation105_spill] sm:$0xff] %v7559_v32  ;;  %v2380_v53 = vadd.f32 %v9408_v26, %v7323_v5  ;;  %v7577_v46 = vsub.f32 %v2455_v57, %v9404_v22  ;;  %v9411_v5 = vld [vmem:[#allocation23_spill] sm:$0xff] }
 0x603   :  { %3222 = vmatpush1.xpose.msra.mxu0 %v7419_v1  ;;  %3293 = vmatpush1.xpose.msra.mxu1 %v7423_v29  ;;  %v2378_v26 = vadd.f32 %v9411_v5, %v7343_v43  ;;  %v9429_v5 = vld [vmem:[#allocation26_spill] sm:$0xff] }
 0x604   :  { %3223 = vmatprep.subr.mxu0 %v7429_v3  ;;  %3294 = vmatprep.subr.mxu1 %v7433_v49 }
 0x607   :  { %3224 = vmatpush1.xpose.msra.mxu0 %v7457_v58  ;;  %3295 = vmatpush1.xpose.msra.mxu1 %v7461_v21 }
 0x608   :  { %3225 = vmatprep.subr.mxu0 %v7465_v45  ;;  %3296 = vmatprep.subr.mxu1 %v7469_v13  ;;  %v9415_v43 = vld [vmem:[#allocation104_spill] sm:$0xff] }
 0x60b   :  { %3226 = vmatpush1.xpose.msra.mxu0 %v7493_v15  ;;  %3297 = vmatpush1.xpose.msra.mxu1 %v7497_v12 }
 0x60c   :  { %3227 = vmatprep.subr.mxu0 %v7501_v24  ;;  %3298 = vmatprep.subr.mxu1 %v7505_v52 }
 0x60f   :  { %3228 = vmatpush1.xpose.msra.mxu0 %v7525_v28  ;;  %3299 = vmatpush1.xpose.msra.mxu1 %v7529_v54 }
 0x610   :  { %3229 = vmatprep.subr.mxu0 %v7532_v41  ;;  %3300 = vmatprep.subr.mxu1 %v7535_v60  ;;  %v2453_v60 = vadd.f32 %v9409_v37, %v7327_v38  ;;  %v7574_v41 = vsub.f32 %v2382_v0, %v9404_v22  ;;  %v9412_v37 = vld [vmem:[#allocation18_spill] sm:$0xff]  ;;  %v7594_v22 = vsub.f32 %v2378_v26, %v9410_v14 }
 0x611   :  { %v2451_v38 = vadd.f32 %v9412_v37, %v7347_v44  ;;  %v2985_v44 = vmul.f32 %v9415_v43, %v9415_v43 }
 0x613   :  { %3230 = vmatpush1.xpose.msra.mxu0 %v7550_v62  ;;  %3301 = vmatpush1.xpose.msra.mxu1 %v7553_v33  ;;  %v7580_v62 = vsub.f32 %v2380_v53, %v9410_v14  ;;  %v7583_v33 = vsub.f32 %v2453_v60, %v9410_v14 }
 0x614   :  { %3231 = vmatprep.subr.mxu0 %v7556_v56  ;;  %3302 = vmatprep.subr.mxu1 %v7559_v32  ;;  %v7597_v32 = vsub.f32 %v2451_v38, %v9410_v14 }
 0x617   :  { %3232 = vmatpush1.xpose.msra.mxu0 %v7574_v41  ;;  %3303 = vmatpush1.xpose.msra.mxu1 %v7577_v46 }
 0x618   :  { %3233 = vmatprep.subr.mxu0 %v7580_v62  ;;  %3304 = vmatprep.subr.mxu1 %v7583_v33 }
 0x61b   :  { %3234 = vmatpush1.xpose.msra.mxu0 %v7594_v22  ;;  %3305 = vmatpush1.xpose.msra.mxu1 %v7597_v32 }
 0x61c   :  { %3235 = vmatprep.subr.mxu0 %v7335_v61  ;;  %3306 = vmatprep.subr.mxu1 %v7339_v34  ;;  %v9414_v61 = vld [vmem:[#allocation108_spill] sm:$0xff] }
 0x61d   :  { %v2988_v34 = vmul.f32 %v9414_v61, %v9414_v61 }
 0x61f   :  { %3236 = vmatpush1.xpose.msra.mxu0 %v7363_v47  ;;  %3307 = vmatpush1.xpose.msra.mxu1 %v7367_v19  ;;  %v2970_v47 = vmul.f32 %v7556_v56, %v7556_v56  ;;  %v9417_v19 = vld [vmem:[#allocation105_spill] sm:$0xff] }
 0x620   :  { %3237 = vmatprep.subr.mxu0 %v7371_v50  ;;  %3308 = vmatprep.subr.mxu1 %v7375_v17  ;;  %v2972_v50 = vmul.f32 %v9417_v19, %v9417_v19  ;;  %v2969_v17 = vmul.f32 %v7574_v41, %v7574_v41  ;;  %v9421_v41 = vld [vmem:[#allocation87_spill] sm:$0xff] }
 0x623   :  { %3238 = vmatpush1.xpose.msra.mxu0 %v7399_v8  ;;  %3309 = vmatpush1.xpose.msra.mxu1 %v7403_v36  ;;  %v3018_v36 = vmul.f32 %v7465_v45, %v7465_v45  ;;  %v9420_v8 = vld [vmem:[#allocation14_spill] sm:$0xff] }
 0x624   :  { %3239 = vmatprep.subr.mxu0 %v7409_v10  ;;  %3310 = vmatprep.subr.mxu1 %v7413_v59  ;;  %v3002_v59 = vmul.f32 %v7501_v24, %v7501_v24  ;;  %v3001_v10 = vmul.f32 %v7525_v28, %v7525_v28  ;;  %v9425_v24 = vld [vmem:[#allocation103_spill] sm:$0xff] }
 0x627   :  { %3240 = vmatpush1.xpose.msra.mxu0 %v7437_v4  ;;  %3311 = vmatpush1.xpose.msra.mxu1 %v7441_v42  ;;  %v3019_v42 = vmul.f32 %v7497_v12, %v7497_v12  ;;  %v3004_v4 = vmul.f32 %v7505_v52, %v7505_v52  ;;  %v2955_v12 = vmul.f32 %v7597_v32, %v7597_v32  ;;  %v9428_v32 = vld [vmem:[#allocation16_spill] sm:$0xff] }
 0x628   :  { %3241 = vmatprep.subr.mxu0 %v7447_v23  ;;  %3312 = vmatprep.subr.mxu1 %v7451_v7  ;;  %v3066_v7 = vmul.f32 %v7355_v16, %v7355_v16  ;;  %v3035_v23 = vmul.f32 %v7461_v21, %v7461_v21  ;;  %v9416_v16 = vld [vmem:[#allocation109_spill] sm:$0xff]  ;;  %v9423_v21 = vld [vmem:[#allocation3_spill] sm:$0xff] }
 0x62b   :  { %3242 = vmatpush1.xpose.msra.mxu0 %v7473_v27  ;;  %3313 = vmatpush1.xpose.msra.mxu1 %v7477_v63  ;;  %v3036_v27 = vmul.f32 %v7433_v49, %v7433_v49  ;;  %v3033_v63 = vmul.f32 %v7457_v58, %v7457_v58  ;;  %v9422_v49 = vld [vmem:[#allocation81_spill] sm:$0xff] }
 0x62c   :  { %3243 = vmatprep.subr.mxu0 %v7483_v25  ;;  %3314 = vmatprep.subr.mxu1 %v7487_v55  ;;  %v3068_v25 = vmul.f32 %v7359_v11, %v7359_v11  ;;  %v3020_v55 = vmul.f32 %v7469_v13, %v7469_v13  ;;  %v2987_v11 = vmul.f32 %v9416_v16, %v9416_v16 }
 0x62f   :  { %3244 = vmatpush1.xpose.msra.mxu0 %v7509_v39  ;;  %3315 = vmatpush1.xpose.msra.mxu1 %v7513_v51  ;;  %v3065_v51 = vmul.f32 %v7381_v9, %v7381_v9  ;;  %v3017_v39 = vmul.f32 %v7493_v15, %v7493_v15  ;;  %v2971_v9 = vmul.f32 %v7577_v46, %v7577_v46 }
 0x630   :  { %3245 = vmatprep.subr.mxu0 %v2390_v30  ;;  %3316 = vmatprep.subr.mxu1 %v2463_v2  ;;  %v3067_v2 = vmul.f32 %v7385_v18, %v7385_v18  ;;  %v3051_v30 = vmul.f32 %v7423_v29, %v7423_v29  ;;  %v9418_v18 = vld [vmem:[#allocation12_spill] sm:$0xff]  ;;  %v2956_v29 = vmul.f32 %v7583_v33, %v7583_v33 }
 0x631   :  { %v2953_v15 = vmul.f32 %v7594_v22, %v7594_v22  ;;  %v9427_v33 = vld [vmem:[#allocation80_spill] sm:$0xff] }
 0x633   :  { %3246 = vmatpush1.xpose.msra.mxu0 %v2388_v20  ;;  %3317 = vmatpush1.xpose.msra.mxu1 %v2461_v31  ;;  %v3049_v20 = vmul.f32 %v7419_v1, %v7419_v1  ;;  %v2954_v1 = vmul.f32 %v7580_v62, %v7580_v62  ;;  %v9424_v62 = vld [vmem:[#allocation13_spill] sm:$0xff] }
 0x634   :  { %3247 = vmatprep.subr.mxu0 %v2384_v6  ;;  %3318 = vmatprep.subr.mxu1 %v2457_v40  ;;  %v3003_v40 = vmul.f32 %v7529_v54, %v7529_v54  ;;  %v9413_v6 = vld [vmem:[#allocation100_spill] sm:$0xff] }
 0x635   :  { %v2986_v31 = vmul.f32 %v9413_v6, %v9413_v6  ;;  %v9426_v54 = vld [vmem:[#allocation84_spill] sm:$0xff] }
 0x637   :  { %3248 = vmatpush1.xpose.msra.mxu0 %v2382_v0  ;;  %3319 = vmatpush1.xpose.msra.mxu1 %v2455_v57  ;;  %v3050_v57 = vmul.f32 %v7391_v35, %v7391_v35  ;;  %v3052_v0 = vmul.f32 %v7395_v48, %v7395_v48  ;;  %v9419_v35 = vld [vmem:[#allocation152_spill] sm:$0xff] }
 0x638   :  { %3249 = vmatprep.subr.mxu0 %v2380_v53  ;;  %3320 = vmatprep.subr.mxu1 %v2453_v60  ;;  %v3034_v53 = vmul.f32 %v7429_v3, %v7429_v3  ;;  %v7679_v48 = vrot.slane %v9419_v35, %v9418_v18  ;;  %v7683_v56 = vrot.slane %v9419_v35, %v9420_v8 }
 0x639   :  { %v7699_v45 = vrot.slane %v9419_v35, %v9423_v21  ;;  %v7703_v13 = vrot.slane %v9419_v35, %v9424_v62  ;;  %v9444_v35 = vld [vmem:[#allocation72_spill] sm:$0xff]  ;;  %v9446_v62 = vld [vmem:[#allocation94_spill] sm:$0xff] }
 0x63a   :  { %v7691_v3 = vadd.f32 %v9421_v41, %v7679_v48  ;;  %v7695_v58 = vadd.f32 %v9422_v49, %v7683_v56  ;;  %v7727_v22 = vadd.f32 %v9428_v32, %v7679_v48  ;;  %v7839_v8 = vadd.f32 %v9444_v35, %v7679_v48 }
 0x63b   :  { %3250 = vmatpush1.xpose.msra.mxu0 %v2378_v26  ;;  %3321 = vmatpush1.xpose.msra.mxu1 %v2451_v38  ;;  %v7719_v60 = vadd.f32 %v9426_v54, %v7699_v45  ;;  %v7723_v46 = vadd.f32 %v9427_v33, %v7703_v13  ;;  %v7731_v26 = vadd.f32 %v9429_v5, %v7683_v56  ;;  %v9448_v33 = vld [vmem:[#allocation67_spill] sm:$0xff]  ;;  %v9449_v5 = vld [vmem:[#allocation70_spill] sm:$0xff] }
 0x63c   :  { %3267 = vmatprep.subr.mxu0 %v3066_v7  ;;  %3338 = vmatprep.subr.mxu1 %v3068_v25  ;;  %v7711_v52 = vsub.f32 %v7691_v3, %v9425_v24  ;;  %v7715_v28 = vsub.f32 %v7695_v58, %v9425_v24  ;;  %v9430_v7 = vmov 1.0   ;;  %v9431_v25 = vld [vmem:[#allocation98_spill] sm:$0xff]  ;;  %v7869_v32 = vadd.f32 %v9448_v33, %v7703_v13 }
 0x63d   :  { %v7737_v37 = vsub.f32 %v7719_v60, %v9425_v24  ;;  %v7741_v38 = vsub.f32 %v7723_v46, %v9425_v24  ;;  %v9447_v24 = vld [vmem:[#allocation71_spill] sm:$0xff] }
 0x63e   :  { %v7865_v54 = vadd.f32 %v9447_v24, %v7699_v45 }
 0x63f   :  { %3268 = vmatpush2.xpose.msra.mxu0 %v3065_v51  ;;  %3339 = vmatpush2.xpose.msra.mxu1 %v3067_v2  ;;  %v7747_v51 = vsub.f32 %v7727_v22, %v9431_v25  ;;  %v7751_v2 = vsub.f32 %v7731_v26, %v9431_v25 }
 0x640   :  { %3269 = vmatprep.subr.mxu0 %v3050_v57  ;;  %3340 = vmatprep.subr.mxu1 %v3052_v0  ;;  %v9432_v57 = vld [vmem:[#allocation15_spill] sm:$0xff] }
 0x641   :  { %v7755_v0 = vadd.f32 %v9432_v57, %v7699_v45  ;;  %v9450_v57 = vld [vmem:[#allocation66_spill] sm:$0xff] }
 0x643   :  { %3270 = vmatpush2.xpose.msra.mxu0 %v3049_v20  ;;  %3341 = vmatpush2.xpose.msra.mxu1 %v3051_v30  ;;  %v9433_v20 = vld [vmem:[#allocation21_spill] sm:$0xff] }
 0x644   :  { %3271 = vmatprep.subr.mxu0 %v3034_v53  ;;  %3342 = vmatprep.subr.mxu1 %v3036_v27  ;;  %v7759_v30 = vadd.f32 %v9433_v20, %v7703_v13  ;;  %v9434_v53 = vld [vmem:[#allocation17_spill] sm:$0xff]  ;;  %v2609_v20 = vadd.f32 %v9450_v57, %v7683_v56 }
 0x645   :  { %v7765_v27 = vadd.f32 %v9434_v53, %v7679_v48  ;;  %v7881_v53 = vsub.f32 %v7865_v54, %v9446_v62 }
 0x647   :  { %3272 = vmatpush2.xpose.msra.mxu0 %v3033_v63  ;;  %3343 = vmatpush2.xpose.msra.mxu1 %v3035_v23  ;;  %v9435_v63 = vld [vmem:[#allocation76_spill] sm:$0xff] }
 0x648   :  { %3273 = vmatprep.subr.mxu0 %v3018_v36  ;;  %3344 = vmatprep.subr.mxu1 %v3020_v55  ;;  %v7769_v23 = vadd.f32 %v9435_v63, %v7683_v56  ;;  %v7775_v36 = vsub.f32 %v7755_v0, %v9431_v25  ;;  %v7779_v55 = vsub.f32 %v7759_v30, %v9431_v25 }
 0x649   :  { %v2536_v25 = vadd.f32 %v9449_v5, %v7679_v48  ;;  %v7885_v63 = vsub.f32 %v7869_v32, %v9446_v62  ;;  %v9460_v5 = vld [vmem:[#allocation137_spill] sm:$0xff] }
 0x64b   :  { %3274 = vmatpush2.xpose.msra.mxu0 %v3017_v39  ;;  %3345 = vmatpush2.xpose.msra.mxu1 %v3019_v42  ;;  %v9436_v39 = vld [vmem:[#allocation111_spill] sm:$0xff]  ;;  %9451 = vst [vmem:[#allocation110_spill] sm:$0xff] %v7885_v63 }
 0x64c   :  { %3275 = vmatprep.subr.mxu0 %v3002_v59  ;;  %3346 = vmatprep.subr.mxu1 %v3004_v4  ;;  %v7785_v42 = vsub.f32 %v7765_v27, %v9436_v39  ;;  %v7789_v59 = vsub.f32 %v7769_v23, %v9436_v39  ;;  %v9437_v4 = vld [vmem:[#allocation79_spill] sm:$0xff] }
 0x64f   :  { %3276 = vmatpush2.xpose.msra.mxu0 %v3001_v10  ;;  %3347 = vmatpush2.xpose.msra.mxu1 %v3003_v40  ;;  %v7793_v10 = vadd.f32 %v9437_v4, %v7699_v45  ;;  %v9438_v40 = vld [vmem:[#allocation75_spill] sm:$0xff] }
 0x650   :  { %3277 = vmatprep.subr.mxu0 %v2986_v31  ;;  %3348 = vmatprep.subr.mxu1 %v2988_v34  ;;  %v7797_v6 = vadd.f32 %v9438_v40, %v7703_v13  ;;  %v9439_v31 = vld [vmem:[#allocation78_spill] sm:$0xff] }
 0x651   :  { %v7803_v61 = vadd.f32 %v9439_v31, %v7679_v48  ;;  %v9440_v34 = vld [vmem:[#allocation74_spill] sm:$0xff]  ;;  %v9455_v31 = vld [vmem:[#allocation68_spill] sm:$0xff] }
 0x652   :  { %v7807_v43 = vadd.f32 %v9440_v34, %v7683_v56  ;;  %v7817_v16 = vsub.f32 %v7797_v6, %v9436_v39  ;;  %v2534_v34 = vadd.f32 %v9455_v31, %v7699_v45 }
 0x653   :  { %3278 = vmatpush2.xpose.msra.mxu0 %v2985_v44  ;;  %3349 = vmatpush2.xpose.msra.mxu1 %v2987_v11  ;;  %v7813_v44 = vsub.f32 %v7793_v10, %v9436_v39  ;;  %v9441_v11 = vld [vmem:[#allocation114_spill] sm:$0xff]  ;;  %v9452_v39 = vld [vmem:[#allocation129_spill] sm:$0xff] }
 0x654   :  { %3279 = vmatprep.subr.mxu0 %v2970_v47  ;;  %3350 = vmatprep.subr.mxu1 %v2972_v50  ;;  %v7821_v47 = vsub.f32 %v7803_v61, %v9441_v11  ;;  %v7825_v19 = vsub.f32 %v7807_v43, %v9441_v11  ;;  %v9442_v50 = vld [vmem:[#allocation77_spill] sm:$0xff]  ;;  %v7888_v4 = vsub.f32 %v2536_v25, %v9452_v39 }
 0x655   :  { %v7891_v40 = vsub.f32 %v2609_v20, %v9452_v39  ;;  %v7906_v24 = vsub.f32 %v2534_v34, %v9452_v39 }
 0x656   :  { %9453 = vst [vmem:[#allocation112_spill] sm:$0xff] %v7888_v4 }
 0x657   :  { %3280 = vmatpush2.xpose.msra.mxu0 %v2969_v17  ;;  %3351 = vmatpush2.xpose.msra.mxu1 %v2971_v9  ;;  %v7829_v17 = vadd.f32 %v9442_v50, %v7699_v45  ;;  %v9443_v9 = vld [vmem:[#allocation73_spill] sm:$0xff]  ;;  %9454 = vst [vmem:[#allocation53_spill] sm:$0xff] %v7891_v40 }
 0x658   :  { %3281 = vmatprep.subr.mxu0 %v2954_v1  ;;  %3352 = vmatprep.subr.mxu1 %v2956_v29  ;;  %v7833_v18 = vadd.f32 %v9443_v9, %v7703_v13  ;;  %v9445_v1 = vld [vmem:[#allocation69_spill] sm:$0xff] }
 0x659   :  { %v7843_v29 = vadd.f32 %v9445_v1, %v7683_v56  ;;  %v7849_v41 = vsub.f32 %v7829_v17, %v9441_v11  ;;  %v9457_v9 = vld [vmem:[#allocation65_spill] sm:$0xff]  ;;  %v9458_v1 = vld [vmem:[#allocation60_spill] sm:$0xff] }
 0x65a   :  { %v7853_v49 = vsub.f32 %v7833_v18, %v9441_v11  ;;  %v9456_v11 = vld [vmem:[#allocation63_spill] sm:$0xff]  ;;  %v2530_v35 = vadd.f32 %v9457_v9, %v7679_v48 }
 0x65b   :  { %3282 = vmatpush2.xpose.msra.mxu0 %v2953_v15  ;;  %3353 = vmatpush2.xpose.msra.mxu1 %v2955_v12  ;;  %v7857_v15 = vsub.f32 %v7839_v8, %v9446_v62  ;;  %v7861_v12 = vsub.f32 %v7843_v29, %v9446_v62  ;;  %v2607_v50 = vadd.f32 %v9456_v11, %v7703_v13  ;;  %v9462_v11 = vld [vmem:[#allocation62_spill] sm:$0xff] }
 0x65c   :  { %3361 = vmatprep.subr.mxu0 %v7711_v52  ;;  %3432 = vmatprep.subr.mxu1 %v7715_v28  ;;  %v2603_v62 = vadd.f32 %v9458_v1, %v7683_v56  ;;  %v7912_v57 = vsub.f32 %v2530_v35, %v9460_v5  ;;  %v2528_v9 = vadd.f32 %v9462_v11, %v7699_v45  ;;  %v9463_v1 = vld [vmem:[#allocation58_spill] sm:$0xff] }
 0x65d   :  { %v7909_v33 = vsub.f32 %v2607_v50, %v9452_v39  ;;  %v2601_v21 = vadd.f32 %v9463_v1, %v7703_v13 }
 0x65e   :  { %3284 = vmatmul.mubr.f32.vlgmr.msra.gmra.mxu0 %v9430_v7  ;;  %3355 = vmatmul.mubr.f32.vlgmr.msra.gmra.mxu1 %v9430_v7  ;;  %v7915_v31 = vsub.f32 %v2603_v62, %v9460_v5 }
 0x65f   :  { %3362 = vmatpush1.xpose.msra.mxu0 %v7737_v37  ;;  %3433 = vmatpush1.xpose.msra.mxu1 %v7741_v38  ;;  %9459 = vst [vmem:[#allocation64_spill] sm:$0xff] %v7909_v33  ;;  %v7933_v11 = vsub.f32 %v2601_v21, %v9460_v5 }
 0x660   :  { %3363 = vmatprep.subr.mxu0 %v7747_v51  ;;  %3434 = vmatprep.subr.mxu1 %v7751_v2  ;;  %9461 = vst [vmem:[#allocation113_spill] sm:$0xff] %v7915_v31 }
 0x661   :  { %3425 = vmatprep.mubr.f32.mxu0 %v9430_v7  ;;  %3496 = vmatprep.mubr.f32.mxu1 %v9430_v7  ;;  %v9464_v7 = vld [vmem:[#allocation61_spill] sm:$0xff] }
 0x662   :  { %v2526_v39 = vadd.f32 %v9464_v7, %v7679_v48  ;;  %v9466_v48 = vld [vmem:[#allocation59_spill] sm:$0xff] }
 0x663   :  { %3364 = vmatpush1.xpose.msra.mxu0 %v7775_v36  ;;  %3435 = vmatpush1.xpose.msra.mxu1 %v7779_v55  ;;  %v2524_v7 = vadd.f32 %v9466_v48, %v7699_v45  ;;  %v3069_v45 = vmul.f32 %v7737_v37, %v7737_v37  ;;  %v3039_v37 = vmul.f32 %v7817_v16, %v7817_v16  ;;  %v9495_v48 = vld [vmem:[#allocation96_spill] sm:$0xff] }
 0x664   :  { %3365 = vmatprep.subr.mxu0 %v7785_v42  ;;  %3436 = vmatprep.subr.mxu1 %v7789_v59  ;;  %v7936_v1 = vsub.f32 %v2526_v39, %v9410_v14 }
 0x667   :  { %3366 = vmatpush1.xpose.msra.mxu0 %v7813_v44  ;;  %3437 = vmatpush1.xpose.msra.mxu1 %v7817_v16  ;;  %v2974_v16 = vmul.f32 %v7912_v57, %v7912_v57 }
 0x668   :  { %3367 = vmatprep.subr.mxu0 %v7821_v47  ;;  %3438 = vmatprep.subr.mxu1 %v7825_v19 }
 0x66b   :  { %3368 = vmatpush1.xpose.msra.mxu0 %v7849_v41  ;;  %3439 = vmatpush1.xpose.msra.mxu1 %v7853_v49 }
 0x66c   :  { %3369 = vmatprep.subr.mxu0 %v7857_v15  ;;  %3440 = vmatprep.subr.mxu1 %v7861_v12 }
 0x66f   :  { %3370 = vmatpush1.xpose.msra.mxu0 %v7881_v53  ;;  %3441 = vmatpush1.xpose.msra.mxu1 %v7885_v63  ;;  %v7930_v63 = vsub.f32 %v2528_v9, %v9460_v5  ;;  %v7950_v5 = vsub.f32 %v2524_v7, %v9410_v14 }
 0x670   :  { %3371 = vmatprep.subr.mxu0 %v7888_v4  ;;  %3442 = vmatprep.subr.mxu1 %v7891_v40  ;;  %v9465_v40 = vld [vmem:[#allocation55_spill] sm:$0xff] }
 0x671   :  { %v2599_v4 = vadd.f32 %v9465_v40, %v7683_v56  ;;  %v9467_v56 = vld [vmem:[#allocation54_spill] sm:$0xff] }
 0x672   :  { %v2597_v40 = vadd.f32 %v9467_v56, %v7703_v13  ;;  %v3071_v13 = vmul.f32 %v7741_v38, %v7741_v38  ;;  %v3022_v38 = vmul.f32 %v7821_v47, %v7821_v47  ;;  %v9472_v47 = vld [vmem:[#allocation113_spill] sm:$0xff]  ;;  %v9496_v56 = vld [vmem:[#allocation47_spill] sm:$0xff] }
 0x673   :  { %3372 = vmatpush1.xpose.msra.mxu0 %v7906_v24  ;;  %3443 = vmatpush1.xpose.msra.mxu1 %v7909_v33  ;;  %v7939_v33 = vsub.f32 %v2599_v4, %v9410_v14 }
 0x674   :  { %3373 = vmatprep.subr.mxu0 %v7912_v57  ;;  %3444 = vmatprep.subr.mxu1 %v7915_v31  ;;  %v7953_v31 = vsub.f32 %v2597_v40, %v9410_v14  ;;  %v9489_v57 = vld [vmem:[#allocation193_spill] sm:$0xff] }
 0x677   :  { %3374 = vmatpush1.xpose.msra.mxu0 %v7930_v63  ;;  %3445 = vmatpush1.xpose.msra.mxu1 %v7933_v11 }
 0x678   :  { %3375 = vmatprep.subr.mxu0 %v7936_v1  ;;  %3446 = vmatprep.subr.mxu1 %v7939_v33 }
 0x67b   :  { %3376 = vmatpush1.xpose.msra.mxu0 %v7950_v5  ;;  %3447 = vmatpush1.xpose.msra.mxu1 %v7953_v31 }
 0x67c   :  { %3377 = vmatprep.subr.mxu0 %v7691_v3  ;;  %3448 = vmatprep.subr.mxu1 %v7695_v58  ;;  %v3070_v3 = vmul.f32 %v7711_v52, %v7711_v52  ;;  %v3072_v58 = vmul.f32 %v7715_v28, %v7715_v28  ;;  %v3053_v52 = vmul.f32 %v7775_v36, %v7775_v36  ;;  %v9468_v36 = vld [vmem:[#allocation110_spill] sm:$0xff] }
 0x67d   :  { %v3055_v28 = vmul.f32 %v7779_v55, %v7779_v55  ;;  %v3007_v55 = vmul.f32 %v9468_v36, %v9468_v36 }
 0x67f   :  { %3378 = vmatpush1.xpose.msra.mxu0 %v7719_v60  ;;  %3449 = vmatpush1.xpose.msra.mxu1 %v7723_v46  ;;  %v3056_v60 = vmul.f32 %v7751_v2, %v7751_v2  ;;  %v3038_v46 = vmul.f32 %v7785_v42, %v7785_v42  ;;  %v3021_v2 = vmul.f32 %v7849_v41, %v7849_v41  ;;  %v9469_v42 = vld [vmem:[#allocation112_spill] sm:$0xff] }
 0x680   :  { %3379 = vmatprep.subr.mxu0 %v7727_v22  ;;  %3450 = vmatprep.subr.mxu1 %v7731_v26  ;;  %v3040_v22 = vmul.f32 %v7789_v59, %v7789_v59  ;;  %v3037_v26 = vmul.f32 %v7813_v44, %v7813_v44  ;;  %v2990_v59 = vmul.f32 %v9469_v42, %v9469_v42 }
 0x681   :  { %v2957_v41 = vmul.f32 %v7950_v5, %v7950_v5  ;;  %v9488_v5 = vld [vmem:[#allocation192_spill] sm:$0xff] }
 0x683   :  { %3380 = vmatpush1.xpose.msra.mxu0 %v7755_v0  ;;  %3451 = vmatpush1.xpose.msra.mxu1 %v7759_v30  ;;  %v3023_v0 = vmul.f32 %v7853_v49, %v7853_v49  ;;  %v3006_v30 = vmul.f32 %v7857_v15, %v7857_v15  ;;  %v2959_v49 = vmul.f32 %v7953_v31, %v7953_v31  ;;  %v9473_v15 = vld [vmem:[#allocation178_spill] sm:$0xff] }
 0x684   :  { %3381 = vmatprep.subr.mxu0 %v7765_v27  ;;  %3452 = vmatprep.subr.mxu1 %v7769_v23  ;;  %v3008_v27 = vmul.f32 %v7861_v12, %v7861_v12  ;;  %v3005_v23 = vmul.f32 %v7881_v53, %v7881_v53  ;;  %v9474_v12 = vld [vmem:[#allocation179_spill] sm:$0xff]  ;;  %v9490_v31 = vld [vmem:[#allocation194_spill] sm:$0xff] }
 0x685   :  { %v9479_v53 = vld [vmem:[#allocation183_spill] sm:$0xff] }
 0x687   :  { %3382 = vmatpush1.xpose.msra.mxu0 %v7793_v10  ;;  %3453 = vmatpush1.xpose.msra.mxu1 %v7797_v6  ;;  %v9470_v10 = vld [vmem:[#allocation53_spill] sm:$0xff] }
 0x688   :  { %3383 = vmatprep.subr.mxu0 %v7803_v61  ;;  %3454 = vmatprep.subr.mxu1 %v7807_v43  ;;  %v2992_v6 = vmul.f32 %v9470_v10, %v9470_v10  ;;  %v2989_v61 = vmul.f32 %v7906_v24, %v7906_v24  ;;  %v9471_v43 = vld [vmem:[#allocation64_spill] sm:$0xff]  ;;  %v9486_v24 = vld [vmem:[#allocation190_spill] sm:$0xff] }
 0x689   :  { %v2991_v44 = vmul.f32 %v9471_v43, %v9471_v43 }
 0x68b   :  { %3384 = vmatpush1.xpose.msra.mxu0 %v7829_v17  ;;  %3455 = vmatpush1.xpose.msra.mxu1 %v7833_v18  ;;  %v2973_v17 = vmul.f32 %v7930_v63, %v7930_v63  ;;  %v2975_v18 = vmul.f32 %v7933_v11, %v7933_v11  ;;  %v9480_v63 = vld [vmem:[#allocation184_spill] sm:$0xff]  ;;  %v9493_v11 = vld [vmem:[#allocation197_spill] sm:$0xff] }
 0x68c   :  { %3385 = vmatprep.subr.mxu0 %v7839_v8  ;;  %3456 = vmatprep.subr.mxu1 %v7843_v29  ;;  %v2958_v8 = vmul.f32 %v7936_v1, %v7936_v1  ;;  %v2960_v29 = vmul.f32 %v7939_v33, %v7939_v33  ;;  %v9487_v33 = vld [vmem:[#allocation191_spill] sm:$0xff]  ;;  %v9494_v1 = vld [vmem:[#allocation46_spill] sm:$0xff] }
 0x68f   :  { %3386 = vmatpush1.xpose.msra.mxu0 %v7865_v54  ;;  %3457 = vmatpush1.xpose.msra.mxu1 %v7869_v32  ;;  %v9475_v54 = vmov 1.0   ;;  %v9476_v32 = vld [vmem:[#allocation180_spill] sm:$0xff] }
 0x690   :  { %3387 = vmatprep.subr.mxu0 %v2536_v25  ;;  %3458 = vmatprep.subr.mxu1 %v2609_v20  ;;  %v9477_v25 = vld [vmem:[#allocation181_spill] sm:$0xff]  ;;  %v9478_v20 = vld [vmem:[#allocation182_spill] sm:$0xff] }
 0x693   :  { %3388 = vmatpush1.xpose.msra.mxu0 %v2534_v34  ;;  %3459 = vmatpush1.xpose.msra.mxu1 %v2607_v50  ;;  %v9482_v34 = vld [vmem:[#allocation186_spill] sm:$0xff]  ;;  %v9483_v50 = vld [vmem:[#allocation187_spill] sm:$0xff] }
 0x694   :  { %3389 = vmatprep.subr.mxu0 %v2530_v35  ;;  %3460 = vmatprep.subr.mxu1 %v2603_v62  ;;  %v9484_v35 = vld [vmem:[#allocation188_spill] sm:$0xff]  ;;  %v9485_v62 = vld [vmem:[#allocation189_spill] sm:$0xff] }
 0x697   :  { %3390 = vmatpush1.xpose.msra.mxu0 %v2528_v9  ;;  %3461 = vmatpush1.xpose.msra.mxu1 %v2601_v21  ;;  %v3054_v21 = vmul.f32 %v7747_v51, %v7747_v51  ;;  %v3024_v51 = vmul.f32 %v7825_v19, %v7825_v19  ;;  %v2976_v19 = vmul.f32 %v9472_v47, %v9472_v47  ;;  %v9491_v9 = vld [vmem:[#allocation195_spill] sm:$0xff]  ;;  %v9512_v47 = vld [vmem:[#allocation172_spill] sm:$0xff] }
 0x698   :  { %3391 = vmatprep.subr.mxu0 %v2526_v39  ;;  %3462 = vmatprep.subr.mxu1 %v2599_v4  ;;  %v9481_v4 = vld [vmem:[#allocation185_spill] sm:$0xff]  ;;  %v9492_v39 = vld [vmem:[#allocation196_spill] sm:$0xff] }
 0x69b   :  { %3392 = vmatpush1.xpose.msra.mxu0 %v2524_v7  ;;  %3463 = vmatpush1.xpose.msra.mxu1 %v2597_v40  ;;  %v2676_v7 = vadd.f32 %v9495_v48, %v9494_v1  ;;  %v9497_v40 = vld [vmem:[#allocation91_spill] sm:$0xff] }
 0x69c   :  { %3409 = vmatprep.subr.mxu0 %v3070_v3  ;;  %3480 = vmatprep.subr.mxu1 %v3072_v58  ;;  %v2749_v3 = vadd.f32 %v9497_v40, %v9496_v56  ;;  %v9498_v58 = vld [vmem:[#allocation198_spill] sm:$0xff]  ;;  %v9522_v48 = vld [vmem:[#allocation167_spill] sm:$0xff]  ;;  %v9524_v40 = vld [vmem:[#allocation165_spill] sm:$0xff] }
 0x69f   :  { %3410 = vmatpush2.xpose.msra.mxu0 %v3069_v45  ;;  %3481 = vmatpush2.xpose.msra.mxu1 %v3071_v13  ;;  %v9499_v45 = vld [vmem:[#allocation199_spill] sm:$0xff]  ;;  %v9500_v13 = vld [vmem:[#allocation137_spill] sm:$0xff] }
 0x6a0   :  { %3411 = vmatprep.subr.mxu0 %v3054_v21  ;;  %3482 = vmatprep.subr.mxu1 %v3056_v60  ;;  %v8072_v21 = vsub.f32 %v2676_v7, %v9500_v13  ;;  %v8075_v60 = vsub.f32 %v2749_v3, %v9500_v13 }
 0x6a3   :  { %3412 = vmatpush2.xpose.msra.mxu0 %v3053_v52  ;;  %3483 = vmatpush2.xpose.msra.mxu1 %v3055_v28  ;;  %v9501_v52 = vld [vmem:[#allocation48_spill] sm:$0xff] }
 0x6a4   :  { %3413 = vmatprep.subr.mxu0 %v3038_v46  ;;  %3484 = vmatprep.subr.mxu1 %v3040_v22  ;;  %v9502_v28 = vld [vmem:[#allocation92_spill] sm:$0xff]  ;;  %v9503_v22 = vld [vmem:[#allocation153_spill] sm:$0xff] }
 0x6a5   :  { %v2674_v46 = vadd.f32 %v9502_v28, %v9501_v52  ;;  %v9527_v28 = vld [vmem:[#allocation160_spill] sm:$0xff] }
 0x6a7   :  { %3414 = vmatpush2.xpose.msra.mxu0 %v3037_v26  ;;  %3485 = vmatpush2.xpose.msra.mxu1 %v3039_v37  ;;  %v9504_v26 = vld [vmem:[#allocation88_spill] sm:$0xff] }
 0x6a8   :  { %3415 = vmatprep.subr.mxu0 %v3022_v38  ;;  %3486 = vmatprep.subr.mxu1 %v3024_v51  ;;  %v2747_v37 = vadd.f32 %v9504_v26, %v9503_v22  ;;  %v9505_v38 = vld [vmem:[#allocation200_spill] sm:$0xff]  ;;  %v9506_v51 = vld [vmem:[#allocation201_spill] sm:$0xff]  ;;  %v9529_v26 = vld [vmem:[#allocation158_spill] sm:$0xff] }
 0x6aa   :  { %v8093_v36 = vsub.f32 %v2747_v37, %v9500_v13 }
 0x6ab   :  { %3416 = vmatpush2.xpose.msra.mxu0 %v3021_v2  ;;  %3487 = vmatpush2.xpose.msra.mxu1 %v3023_v0  ;;  %v9507_v2 = vld [vmem:[#allocation90_spill] sm:$0xff] }
 0x6ac   :  { %3417 = vmatprep.subr.mxu0 %v3006_v30  ;;  %3488 = vmatprep.subr.mxu1 %v3008_v27  ;;  %v2672_v0 = vadd.f32 %v9507_v2, %v9494_v1  ;;  %v9508_v30 = vld [vmem:[#allocation86_spill] sm:$0xff]  ;;  %v9530_v2 = vld [vmem:[#allocation159_spill] sm:$0xff] }
 0x6ad   :  { %v2745_v27 = vadd.f32 %v9508_v30, %v9496_v56  ;;  %v9521_v1 = vld [vmem:[#allocation166_spill] sm:$0xff]  ;;  %v9523_v56 = vld [vmem:[#allocation164_spill] sm:$0xff] }
 0x6ae   :  { %v9531_v30 = vld [vmem:[#allocation156_spill] sm:$0xff] }
 0x6af   :  { %3418 = vmatpush2.xpose.msra.mxu0 %v3005_v23  ;;  %3489 = vmatpush2.xpose.msra.mxu1 %v3007_v55  ;;  %v8090_v23 = vsub.f32 %v2674_v46, %v9500_v13  ;;  %v8096_v55 = vsub.f32 %v2672_v0, %v9410_v14  ;;  %v8099_v42 = vsub.f32 %v2745_v27, %v9410_v14  ;;  %v9525_v13 = vld [vmem:[#allocation162_spill] sm:$0xff] }
 0x6b0   :  { %3419 = vmatprep.subr.mxu0 %v2990_v59  ;;  %3490 = vmatprep.subr.mxu1 %v2992_v6  ;;  %v9509_v59 = vld [vmem:[#allocation89_spill] sm:$0xff] }
 0x6b1   :  { %v2670_v10 = vadd.f32 %v9509_v59, %v9501_v52  ;;  %v9510_v6 = vld [vmem:[#allocation85_spill] sm:$0xff]  ;;  %v9526_v52 = vld [vmem:[#allocation163_spill] sm:$0xff] }
 0x6b2   :  { %v9532_v59 = vld [vmem:[#allocation157_spill] sm:$0xff] }
 0x6b3   :  { %3420 = vmatpush2.xpose.msra.mxu0 %v2989_v61  ;;  %3491 = vmatpush2.xpose.msra.mxu1 %v2991_v44  ;;  %v2743_v61 = vadd.f32 %v9510_v6, %v9503_v22  ;;  %v8110_v43 = vsub.f32 %v2670_v10, %v9410_v14  ;;  %v9528_v22 = vld [vmem:[#allocation161_spill] sm:$0xff]  ;;  %v9533_v6 = vld [vmem:[#allocation154_spill] sm:$0xff] }
 0x6b4   :  { %3421 = vmatprep.subr.mxu0 %v2974_v16  ;;  %3492 = vmatprep.subr.mxu1 %v2976_v19  ;;  %v9511_v16 = vld [vmem:[#allocation171_spill] sm:$0xff]  ;;  %v9513_v19 = vld [vmem:[#allocation170_spill] sm:$0xff] }
 0x6b5   :  { %v8113_v44 = vsub.f32 %v2743_v61, %v9410_v14  ;;  %v9518_v14 = vld [vmem:[#allocation177_spill] sm:$0xff] }
 0x6b7   :  { %3422 = vmatpush2.xpose.msra.mxu0 %v2973_v17  ;;  %3493 = vmatpush2.xpose.msra.mxu1 %v2975_v18  ;;  %v9514_v17 = vld [vmem:[#allocation176_spill] sm:$0xff]  ;;  %v9515_v18 = vld [vmem:[#allocation174_spill] sm:$0xff] }
 0x6b8   :  { %3423 = vmatprep.subr.mxu0 %v2958_v8  ;;  %3494 = vmatprep.subr.mxu1 %v2960_v29  ;;  %v9516_v8 = vld [vmem:[#allocation175_spill] sm:$0xff]  ;;  %v9517_v29 = vld [vmem:[#allocation173_spill] sm:$0xff] }
 0x6bb   :  { %3424 = vmatpush2.xpose.msra.mxu0 %v2957_v41  ;;  %3495 = vmatpush2.xpose.msra.mxu1 %v2959_v49  ;;  %v9519_v41 = vld [vmem:[#allocation168_spill] sm:$0xff]  ;;  %v9520_v49 = vld [vmem:[#allocation169_spill] sm:$0xff] }
 0x6bc   :  { %3503 = vmatprep.subr.mxu0 %v9473_v15  ;;  %3574 = vmatprep.subr.mxu1 %v9474_v12 }
 0x6be   :  { %3426 = vmatmul.mubr.f32.vlgmr.msra.gmra.mxu0 %v9475_v54  ;;  %3497 = vmatmul.mubr.f32.vlgmr.msra.gmra.mxu1 %v9475_v54 }
 0x6bf   :  { %3504 = vmatpush1.xpose.msra.mxu0 %v9476_v32  ;;  %3575 = vmatpush1.xpose.msra.mxu1 %v9477_v25 }
 0x6c0   :  { %3505 = vmatprep.subr.mxu0 %v9478_v20  ;;  %3576 = vmatprep.subr.mxu1 %v9479_v53 }
 0x6c1   :  { %3567 = vmatprep.mubr.f32.mxu0 %v9475_v54  ;;  %3638 = vmatprep.mubr.f32.mxu1 %v9475_v54 }
 0x6c3   :  { %3506 = vmatpush1.xpose.msra.mxu0 %v9480_v63  ;;  %3577 = vmatpush1.xpose.msra.mxu1 %v9481_v4 }
 0x6c4   :  { %3507 = vmatprep.subr.mxu0 %v9482_v34  ;;  %3578 = vmatprep.subr.mxu1 %v9483_v50 }
 0x6c7   :  { %3508 = vmatpush1.xpose.msra.mxu0 %v9484_v35  ;;  %3579 = vmatpush1.xpose.msra.mxu1 %v9485_v62 }
 0x6c8   :  { %3509 = vmatprep.subr.mxu0 %v9486_v24  ;;  %3580 = vmatprep.subr.mxu1 %v9487_v33 }
 0x6cb   :  { %3510 = vmatpush1.xpose.msra.mxu0 %v9488_v5  ;;  %3581 = vmatpush1.xpose.msra.mxu1 %v9489_v57 }
 0x6cc   :  { %3511 = vmatprep.subr.mxu0 %v9490_v31  ;;  %3582 = vmatprep.subr.mxu1 %v9491_v9 }
 0x6cf   :  { %3512 = vmatpush1.xpose.msra.mxu0 %v9492_v39  ;;  %3583 = vmatpush1.xpose.msra.mxu1 %v9493_v11 }
 0x6d0   :  { %3513 = vmatprep.subr.mxu0 %v9498_v58  ;;  %3584 = vmatprep.subr.mxu1 %v9499_v45 }
 0x6d3   :  { %3514 = vmatpush1.xpose.msra.mxu0 %v9505_v38  ;;  %3585 = vmatpush1.xpose.msra.mxu1 %v9506_v51 }
 0x6d4   :  { %3515 = vmatprep.subr.mxu0 %v8072_v21  ;;  %3586 = vmatprep.subr.mxu1 %v8075_v60 }
 0x6d7   :  { %3516 = vmatpush1.xpose.msra.mxu0 %v8090_v23  ;;  %3587 = vmatpush1.xpose.msra.mxu1 %v8093_v36 }
 0x6d8   :  { %3517 = vmatprep.subr.mxu0 %v8096_v55  ;;  %3588 = vmatprep.subr.mxu1 %v8099_v42 }
 0x6db   :  { %3518 = vmatpush1.xpose.msra.mxu0 %v8110_v43  ;;  %3589 = vmatpush1.xpose.msra.mxu1 %v8113_v44 }
 0x6dc   :  { %3519 = vmatprep.subr.mxu0 %v9511_v16  ;;  %3590 = vmatprep.subr.mxu1 %v9512_v47  ;;  %v9534_v16 = vld [vmem:[#allocation155_spill] sm:$0xff]  ;;  %v3074_v47 = vmul.f32 %v9473_v15, %v9473_v15  ;;  %v3057_v15 = vmul.f32 %v9480_v63, %v9480_v63  ;;  %v3026_v63 = vmul.f32 %v9486_v24, %v9486_v24 }
 0x6dd   :  { %v3009_v24 = vmul.f32 %v9492_v39, %v9492_v39  ;;  %v2978_v39 = vmul.f32 %v8072_v21, %v8072_v21  ;;  %v2961_v21 = vmul.f32 %v8110_v43, %v8110_v43  ;;  %v9543_v43 = vld [vmem:[#allocation120_spill] sm:$0xff] }
 0x6df   :  { %3520 = vmatpush1.xpose.msra.mxu0 %v9513_v19  ;;  %3591 = vmatpush1.xpose.msra.mxu1 %v9514_v17  ;;  %v3076_v19 = vmul.f32 %v9474_v12, %v9474_v12  ;;  %v3073_v17 = vmul.f32 %v9476_v32, %v9476_v32  ;;  %v3059_v12 = vmul.f32 %v9481_v4, %v9481_v4 }
 0x6e0   :  { %3521 = vmatprep.subr.mxu0 %v9515_v18  ;;  %3592 = vmatprep.subr.mxu1 %v9516_v8  ;;  %v3042_v32 = vmul.f32 %v9482_v34, %v9482_v34  ;;  %v3028_v4 = vmul.f32 %v9487_v33, %v9487_v33  ;;  %v3025_v34 = vmul.f32 %v9488_v5, %v9488_v5  ;;  %v9541_v18 = vld [vmem:[#allocation82_spill] sm:$0xff] }
 0x6e1   :  { %v3011_v33 = vmul.f32 %v9493_v11, %v9493_v11  ;;  %v2994_v5 = vmul.f32 %v9498_v58, %v9498_v58  ;;  %v2980_v11 = vmul.f32 %v8075_v60, %v8075_v60  ;;  %v2977_v58 = vmul.f32 %v8090_v23, %v8090_v23  ;;  %v9537_v23 = vld [vmem:[#allocation102_spill] sm:$0xff] }
 0x6e2   :  { %v2963_v60 = vmul.f32 %v8113_v44, %v8113_v44  ;;  %v9542_v8 = vld [vmem:[#allocation42_spill] sm:$0xff]  ;;  %v9544_v44 = vld [vmem:[#allocation107_spill] sm:$0xff] }
 0x6e3   :  { %3522 = vmatpush1.xpose.msra.mxu0 %v9517_v29  ;;  %3593 = vmatpush1.xpose.msra.mxu1 %v9518_v14  ;;  %v3788_v29 = vpack.c.bf16 %v9542_v8, %v9541_v18  ;;  %v3785_v14 = vpack.c.bf16 %v9544_v44, %v9543_v43 }
 0x6e4   :  { %3523 = vmatprep.subr.mxu0 %v9519_v41  ;;  %3594 = vmatprep.subr.mxu1 %v9520_v49  ;;  %v9545_v41 = vld [vmem:[#allocation116_spill] sm:$0xff] }
 0x6e5   :  { %v9546_v49 = vld [vmem:[#allocation52_spill] sm:$0xff] }
 0x6e7   :  { %3524 = vmatpush1.xpose.msra.mxu0 %v9521_v1  ;;  %3595 = vmatpush1.xpose.msra.mxu1 %v9522_v48  ;;  %v3787_v1 = vpack.c.bf16 %v9546_v49, %v9545_v41  ;;  %v9547_v48 = vld [vmem:[#allocation119_spill] sm:$0xff] }
 0x6e8   :  { %3525 = vmatprep.subr.mxu0 %v9523_v56  ;;  %3596 = vmatprep.subr.mxu1 %v9524_v40  ;;  %v9548_v56 = vld [vmem:[#allocation115_spill] sm:$0xff] }
 0x6e9   :  { %v3786_v40 = vpack.c.bf16 %v9548_v56, %v9547_v48 }
 0x6eb   :  { %3526 = vmatpush1.xpose.msra.mxu0 %v9525_v13  ;;  %3597 = vmatpush1.xpose.msra.mxu1 %v9526_v52  ;;  %v9549_v13 = vld [vmem:[#allocation83_spill] sm:$0xff]  ;;  %v9550_v52 = vld [vmem:[#allocation20_spill] sm:$0xff] }
 0x6ec   :  { %3527 = vmatprep.subr.mxu0 %v9527_v28  ;;  %3598 = vmatprep.subr.mxu1 %v9528_v22  ;;  %v3784_v28 = vpack.c.bf16 %v9550_v52, %v9549_v13  ;;  %v9551_v22 = vmov 0   ;;  %v3653_v13 = vld [vmem:[%s8578_s6] sm:$0x1] }
 0x6ef   :  { %3528 = vmatpush1.xpose.msra.mxu0 %v9529_v26  ;;  %3599 = vmatpush1.xpose.msra.mxu1 %v9530_v2  ;;  %v9553_v26 = vld [vmem:[#allocation95_spill] sm:$0xff] }
 0x6f0   :  { %3529 = vmatprep.subr.mxu0 %v9531_v30  ;;  %3600 = vmatprep.subr.mxu1 %v9532_v59  ;;  %v9554_v30 = vld [vmem:[#allocation131_spill] sm:$0xff] }
 0x6f1   :  { %v9555_v59 = vld [vmem:[#allocation123_spill] sm:$0xff] }
 0x6f3   :  { %3530 = vmatpush1.xpose.msra.mxu0 %v9533_v6  ;;  %3601 = vmatpush1.xpose.msra.mxu1 %v9534_v16  ;;  %v3783_v6 = vpack.c.bf16 %v9555_v59, %v9554_v30  ;;  %v9556_v16 = vld [vmem:[#allocation136_spill] sm:$0xff]  ;;  %v9568_v59 = vld [vmem:[#allocation3_spill] sm:$0xff] }
 0x6f4   :  { %3531 = vmatprep.subr.mxu0 %v2676_v7  ;;  %3602 = vmatprep.subr.mxu1 %v2749_v3  ;;  %v3075_v7 = vmul.f32 %v9477_v25, %v9477_v25  ;;  %v3058_v3 = vmul.f32 %v9478_v20, %v9478_v20  ;;  %v3044_v25 = vmul.f32 %v9483_v50, %v9483_v50 }
 0x6f5   :  { %v3041_v20 = vmul.f32 %v9484_v35, %v9484_v35  ;;  %v3027_v50 = vmul.f32 %v9489_v57, %v9489_v57  ;;  %v3010_v35 = vmul.f32 %v9490_v31, %v9490_v31  ;;  %v2996_v57 = vmul.f32 %v9499_v45, %v9499_v45 }
 0x6f6   :  { %v2993_v31 = vmul.f32 %v9505_v38, %v9505_v38  ;;  %v2979_v45 = vmul.f32 %v8093_v36, %v8093_v36  ;;  %v2964_v38 = vmul.f32 %v8099_v42, %v8099_v42  ;;  %v9538_v36 = vld [vmem:[#allocation101_spill] sm:$0xff]  ;;  %v9540_v42 = vld [vmem:[#allocation99_spill] sm:$0xff] }
 0x6f7   :  { %3532 = vmatpush1.xpose.msra.mxu0 %v2674_v46  ;;  %3603 = vmatpush1.xpose.msra.mxu1 %v2747_v37  ;;  %v3060_v46 = vmul.f32 %v9479_v53, %v9479_v53  ;;  %v3043_v53 = vmul.f32 %v9485_v62, %v9485_v62  ;;  %v3012_v62 = vmul.f32 %v9491_v9, %v9491_v9 }
 0x6f8   :  { %3533 = vmatprep.subr.mxu0 %v2672_v0  ;;  %3604 = vmatprep.subr.mxu1 %v2745_v27  ;;  %v2995_v9 = vmul.f32 %v9506_v51, %v9506_v51  ;;  %v2962_v37 = vmul.f32 %v8096_v55, %v8096_v55  ;;  %v9535_v51 = vld [vmem:[#allocation97_spill] sm:$0xff]  ;;  %v9539_v55 = vld [vmem:[#allocation106_spill] sm:$0xff] }
 0x6f9   :  { %v9536_v0 = vld [vmem:[#allocation93_spill] sm:$0xff] }
 0x6fa   :  { %v3789_v27 = vpack.c.bf16 %v9536_v0, %v9535_v51 }
 0x6fb   :  { %3534 = vmatpush1.xpose.msra.mxu0 %v2670_v10  ;;  %3605 = vmatpush1.xpose.msra.mxu1 %v2743_v61  ;;  %v3791_v10 = vpack.c.bf16 %v9538_v36, %v9537_v23  ;;  %v3790_v61 = vpack.c.bf16 %v9540_v42, %v9539_v55 }
 0x6fc   :  { %3551 = vmatprep.subr.mxu0 %v3074_v47  ;;  %3622 = vmatprep.subr.mxu1 %v3076_v19  ;;  %v9557_v47 = vld [vmem:[#allocation128_spill] sm:$0xff] }
 0x6fd   :  { %v3782_v19 = vpack.c.bf16 %v9557_v47, %v9556_v16 }
 0x6ff   :  { %3552 = vmatpush2.xpose.msra.mxu0 %v3073_v17  ;;  %3623 = vmatpush2.xpose.msra.mxu1 %v3075_v7  ;;  %v9558_v17 = vld [vmem:[#allocation25_spill] sm:$0xff]  ;;  %v9559_v7 = vld [vmem:[#allocation22_spill] sm:$0xff] }
 0x700   :  { %3553 = vmatprep.subr.mxu0 %v3058_v3  ;;  %3624 = vmatprep.subr.mxu1 %v3060_v46  ;;  %v3780_v3 = vpack.c.bf16 %v9559_v7, %v9558_v17  ;;  %v9560_v46 = vld [vmem:[#allocation145_spill] sm:$0xff] }
 0x703   :  { %3554 = vmatpush2.xpose.msra.mxu0 %v3057_v15  ;;  %3625 = vmatpush2.xpose.msra.mxu1 %v3059_v12  ;;  %v9561_v15 = vld [vmem:[#allocation138_spill] sm:$0xff] }
 0x704   :  { %3555 = vmatprep.subr.mxu0 %v3042_v32  ;;  %3626 = vmatprep.subr.mxu1 %v3044_v25  ;;  %v3777_v12 = vpack.c.bf16 %v9561_v15, %v9560_v46  ;;  %v9562_v32 = vld [vmem:[#allocation146_spill] sm:$0xff]  ;;  %v9563_v25 = vld [vmem:[#allocation139_spill] sm:$0xff]  ;;  %v3663_v46 = vld [vmem:[%s8580_s8 + $0x18] sm:$0xff] }
 0x707   :  { %3556 = vmatpush2.xpose.msra.mxu0 %v3041_v20  ;;  %3627 = vmatpush2.xpose.msra.mxu1 %v3043_v53  ;;  %v3779_v20 = vpack.c.bf16 %v9563_v25, %v9562_v32  ;;  %v9564_v53 = vld [vmem:[#allocation149_spill] sm:$0xff] }
 0x708   :  { %3557 = vmatprep.subr.mxu0 %v3026_v63  ;;  %3628 = vmatprep.subr.mxu1 %v3028_v4  ;;  %v9565_v63 = vld [vmem:[#allocation143_spill] sm:$0xff] }
 0x709   :  { %v3778_v4 = vpack.c.bf16 %v9565_v63, %v9564_v53 }
 0x70b   :  { %3558 = vmatpush2.xpose.msra.mxu0 %v3025_v34  ;;  %3629 = vmatpush2.xpose.msra.mxu1 %v3027_v50  ;;  %v9566_v34 = vld [vmem:[#allocation28_spill] sm:$0xff]  ;;  %v9567_v50 = vld [vmem:[#allocation31_spill] sm:$0xff] }
 0x70c   :  { %3559 = vmatprep.subr.mxu0 %v3010_v35  ;;  %3630 = vmatprep.subr.mxu1 %v3012_v62  ;;  %v3776_v35 = vpack.c.bf16 %v9567_v50, %v9566_v34  ;;  %v3143_v62 = vpop.f32.mrf.mxu0  ;;  %v3664_v50 = vld [vmem:[%s8580_s8 + $0x20] sm:$0xff] }
 0x70f   :  { %3560 = vmatpush2.xpose.msra.mxu0 %v3009_v24  ;;  %3631 = vmatpush2.xpose.msra.mxu1 %v3011_v33  ;;  %v3214_v24 = vpop.f32.mrf.mxu1  ;;  %v3145_v33 = vpop.f32.mrf.mxu0 }
 0x710   :  { %3561 = vmatprep.subr.mxu0 %v2994_v5  ;;  %3632 = vmatprep.subr.mxu1 %v2996_v57  ;;  %v3215_v57 = vadd.f32 %v3214_v24, %v3143_v62 }
 0x713   :  { %3562 = vmatpush2.xpose.msra.mxu0 %v2993_v31  ;;  %3633 = vmatpush2.xpose.msra.mxu1 %v2995_v9  ;;  %v3216_v31 = vpop.f32.mrf.mxu1 }
 0x714   :  { %3563 = vmatprep.subr.mxu0 %v2978_v39  ;;  %3634 = vmatprep.subr.mxu1 %v2980_v11 }
 0x717   :  { %3564 = vmatpush2.xpose.msra.mxu0 %v2977_v58  ;;  %3635 = vmatpush2.xpose.msra.mxu1 %v2979_v45 }
 0x718   :  { %3565 = vmatprep.subr.mxu0 %v2962_v37  ;;  %3636 = vmatprep.subr.mxu1 %v2964_v38 }
 0x71b   :  { %3566 = vmatpush2.xpose.msra.mxu0 %v2961_v21  ;;  %3637 = vmatpush2.xpose.msra.mxu1 %v2963_v60 }
 0x71c   :  { %3824 = vmatprep.subr.bf16.mxu0 %v3789_v27  ;;  %3937 = vmatprep.subr.bf16.mxu1 %v3791_v10 }
 0x71e   :  { %3568 = vmatmul.mubr.f32.vlgmr.msra.gmra.mxu0 %v9475_v54  ;;  %3639 = vmatmul.mubr.f32.vlgmr.msra.gmra.mxu1 %v9475_v54  ;;  %v9552_v54 = vld [vmem:[#allocation130_spill] sm:$0xff]  ;;  %v3285_v5 = vpop.f32.mrf.mxu0  ;;  %v3356_v39 = vpop.f32.mrf.mxu1 }
 0x71f   :  { %3825 = vmatpush1.bf16.msra.mxu0 %v3788_v29  ;;  %3938 = vmatpush1.bf16.msra.mxu1 %v3790_v61  ;;  %v3781_v2 = vpack.c.bf16 %v9553_v26, %v9552_v54  ;;  %v3286_v9 = vadd.f32 %v3285_v5, %v3215_v57  ;;  %v3217_v61 = vadd.f32 %v3216_v31, %v3145_v33  ;;  %v3657_v54 = vld [vmem:[%s8579_s7] sm:$0x1] }
 0x720   :  { %3826 = vmatprep.subr.bf16.mxu0 %v3785_v14  ;;  %3939 = vmatprep.subr.bf16.mxu1 %v3787_v1  ;;  %v3287_v11 = vpop.f32.mrf.mxu0  ;;  %v3358_v37 = vpop.f32.mrf.mxu1  ;;  %v3660_v26 = vld [vmem:[%s8580_s8] sm:$0xff] }
 0x721   :  { %3848 = vmatprep.mubr.bf16.mxu0 %v9551_v22  ;;  %3961 = vmatprep.mubr.bf16.mxu1 %v9551_v22  ;;  %v3357_v45 = vadd.f32 %v3356_v39, %v3286_v9  ;;  %v3288_v18 = vadd.f32 %v3287_v11, %v3217_v61  ;;  %v3666_v9 = vld [vmem:[%s8580_s8 + $0x30] sm:$0xff]  ;;  %v3667_v39 = vld [vmem:[%s8580_s8 + $0x38] sm:$0xff] }
 0x723   :  { %3827 = vmatpush1.bf16.msra.mxu0 %v3784_v28  ;;  %3940 = vmatpush1.bf16.msra.mxu1 %v3786_v40  ;;  %v3359_v8 = vadd.f32 %v3358_v37, %v3288_v18 }
 0x724   :  { %3828 = vmatprep.subr.bf16.mxu0 %v3781_v2  ;;  %3941 = vmatprep.subr.bf16.mxu1 %v3783_v6  ;;  %v3661_v2 = vld [vmem:[%s8580_s8 + $0x8] sm:$0xff] }
 0x727   :  { %3829 = vmatpush1.bf16.msra.mxu0 %v3780_v3  ;;  %3942 = vmatpush1.bf16.msra.mxu1 %v3782_v19  ;;  %v3662_v3 = vld [vmem:[%s8580_s8 + $0x10] sm:$0xff] }
 0x728   :  { %3830 = vmatprep.subr.bf16.mxu0 %v3777_v12  ;;  %3943 = vmatprep.subr.bf16.mxu1 %v3779_v20 }
 0x72b   :  { %3831 = vmatpush1.bf16.msra.mxu0 %v3776_v35  ;;  %3944 = vmatpush1.bf16.msra.mxu1 %v3778_v4  ;;  %v3665_v35 = vld [vmem:[%s8580_s8 + $0x28] sm:$0xff] }
 0x77e   :  { %v3427_v58 = vpop.f32.mrf.mxu0  ;;  %v3498_v21 = vpop.f32.mrf.mxu1 }
 0x77f   :  { %v3428_v38 = vadd.f32 %v3427_v58, %v3357_v45 }
 0x780   :  { %v3429_v60 = vpop.f32.mrf.mxu0  ;;  %v3500_v0 = vpop.f32.mrf.mxu1 }
 0x781   :  { %v3499_v51 = vadd.f32 %v3498_v21, %v3428_v38  ;;  %v3430_v29 = vadd.f32 %v3429_v60, %v3359_v8  ;;  %v3668_v21 = vld [vmem:[%s8580_s8 + $0x40] sm:$0xff]  ;;  %v3669_v60 = vld [vmem:[%s8580_s8 + $0x48] sm:$0xff] }
 0x783   :  { %v3501_v44 = vadd.f32 %v3500_v0, %v3430_v29 }
 0x7de   :  { %v3569_v27 = vpop.f32.mrf.mxu0  ;;  %v3640_v36 = vpop.f32.mrf.mxu1 }
 0x7df   :  { %v3570_v23 = vadd.f32 %v3569_v27, %v3499_v51 }
 0x7e0   :  { %v3571_v43 = vpop.f32.mrf.mxu0  ;;  %v3642_v41 = vpop.f32.mrf.mxu1 }
 0x7e1   :  { %v3641_v10 = vadd.f32 %v3640_v36, %v3570_v23  ;;  %v3572_v14 = vadd.f32 %v3571_v43, %v3501_v44  ;;  %v3672_v44 = vld [vmem:[%s8580_s8 + $0x60] sm:$0xff] }
 0x7e3   :  { %v3645_v55 = vmul.f32 0.00048828125, %v3641_v10  ;;  %v3643_v49 = vadd.f32 %v3642_v41, %v3572_v14  ;;  %v3673_v14 = vld [vmem:[%s8580_s8 + $0x68] sm:$0xff] }
 0x7e5   :  { %v3647_v42 = vmul.f32 %v3645_v55, %v3645_v55  ;;  %v3646_v1 = vmul.f32 0.00048828125, %v3643_v49 }
 0x7e7   :  { %3649 = vrot.lane.b32.xlu0 %v3647_v42, %s4274_s1  ;;  %v3671_v42 = vld [vmem:[%s8580_s8 + $0x58] sm:$0xff] }
 0x859   :  { %v3650_v48 = vpop.permute.xlu0 %3649 }
 0x85a   :  { %v3652_v56 = vsub.f32 %v3646_v1, %v3650_v48 }
 0x85c   :  { %v3654_v40 = vadd.f32 0.001, %v3652_v56 }
 0x85e   :  { %4270 = vrsqrt.f32 %v3654_v40 }
 0x86b   :  { %v4271_v52 = vpop.eup %4270 }
 0x86c   :  { %v3656_v28 = vmul.f32 %v4271_v52, %v3653_v13  ;;  %v3674_v13 = vld [vmem:[%s8580_s8 + $0x70] sm:$0xff]  ;;  %v3675_v52 = vld [vmem:[%s8580_s8 + $0x78] sm:$0xff] }
 0x86e   :  { %v3658_v30 = vmul.f32 %v3656_v28, %v3645_v55  ;;  %v8255_v6 = vrot.slane %v3656_v28, %v9568_v59  ;;  %v3670_v55 = vld [vmem:[%s8580_s8 + $0x50] sm:$0xff] }
 0x870   :  { %v3659_v16 = vsub.f32 %v3657_v54, %v3658_v30  ;;  %v3682_v47 = vmul.f32 %v8255_v6, %v3660_v26  ;;  %v3683_v19 = vmul.f32 %v8255_v6, %v3661_v2  ;;  %v3684_v32 = vmul.f32 %v8255_v6, %v3662_v3 }
 0x871   :  { %v3685_v25 = vmul.f32 %v8255_v6, %v3663_v46  ;;  %v3686_v57 = vmul.f32 %v8255_v6, %v3664_v50  ;;  %v3687_v31 = vmul.f32 %v8255_v6, %v3665_v35  ;;  %v3688_v36 = vmul.f32 %v8255_v6, %v3666_v9 }
 0x872   :  { %v8260_v17 = vrot.slane %v3659_v16, %v9568_v59  ;;  %v3698_v7 = vpack.c.bf16 %v3683_v19, %v3682_v47  ;;  %v3689_v10 = vmul.f32 %v8255_v6, %v3667_v39  ;;  %v3690_v56 = vmul.f32 %v8255_v6, %v3668_v21 }
 0x873   :  { %v3699_v34 = vpack.c.bf16 %v3685_v25, %v3684_v32  ;;  %v3700_v38 = vpack.c.bf16 %v3687_v31, %v3686_v57  ;;  %v3691_v40 = vmul.f32 %v8255_v6, %v3669_v60  ;;  %v3692_v47 = vmul.f32 %v8255_v6, %v3670_v55 }
 0x874   :  { %4242 = vmatmul.mubr.msk.bf16.vlgmr.msra.gmra.mxu0 %vm529_vm0, %v3698_v7  ;;  %4250 = vmatmul.mubr.msk.bf16.vlgmr.msra.gmra.mxu1 %vm529_vm0, %v3698_v7  ;;  %v3713_v15 = vmul.f32 %v8260_v17, %v3661_v2  ;;  %v3712_v12 = vmul.f32 %v8260_v17, %v3660_v26  ;;  %v3714_v63 = vmul.f32 %v8260_v17, %v3662_v3 }
 0x875   :  { %3971 = vmatprep.mubr.bf16.mxu1 %v9551_v22  ;;  %3858 = vmatprep.mubr.bf16.mxu0 %v9551_v22  ;;  %v3715_v4 = vmul.f32 %v8260_v17, %v3663_v46  ;;  %v3716_v33 = vmul.f32 %v8260_v17, %v3664_v50  ;;  %v3717_v5 = vmul.f32 %v8260_v17, %v3665_v35 }
 0x876   :  { %v3731_v20 = vsel %vm529_vm0, %v3713_v15, 0.0  ;;  %v3728_v53 = vsel %vm529_vm0, %v3712_v12, 0.0  ;;  %v3734_v62 = vsel %vm529_vm0, %v3714_v63, 0.0  ;;  %v3718_v45 = vmul.f32 %v8260_v17, %v3666_v9 }
 0x877   :  { %3732 = vadd.xlane.f32.xlu0 %v3731_v20  ;;  %3729 = vadd.xlane.f32.xlu1 %v3728_v53  ;;  %v3737_v24 = vsel %vm529_vm0, %v3715_v4, 0.0  ;;  %v3740_v11 = vsel %vm529_vm0, %v3716_v33, 0.0  ;;  %v3743_v58 = vsel %vm529_vm0, %v3717_v5, 0.0  ;;  %v3719_v37 = vmul.f32 %v8260_v17, %v3667_v39 }
 0x878   :  { %v3746_v51 = vsel %vm529_vm0, %v3718_v45, 0.0  ;;  %v3720_v27 = vmul.f32 %v8260_v17, %v3668_v21  ;;  %v3721_v23 = vmul.f32 %v8260_v17, %v3669_v60  ;;  %v3722_v8 = vmul.f32 %v8260_v17, %v3670_v55 }
 0x879   :  { %v3749_v0 = vsel %vm529_vm0, %v3719_v37, 0.0  ;;  %v3723_v29 = vmul.f32 %v8260_v17, %v3671_v42  ;;  %v3701_v43 = vpack.c.bf16 %v3689_v10, %v3688_v36  ;;  %v3724_v1 = vmul.f32 %v8260_v17, %v3672_v44 }
 0x87a   :  { %v3752_v61 = vsel %vm529_vm0, %v3720_v27, 0.0  ;;  %v3755_v18 = vsel %vm529_vm0, %v3721_v23, 0.0  ;;  %v3758_v41 = vsel %vm529_vm0, %v3722_v8, 0.0  ;;  %v3725_v48 = vmul.f32 %v8260_v17, %v3673_v14 }
 0x87b   :  { %3735 = vadd.xlane.f32.xlu0 %v3734_v62  ;;  %3738 = vadd.xlane.f32.xlu1 %v3737_v24  ;;  %v3761_v49 = vsel %vm529_vm0, %v3723_v29, 0.0  ;;  %v3764_v28 = vsel %vm529_vm0, %v3724_v1, 0.0  ;;  %v3726_v26 = vmul.f32 %v8260_v17, %v3674_v13  ;;  %v3727_v2 = vmul.f32 %v8260_v17, %v3675_v52 }
 0x87c   :  { %4243 = vmatmul.mubr.msk.bf16.gmra.mxu0 %vm529_vm0, %v3699_v34  ;;  %4251 = vmatmul.mubr.msk.bf16.gmra.mxu1 %vm529_vm0, %v3699_v34  ;;  %v3767_v54 = vsel %vm529_vm0, %v3725_v48, 0.0  ;;  %v3702_v30 = vpack.c.bf16 %v3691_v40, %v3690_v56  ;;  %v3693_v19 = vmul.f32 %v8255_v6, %v3671_v42  ;;  %v3694_v7 = vmul.f32 %v8255_v6, %v3672_v44 }
 0x87d   :  { %3981 = vmatprep.mubr.bf16.mxu1 %v9551_v22  ;;  %3868 = vmatprep.mubr.bf16.mxu0 %v9551_v22  ;;  %v3770_v59 = vsel %vm529_vm0, %v3726_v26, 0.0  ;;  %v3773_v16 = vsel %vm529_vm0, %v3727_v2, 0.0  ;;  %v3695_v3 = vmul.f32 %v8255_v6, %v3673_v14  ;;  %v3696_v15 = vmul.f32 %v8255_v6, %v3674_v13 }
 0x87e   :  { %v3703_v17 = vpack.c.bf16 %v3693_v19, %v3692_v47  ;;  %v3697_v12 = vmul.f32 %v8255_v6, %v3675_v52 }
 0x87f   :  { %3741 = vadd.xlane.f32.xlu0 %v3740_v11  ;;  %3744 = vadd.xlane.f32.xlu1 %v3743_v58  ;;  %v3704_v46 = vpack.c.bf16 %v3695_v3, %v3694_v7 }
 0x880   :  { %v3705_v32 = vpack.c.bf16 %v3697_v12, %v3696_v15 }
 0x883   :  { %3747 = vadd.xlane.f32.xlu0 %v3746_v51  ;;  %3750 = vadd.xlane.f32.xlu1 %v3749_v0 }
 0x884   :  { %4244 = vmatmul.mubr.msk.bf16.gmra.mxu0 %vm529_vm0, %v3700_v38  ;;  %4252 = vmatmul.mubr.msk.bf16.gmra.mxu1 %vm529_vm0, %v3700_v38 }
 0x885   :  { %3991 = vmatprep.mubr.bf16.mxu1 %v9551_v22  ;;  %3878 = vmatprep.mubr.bf16.mxu0 %v9551_v22 }
 0x887   :  { %3753 = vadd.xlane.f32.xlu0 %v3752_v61  ;;  %3756 = vadd.xlane.f32.xlu1 %v3755_v18 }
 0x88b   :  { %3759 = vadd.xlane.f32.xlu0 %v3758_v41  ;;  %3762 = vadd.xlane.f32.xlu1 %v3761_v49 }
 0x88c   :  { %4245 = vmatmul.mubr.msk.bf16.gmra.mxu0 %vm529_vm0, %v3701_v43  ;;  %4253 = vmatmul.mubr.msk.bf16.gmra.mxu1 %vm529_vm0, %v3701_v43 }
 0x88d   :  { %4001 = vmatprep.mubr.bf16.mxu1 %v9551_v22  ;;  %3888 = vmatprep.mubr.bf16.mxu0 %v9551_v22 }
 0x88f   :  { %3765 = vadd.xlane.f32.xlu0 %v3764_v28  ;;  %3768 = vadd.xlane.f32.xlu1 %v3767_v54 }
 0x893   :  { %3771 = vadd.xlane.f32.xlu0 %v3770_v59  ;;  %3774 = vadd.xlane.f32.xlu1 %v3773_v16 }
 0x894   :  { %4246 = vmatmul.mubr.msk.bf16.gmra.mxu0 %vm529_vm0, %v3702_v30  ;;  %4254 = vmatmul.mubr.msk.bf16.gmra.mxu1 %vm529_vm0, %v3702_v30 }
 0x895   :  { %3898 = vmatprep.mubr.bf16.mxu0 %v9551_v22  ;;  %4011 = vmatprep.mubr.bf16.mxu1 %v9551_v22 }
 0x89c   :  { %4247 = vmatmul.mubr.msk.bf16.gmra.mxu0 %vm529_vm0, %v3703_v17  ;;  %4255 = vmatmul.mubr.msk.bf16.gmra.mxu1 %vm529_vm0, %v3703_v17 }
 0x89d   :  { %3908 = vmatprep.mubr.bf16.mxu0 %v9551_v22  ;;  %4021 = vmatprep.mubr.bf16.mxu1 %v9551_v22 }
 0x8a4   :  { %4248 = vmatmul.mubr.msk.bf16.gmra.mxu0 %vm529_vm0, %v3704_v46  ;;  %4256 = vmatmul.mubr.msk.bf16.gmra.mxu1 %vm529_vm0, %v3704_v46 }
 0x8a5   :  { %3918 = vmatprep.mubr.bf16.mxu0 %v9551_v22  ;;  %4031 = vmatprep.mubr.bf16.mxu1 %v9551_v22 }
 0x8ac   :  { %4249 = vmatmul.mubr.msk.bf16.gmra.mxu0 %vm529_vm0, %v3705_v32  ;;  %4257 = vmatmul.mubr.msk.bf16.gmra.mxu1 %vm529_vm0, %v3705_v32 }
 0x900   :  { %v3730_v25 = vpop.xlane.xlu1 %3729  ;;  %v3733_v63 = vpop.xlane.xlu0 %3732 }
 0x904   :  { %v3736_v9 = vpop.xlane.xlu0 %3735  ;;  %v3739_v51 = vpop.xlane.xlu1 %3738 }
 0x908   :  { %v3742_v18 = vpop.xlane.xlu0 %3741  ;;  %v3745_v48 = vpop.xlane.xlu1 %3744 }
 0x90c   :  { %v3748_v30 = vpop.xlane.xlu0 %3747  ;;  %v3751_v15 = vpop.xlane.xlu1 %3750 }
 0x934   :  { %v3850_v20 = vpop.f32.mrf.mxu0  ;;  %v3963_v53 = vpop.f32.mrf.mxu1 }
 0x935   :  { %v3851_v4 = vadd.f32 %v3850_v20, %v3730_v25  ;;  %v3964_v34 = vadd.f32 %v3963_v53, %v3730_v25 }
 0x936   :  { %v3852_v50 = vpop.f32.mrf.mxu0  ;;  %v3965_v35 = vpop.f32.mrf.mxu1 }
 0x937   :  { %4042 = vst [vmem:[%s8581_s9] sm:$0xff] %v3851_v4  ;;  %4044 = vst [vmem:[%s8581_s9 + $0x10] sm:$0xff] %v3964_v34  ;;  %v3853_v22 = vadd.f32 %v3852_v50, %v3730_v25  ;;  %v3966_v6 = vadd.f32 %v3965_v35, %v3730_v25  ;;  %v3754_v50 = vpop.xlane.xlu0 %3753 }
 0x938   :  { %v3854_v62 = vpop.f32.mrf.mxu0  ;;  %v3967_v24 = vpop.f32.mrf.mxu1 }
 0x939   :  { %4043 = vst [vmem:[%s8581_s9 + $0x8] sm:$0xff] %v3853_v22  ;;  %4045 = vst [vmem:[%s8581_s9 + $0x18] sm:$0xff] %v3966_v6  ;;  %v3855_v33 = vadd.f32 %v3854_v62, %v3733_v63  ;;  %v3968_v5 = vadd.f32 %v3967_v24, %v3733_v63 }
 0x93a   :  { %v3856_v57 = vpop.f32.mrf.mxu0  ;;  %v3969_v31 = vpop.f32.mrf.mxu1 }
 0x93b   :  { %4046 = vst [vmem:[%s8581_s9 + $0x20] sm:$0xff] %v3855_v33  ;;  %4048 = vst [vmem:[%s8581_s9 + $0x30] sm:$0xff] %v3968_v5  ;;  %v3857_v39 = vadd.f32 %v3856_v57, %v3733_v63  ;;  %v3970_v11 = vadd.f32 %v3969_v31, %v3733_v63  ;;  %v3757_v31 = vpop.xlane.xlu1 %3756 }
 0x93c   :  { %v3860_v58 = vpop.f32.mrf.mxu0  ;;  %v3973_v45 = vpop.f32.mrf.mxu1 }
 0x93d   :  { %4047 = vst [vmem:[%s8581_s9 + $0x28] sm:$0xff] %v3857_v39  ;;  %4049 = vst [vmem:[%s8581_s9 + $0x38] sm:$0xff] %v3970_v11  ;;  %v3861_v37 = vadd.f32 %v3860_v58, %v3736_v9  ;;  %v3974_v38 = vadd.f32 %v3973_v45, %v3736_v9 }
 0x93e   :  { %v3862_v21 = vpop.f32.mrf.mxu0  ;;  %v3975_v60 = vpop.f32.mrf.mxu1 }
 0x93f   :  { %4050 = vst [vmem:[%s8581_s9 + $0x40] sm:$0xff] %v3861_v37  ;;  %4052 = vst [vmem:[%s8581_s9 + $0x50] sm:$0xff] %v3974_v38  ;;  %v3863_v0 = vadd.f32 %v3862_v21, %v3736_v9  ;;  %v3976_v27 = vadd.f32 %v3975_v60, %v3736_v9  ;;  %v3760_v60 = vpop.xlane.xlu0 %3759 }
 0x940   :  { %v3864_v23 = vpop.f32.mrf.mxu0  ;;  %v3977_v36 = vpop.f32.mrf.mxu1 }
 0x941   :  { %4051 = vst [vmem:[%s8581_s9 + $0x48] sm:$0xff] %v3863_v0  ;;  %4053 = vst [vmem:[%s8581_s9 + $0x58] sm:$0xff] %v3976_v27  ;;  %v3865_v10 = vadd.f32 %v3864_v23, %v3739_v51  ;;  %v3978_v55 = vadd.f32 %v3977_v36, %v3739_v51 }
 0x942   :  { %v3866_v42 = vpop.f32.mrf.mxu0  ;;  %v3979_v61 = vpop.f32.mrf.mxu1 }
 0x943   :  { %4054 = vst [vmem:[%s8581_s9 + $0x60] sm:$0xff] %v3865_v10  ;;  %4056 = vst [vmem:[%s8581_s9 + $0x70] sm:$0xff] %v3978_v55  ;;  %v3867_v8 = vadd.f32 %v3866_v42, %v3739_v51  ;;  %v3980_v29 = vadd.f32 %v3979_v61, %v3739_v51  ;;  %v3763_v61 = vpop.xlane.xlu1 %3762 }
 0x944   :  { %v3870_v43 = vpop.f32.mrf.mxu0  ;;  %v3983_v44 = vpop.f32.mrf.mxu1 }
 0x945   :  { %4055 = vst [vmem:[%s8581_s9 + $0x68] sm:$0xff] %v3867_v8  ;;  %4057 = vst [vmem:[%s8581_s9 + $0x78] sm:$0xff] %v3980_v29  ;;  %v3871_v14 = vadd.f32 %v3870_v43, %v3742_v18  ;;  %v3984_v41 = vadd.f32 %v3983_v44, %v3742_v18 }
 0x946   :  { %v3872_v49 = vpop.f32.mrf.mxu0  ;;  %v3985_v1 = vpop.f32.mrf.mxu1 }
 0x947   :  { %4058 = vst [vmem:[%s8581_s9 + $0x80] sm:$0xff] %v3871_v14  ;;  %4060 = vst [vmem:[%s8581_s9 + $0x90] sm:$0xff] %v3984_v41  ;;  %v3873_v56 = vadd.f32 %v3872_v49, %v3742_v18  ;;  %v3986_v40 = vadd.f32 %v3985_v1, %v3742_v18  ;;  %v3766_v1 = vpop.xlane.xlu0 %3765 }
 0x948   :  { %v3874_v13 = vpop.f32.mrf.mxu0  ;;  %v3987_v52 = vpop.f32.mrf.mxu1 }
 0x949   :  { %4059 = vst [vmem:[%s8581_s9 + $0x88] sm:$0xff] %v3873_v56  ;;  %4061 = vst [vmem:[%s8581_s9 + $0x98] sm:$0xff] %v3986_v40  ;;  %v3875_v28 = vadd.f32 %v3874_v13, %v3745_v48  ;;  %v3988_v54 = vadd.f32 %v3987_v52, %v3745_v48 }
 0x94a   :  { %v3876_v26 = vpop.f32.mrf.mxu0  ;;  %v3989_v2 = vpop.f32.mrf.mxu1 }
 0x94b   :  { %4062 = vst [vmem:[%s8581_s9 + $0xa0] sm:$0xff] %v3875_v28  ;;  %4064 = vst [vmem:[%s8581_s9 + $0xb0] sm:$0xff] %v3988_v54  ;;  %v3877_v59 = vadd.f32 %v3876_v26, %v3745_v48  ;;  %v3990_v16 = vadd.f32 %v3989_v2, %v3745_v48  ;;  %v3769_v2 = vpop.xlane.xlu1 %3768 }
 0x94c   :  { %v3880_v47 = vpop.f32.mrf.mxu0  ;;  %v3993_v19 = vpop.f32.mrf.mxu1 }
 0x94d   :  { %4063 = vst [vmem:[%s8581_s9 + $0xa8] sm:$0xff] %v3877_v59  ;;  %4065 = vst [vmem:[%s8581_s9 + $0xb8] sm:$0xff] %v3990_v16  ;;  %v3881_v17 = vadd.f32 %v3880_v47, %v3748_v30  ;;  %v3994_v7 = vadd.f32 %v3993_v19, %v3748_v30 }
 0x94e   :  { %v3882_v3 = vpop.f32.mrf.mxu0  ;;  %v3995_v46 = vpop.f32.mrf.mxu1 }
 0x94f   :  { %4066 = vst [vmem:[%s8581_s9 + $0xc0] sm:$0xff] %v3881_v17  ;;  %4068 = vst [vmem:[%s8581_s9 + $0xd0] sm:$0xff] %v3994_v7  ;;  %v3883_v12 = vadd.f32 %v3882_v3, %v3748_v30  ;;  %v3996_v32 = vadd.f32 %v3995_v46, %v3748_v30  ;;  %v3772_v46 = vpop.xlane.xlu0 %3771 }
 0x950   :  { %v3884_v25 = vpop.f32.mrf.mxu0  ;;  %v3997_v20 = vpop.f32.mrf.mxu1 }
 0x951   :  { %4067 = vst [vmem:[%s8581_s9 + $0xc8] sm:$0xff] %v3883_v12  ;;  %4069 = vst [vmem:[%s8581_s9 + $0xd8] sm:$0xff] %v3996_v32  ;;  %v3885_v53 = vadd.f32 %v3884_v25, %v3751_v15  ;;  %v3998_v63 = vadd.f32 %v3997_v20, %v3751_v15 }
 0x952   :  { %v3886_v4 = vpop.f32.mrf.mxu0  ;;  %v3999_v34 = vpop.f32.mrf.mxu1 }
 0x953   :  { %4070 = vst [vmem:[%s8581_s9 + $0xe0] sm:$0xff] %v3885_v53  ;;  %4072 = vst [vmem:[%s8581_s9 + $0xf0] sm:$0xff] %v3998_v63  ;;  %v3887_v35 = vadd.f32 %v3886_v4, %v3751_v15  ;;  %v4000_v22 = vadd.f32 %v3999_v34, %v3751_v15  ;;  %v3775_v34 = vpop.xlane.xlu1 %3774 }
 0x954   :  { %v3890_v6 = vpop.f32.mrf.mxu0  ;;  %v4003_v62 = vpop.f32.mrf.mxu1 }
 0x955   :  { %4071 = vst [vmem:[%s8581_s9 + $0xe8] sm:$0xff] %v3887_v35  ;;  %4073 = vst [vmem:[%s8581_s9 + $0xf8] sm:$0xff] %v4000_v22  ;;  %v3891_v24 = vadd.f32 %v3890_v6, %v3754_v50  ;;  %v4004_v33 = vadd.f32 %v4003_v62, %v3754_v50 }
 0x956   :  { %v3892_v5 = vpop.f32.mrf.mxu0  ;;  %v4005_v57 = vpop.f32.mrf.mxu1 }
 0x957   :  { %4074 = vst [vmem:[%s8581_s9 + $0x100] sm:$0xff] %v3891_v24  ;;  %4076 = vst [vmem:[%s8581_s9 + $0x110] sm:$0xff] %v4004_v33  ;;  %v3893_v9 = vadd.f32 %v3892_v5, %v3754_v50  ;;  %v4006_v39 = vadd.f32 %v4005_v57, %v3754_v50 }
 0x958   :  { %v3894_v11 = vpop.f32.mrf.mxu0  ;;  %v4007_v58 = vpop.f32.mrf.mxu1 }
 0x959   :  { %4075 = vst [vmem:[%s8581_s9 + $0x108] sm:$0xff] %v3893_v9  ;;  %4077 = vst [vmem:[%s8581_s9 + $0x118] sm:$0xff] %v4006_v39  ;;  %v3895_v45 = vadd.f32 %v3894_v11, %v3757_v31  ;;  %v4008_v37 = vadd.f32 %v4007_v58, %v3757_v31 }
 0x95a   :  { %v3896_v38 = vpop.f32.mrf.mxu0  ;;  %v4009_v21 = vpop.f32.mrf.mxu1 }
 0x95b   :  { %4078 = vst [vmem:[%s8581_s9 + $0x120] sm:$0xff] %v3895_v45  ;;  %4080 = vst [vmem:[%s8581_s9 + $0x130] sm:$0xff] %v4008_v37  ;;  %v3897_v51 = vadd.f32 %v3896_v38, %v3757_v31  ;;  %v4010_v0 = vadd.f32 %v4009_v21, %v3757_v31 }
 0x95c   :  { %v3900_v27 = vpop.f32.mrf.mxu0  ;;  %v4013_v23 = vpop.f32.mrf.mxu1 }
 0x95d   :  { %4079 = vst [vmem:[%s8581_s9 + $0x128] sm:$0xff] %v3897_v51  ;;  %4081 = vst [vmem:[%s8581_s9 + $0x138] sm:$0xff] %v4010_v0  ;;  %v3901_v36 = vadd.f32 %v3900_v27, %v3760_v60  ;;  %v4014_v10 = vadd.f32 %v4013_v23, %v3760_v60 }
 0x95e   :  { %v3902_v55 = vpop.f32.mrf.mxu0  ;;  %v4015_v42 = vpop.f32.mrf.mxu1 }
 0x95f   :  { %4082 = vst [vmem:[%s8581_s9 + $0x140] sm:$0xff] %v3901_v36  ;;  %4084 = vst [vmem:[%s8581_s9 + $0x150] sm:$0xff] %v4014_v10  ;;  %v3903_v18 = vadd.f32 %v3902_v55, %v3760_v60  ;;  %v4016_v8 = vadd.f32 %v4015_v42, %v3760_v60 }
 0x960   :  { %v3904_v29 = vpop.f32.mrf.mxu0  ;;  %v4017_v43 = vpop.f32.mrf.mxu1 }
 0x961   :  { %4083 = vst [vmem:[%s8581_s9 + $0x148] sm:$0xff] %v3903_v18  ;;  %4085 = vst [vmem:[%s8581_s9 + $0x158] sm:$0xff] %v4016_v8  ;;  %v3905_v44 = vadd.f32 %v3904_v29, %v3763_v61  ;;  %v4018_v14 = vadd.f32 %v4017_v43, %v3763_v61 }
 0x962   :  { %v3906_v41 = vpop.f32.mrf.mxu0  ;;  %v4019_v49 = vpop.f32.mrf.mxu1 }
 0x963   :  { %4086 = vst [vmem:[%s8581_s9 + $0x160] sm:$0xff] %v3905_v44  ;;  %4088 = vst [vmem:[%s8581_s9 + $0x170] sm:$0xff] %v4018_v14  ;;  %v3907_v48 = vadd.f32 %v3906_v41, %v3763_v61  ;;  %v4020_v56 = vadd.f32 %v4019_v49, %v3763_v61 }
 0x964   :  { %v3910_v40 = vpop.f32.mrf.mxu0  ;;  %v4023_v13 = vpop.f32.mrf.mxu1 }
 0x965   :  { %4087 = vst [vmem:[%s8581_s9 + $0x168] sm:$0xff] %v3907_v48  ;;  %4089 = vst [vmem:[%s8581_s9 + $0x178] sm:$0xff] %v4020_v56  ;;  %v3911_v52 = vadd.f32 %v3910_v40, %v3766_v1  ;;  %v4024_v28 = vadd.f32 %v4023_v13, %v3766_v1 }
 0x966   :  { %v3912_v54 = vpop.f32.mrf.mxu0  ;;  %v4025_v26 = vpop.f32.mrf.mxu1 }
 0x967   :  { %4090 = vst [vmem:[%s8581_s9 + $0x180] sm:$0xff] %v3911_v52  ;;  %4092 = vst [vmem:[%s8581_s9 + $0x190] sm:$0xff] %v4024_v28  ;;  %v3913_v30 = vadd.f32 %v3912_v54, %v3766_v1  ;;  %v4026_v59 = vadd.f32 %v4025_v26, %v3766_v1 }
 0x968   :  { %v3914_v16 = vpop.f32.mrf.mxu0  ;;  %v4027_v47 = vpop.f32.mrf.mxu1 }
 0x969   :  { %4091 = vst [vmem:[%s8581_s9 + $0x188] sm:$0xff] %v3913_v30  ;;  %4093 = vst [vmem:[%s8581_s9 + $0x198] sm:$0xff] %v4026_v59  ;;  %v3915_v19 = vadd.f32 %v3914_v16, %v3769_v2  ;;  %v4028_v17 = vadd.f32 %v4027_v47, %v3769_v2 }
 0x96a   :  { %v3916_v7 = vpop.f32.mrf.mxu0  ;;  %v4029_v3 = vpop.f32.mrf.mxu1 }
 0x96b   :  { %4094 = vst [vmem:[%s8581_s9 + $0x1a0] sm:$0xff] %v3915_v19  ;;  %4096 = vst [vmem:[%s8581_s9 + $0x1b0] sm:$0xff] %v4028_v17  ;;  %v3917_v15 = vadd.f32 %v3916_v7, %v3769_v2  ;;  %v4030_v12 = vadd.f32 %v4029_v3, %v3769_v2 }
 0x96c   :  { %v3920_v32 = vpop.f32.mrf.mxu0  ;;  %v4033_v25 = vpop.f32.mrf.mxu1 }
 0x96d   :  { %4095 = vst [vmem:[%s8581_s9 + $0x1a8] sm:$0xff] %v3917_v15  ;;  %4097 = vst [vmem:[%s8581_s9 + $0x1b8] sm:$0xff] %v4030_v12  ;;  %v3921_v20 = vadd.f32 %v3920_v32, %v3772_v46  ;;  %v4034_v53 = vadd.f32 %v4033_v25, %v3772_v46 }
 0x96e   :  { %v3922_v63 = vpop.f32.mrf.mxu0  ;;  %v4035_v4 = vpop.f32.mrf.mxu1 }
 0x96f   :  { %4098 = vst [vmem:[%s8581_s9 + $0x1c0] sm:$0xff] %v3921_v20  ;;  %4100 = vst [vmem:[%s8581_s9 + $0x1d0] sm:$0xff] %v4034_v53  ;;  %v3923_v50 = vadd.f32 %v3922_v63, %v3772_v46  ;;  %v4036_v35 = vadd.f32 %v4035_v4, %v3772_v46 }
 0x970   :  { %v3924_v22 = vpop.f32.mrf.mxu0  ;;  %v4037_v6 = vpop.f32.mrf.mxu1 }
 0x971   :  { %4099 = vst [vmem:[%s8581_s9 + $0x1c8] sm:$0xff] %v3923_v50  ;;  %4101 = vst [vmem:[%s8581_s9 + $0x1d8] sm:$0xff] %v4036_v35  ;;  %v3925_v62 = vadd.f32 %v3924_v22, %v3775_v34  ;;  %v4038_v24 = vadd.f32 %v4037_v6, %v3775_v34 }
 0x972   :  { %v3926_v33 = vpop.f32.mrf.mxu0  ;;  %v4039_v5 = vpop.f32.mrf.mxu1 }
 0x973   :  { %4102 = vst [vmem:[%s8581_s9 + $0x1e0] sm:$0xff] %v3925_v62  ;;  %4104 = vst [vmem:[%s8581_s9 + $0x1f0] sm:$0xff] %v4038_v24  ;;  %v3927_v57 = vadd.f32 %v3926_v33, %v3775_v34  ;;  %v4040_v31 = vadd.f32 %v4039_v5, %v3775_v34 }
 0x975   :  { %4103 = vst [vmem:[%s8581_s9 + $0x1e8] sm:$0xff] %v3927_v57  ;;  %4105 = vst [vmem:[%s8581_s9 + $0x1f8] sm:$0xff] %v4040_v31 }

</bundles_post_ra>
